<compile_context>
chip_gen: v7x
topology: tpu7x:2x2x1
jax: 0.10.0
libtpu: 0.0.40
codegen_flags: <defaults>
</compile_context>

<pallas_src>
import functools

import jax
import jax.numpy as jnp
from jax.experimental import pallas as pl
from jax.experimental.pallas import tpu as pltpu

ESP = 1e-5
LANES = 128
SMALL_PROBLEM_BYTES = 256 * 1024   # below this, plain XLA beats a kernel launch
MAX_BLOCK_ROWS = 32768


# ---------------------------------------------------------------------------
# Kernel
# ---------------------------------------------------------------------------
def _gce_kernel(scal_ref, logits_ref, labels_ref, out_ref, *,
                batch_size, block_rows, compute_dtype):
    # scal_ref: (1,2) f32 in SMEM -> [q, 1/(q+esp)]
    q = scal_ref[0, 0]
    inv_q_esp = scal_ref[0, 1]

    x = logits_ref[...]                                  # (TB, C) in input dtype
    if x.dtype != compute_dtype:
        x = x.astype(compute_dtype)                      # f32 upcast only on v5-class
    labels = labels_ref[...]                             # (TB, 1) int32
    tb, c = x.shape

    # row-wise softmax pieces in the compute dtype; sums accumulated in f32
    m = jnp.max(x, axis=-1, keepdims=True)                                   # (TB, 1)
    e = jnp.exp(x - m)                                                       # (TB, C) bulk EUP op
    s = jnp.sum(e, axis=-1, keepdims=True, dtype=jnp.float32)                # (TB, 1) f32

    # true-class term reuses the exp tile (no second pass over logits)
    class_iota = jax.lax.broadcasted_iota(jnp.int32, (tb, c), 1)
    onehot = class_iota == labels                                            # (TB, C) bool
    e_y = jnp.sum(jnp.where(onehot, e, 0.0), axis=-1, keepdims=True,
                  dtype=jnp.float32)                                         # (TB, 1) f32

    # log p_y = log(e_y) - log(s)   (s >= 1 so log(s) is finite; e_y underflow
    # to 0 maps to loss -> 1/(q+esp), same as the reference's p_y^q with p_y=0)
    log_p_y = jnp.log(e_y) - jnp.log(s)                                      # (TB, 1)
    # GCE per row: (1 - p_y^q) / (q + esp).  Kept as (1 - exp(...)) for exact
    # parity with the PyTorch module (expm1 would be more accurate near q=0).
    loss_row = (1.0 - jnp.exp(q * log_p_y)) * inv_q_esp                      # (TB, 1)

    # mask rows past the true batch (last, padded tile); select is NaN-safe
    row_ids = pl.program_id(0) * block_rows + jax.lax.broadcasted_iota(
        jnp.int32, (tb, 1), 0)
    loss_row = jnp.where(row_ids < batch_size, loss_row, 0.0)

    partial = jnp.sum(loss_row)                                              # scalar
    # lane-dense (1,128) block store (unmasked vst); wrapper reads lane 0
    out_ref[...] = jnp.full((1, LANES), partial, dtype=jnp.float32)


# ---------------------------------------------------------------------------
# Generation-aware sizing
# ---------------------------------------------------------------------------
def _hw_config():
    """Return (vmem_limit_bytes, tile_budget_bytes, per_buffer_cap_bytes,
    f32_only_math) for the current TPU generation."""
    try:
        vmem_cap = int(pltpu.get_tpu_info().vmem_capacity_bytes)
    except Exception:
        vmem_cap = 64 * 1024 * 1024        # conservative (v7x-sized) fallback

    kind = ""
    try:
        kind = jax.devices()[0].device_kind.lower()
    except Exception:
        pass
    # pre-v6 chips have no bf16 VPU/EUP -> keep the f32 upcast there
    f32_only = any(t in kind for t in ("v2", "v3", "v4", "v5"))

    if vmem_cap <= 64 * 1024 * 1024:
        # v7x-class: 64 MiB physical per TC -> leave double-buffer headroom
        return 48 * 1024 * 1024, 40 * 1024 * 1024, 6 * 1024 * 1024, f32_only
    # v5e / v6e: 128 MiB physical
    return 64 * 1024 * 1024, 56 * 1024 * 1024, 10 * 1024 * 1024, f32_only


def _pick_block_rows(batch, n_classes, in_itemsize, cd_itemsize, needs_upcast,
                     tile_budget, per_buffer_cap):
    """Largest batch tile (multiple of 8) whose *full* in-kernel footprint fits
    the generation's scoped-VMEM budget."""
    if batch <= 8:
        return batch

    per_row = (
        2 * n_classes * in_itemsize                              # double-buffered logits tiles
        + (n_classes * cd_itemsize if needs_upcast else 0)       # astype copy
        + 2 * n_classes * cd_itemsize                            # exp temp + where temp
        + n_classes * 4                                          # class iota (int32)
        + 2 * LANES * 4                                          # lane-padded labels, double-buffered
    )
    rows = min(tile_budget // per_row,
               per_buffer_cap // max(1, n_classes * in_itemsize),
               batch, MAX_BLOCK_ROWS)
    rows = max(8, (rows // 8) * 8)

    # Guarantee >= 2 grid steps so v7x can shard the "parallel" batch axis
    # across both TensorCores (harmless on single-TC v5e/v6e).
    if rows >= batch and batch >= 16:
        rows = max(8, ((pl.cdiv(batch, 2) + 7) // 8) * 8)
    return rows


# ---------------------------------------------------------------------------
# Wrapper
# ---------------------------------------------------------------------------
def _gce_xla(logits, labels, q, esp):
    """Stable pure-XLA path for tiny problems."""
    logits = logits.astype(jnp.float32)
    m = jnp.max(logits, axis=-1, keepdims=True)
    lse = m + jnp.log(jnp.sum(jnp.exp(logits - m), axis=-1, keepdims=True))
    l_y = jnp.take_along_axis(logits, labels.astype(jnp.int32)[:, None], axis=-1)
    log_p_y = jnp.squeeze(l_y - lse, -1)
    loss = (1.0 - jnp.exp(q * log_p_y)) / (q + esp)
    return jnp.mean(loss)


def generalized_cross_entropy(logits, labels, snrs, esp=ESP):
    """logits: (B, C) float (f32 or bf16), labels: (B,) int, snrs: (B,) numeric
    -> scalar mean GCE loss (matches the PyTorch module)."""
    B, C = logits.shape

    # q (and 1/(q+esp)) computed with plain XLA outside the kernel
    q = 1.0 - (jnp.mean(snrs.astype(jnp.float32)) + 20.0) / 38.0

    in_itemsize = jnp.dtype(logits.dtype).itemsize
    if B * C * in_itemsize < SMALL_PROBLEM_BYTES:
        # tiny problem: kernel launch + one grid step overhead dominates
        return _gce_xla(logits, labels, q, esp)

    vmem_limit, tile_budget, per_buffer_cap, f32_only = _hw_config()

    # bf16 stays bf16 through the bulk math on v6e/v7x; everything else -> f32
    if logits.dtype == jnp.dtype(jnp.bfloat16) and not f32_only:
        compute_dtype = jnp.bfloat16
    else:
        compute_dtype = jnp.float32
    cd_itemsize = jnp.dtype(compute_dtype).itemsize
    needs_upcast = jnp.dtype(logits.dtype) != jnp.dtype(compute_dtype)

    # TODO(synk): class dim is not tiled; a single row of logits larger than the
    # VMEM budget would need an online log-sum-exp split over C.
    tb = _pick_block_rows(B, C, in_itemsize, cd_itemsize, needs_upcast,
                          tile_budget, per_buffer_cap)
    nb = pl.cdiv(B, tb)

    scal = jnp.stack([q, 1.0 / (q + esp)]).reshape(1, 2).astype(jnp.float32)
    labels2d = labels.astype(jnp.int32).reshape(B, 1)

    kernel = functools.partial(_gce_kernel, batch_size=B, block_rows=tb,
                               compute_dtype=compute_dtype)

    partials = pl.pallas_call(
        kernel,
        out_shape=jax.ShapeDtypeStruct((1, nb * LANES), jnp.float32),
        grid_spec=pltpu.PrefetchScalarGridSpec(
            num_scalar_prefetch=0,
            grid=(nb,),
            in_specs=[
                # (q, 1/(q+esp)) as untiled SMEM scalars
                pl.BlockSpec(memory_space=pltpu.MemorySpace.SMEM),
                # logits: batch-tiled, full class dim on lanes
                pl.BlockSpec((tb, C), lambda i: (i, 0)),
                # labels: batch-tiled column of class indices
                pl.BlockSpec((tb, 1), lambda i: (i, 0)),
            ],
            # lane-dense per-block partial sums
            out_specs=pl.BlockSpec((1, LANES), lambda i: (0, i)),
        ),
        compiler_params=pltpu.CompilerParams(
            dimension_semantics=("parallel",),    # v7x: shard batch over both TCs
            vmem_limit_bytes=vmem_limit,
        ),
    )(scal, logits, labels2d)

    block_sums = partials.reshape(nb, LANES)[:, 0]
    return jnp.sum(block_sums) / B


# ---------------------------------------------------------------------------
# Reference + self-test
# ---------------------------------------------------------------------------
def _reference(logits, labels, snrs, esp=ESP):
    # pure-JAX reference mirroring the PyTorch module
    q = 1.0 - (jnp.mean(snrs.astype(jnp.float32)) + 20.0) / 38.0
    onehot = jax.nn.one_hot(labels, logits.shape[-1], dtype=jnp.float32)
    probs = jax.nn.softmax(logits.astype(jnp.float32), axis=-1)
    p_y = jnp.sum(onehot * probs, axis=-1)
    loss = (1.0 - jnp.power(p_y, q)) / (q + esp)
    return jnp.mean(loss)


if __name__ == "__main__":
    key = jax.random.PRNGKey(0)
    keys = jax.random.split(key, 9)

    # 1) tiny problem -> XLA fallback path (small-problem regime)
    B0, C0 = 8, 32
    logits0 = jax.random.normal(keys[0], (B0, C0), dtype=jnp.float32)
    labels0 = jax.random.randint(keys[1], (B0,), 0, C0, dtype=jnp.int32)
    snrs0 = jax.random.uniform(keys[2], (B0,), dtype=jnp.float32,
                               minval=-20.0, maxval=18.0)
    loss0 = jax.block_until_ready(generalized_cross_entropy(logits0, labels0, snrs0))
    ref0 = jax.block_until_ready(_reference(logits0, labels0, snrs0))
    assert jnp.allclose(loss0, ref0, atol=1e-5, rtol=1e-5), (loss0, ref0)

    # 2) medium f32 problem -> Pallas kernel, >= 2 grid steps
    B1, C1 = 1024, 128
    logits1 = jax.random.normal(keys[3], (B1, C1), dtype=jnp.float32)
    labels1 = jax.random.randint(keys[4], (B1,), 0, C1, dtype=jnp.int32)
    snrs1 = jax.random.uniform(keys[5], (B1,), dtype=jnp.float32,
                               minval=-20.0, maxval=18.0)
    loss1 = jax.block_until_ready(generalized_cross_entropy(logits1, labels1, snrs1))
    ref1 = jax.block_until_ready(_reference(logits1, labels1, snrs1))
    assert jnp.allclose(loss1, ref1, atol=1e-4, rtol=1e-4), (loss1, ref1)

    # 3) bf16 logits -> Pallas kernel, bf16 bulk math on v6e/v7x (f32 on v5-class)
    B2, C2 = 1024, 256
    logits2 = jax.random.normal(keys[6], (B2, C2), dtype=jnp.float32).astype(jnp.bfloat16)
    labels2 = jax.random.randint(keys[7], (B2,), 0, C2, dtype=jnp.int32)
    snrs2 = jax.random.uniform(keys[8], (B2,), dtype=jnp.float32,
                               minval=-20.0, maxval=18.0)
    loss2 = jax.block_until_ready(generalized_cross_entropy(logits2, labels2, snrs2))
    ref2 = jax.block_until_ready(_reference(logits2, labels2, snrs2))
    assert jnp.allclose(loss2, ref2, atol=5e-2, rtol=5e-2), (loss2, ref2)

    print("KERNEL_OK")
</pallas_src>

<mosaic_0001>
module attributes {stable_mosaic.version = 11 : i64} {
  func.func @_gce_kernel(%arg0: i32, %arg1: memref<1x2xf32, #tpu.memory_space<smem>>, %arg2: memref<512x128xf32, #tpu.memory_space<vmem>>, %arg3: memref<512x1xi32, #tpu.memory_space<vmem>>, %arg4: memref<1x128xf32, #tpu.memory_space<vmem>>) attributes {dimension_semantics = [#tpu.dimension_semantics<parallel>], iteration_bounds = array<i64: 2>, scalar_prefetch = 0 : i64, scratch_operands = 0 : i64, tpu.core_type = #tpu.core_type<tc>, window_params = [{transform_indices = @transform_0, window_bounds = array<i64: 1, 2>}, {transform_indices = @transform_1, window_bounds = array<i64: 512, 128>}, {transform_indices = @transform_2, window_bounds = array<i64: 512, 1>}, {transform_indices = @transform_3, window_bounds = array<i64: 1, 128>}]} {
    %c0 = arith.constant 0 : index
    %c0_0 = arith.constant 0 : index
    %0 = memref.load %arg1[%c0, %c0_0] : memref<1x2xf32, #tpu.memory_space<smem>>
    %c0_1 = arith.constant 0 : index
    %c1 = arith.constant 1 : index
    %1 = memref.load %arg1[%c0_1, %c1] : memref<1x2xf32, #tpu.memory_space<smem>>
    %c0_2 = arith.constant 0 : index
    %c0_3 = arith.constant 0 : index
    %2 = vector.load %arg2[%c0_2, %c0_3] : memref<512x128xf32, #tpu.memory_space<vmem>>, vector<512x128xf32>
    %c0_4 = arith.constant 0 : index
    %c0_5 = arith.constant 0 : index
    %3 = vector.load %arg3[%c0_4, %c0_5] : memref<512x1xi32, #tpu.memory_space<vmem>>, vector<512x1xi32>
    %cst = arith.constant dense<0xFF800000> : vector<512xf32>
    %4 = vector.multi_reduction <maximumf>, %2, %cst [1] : vector<512x128xf32> to vector<512xf32>
    %5 = vector.shape_cast %4 : vector<512xf32> to vector<512x1xf32>
    %6 = vector.broadcast %5 : vector<512x1xf32> to vector<512x128xf32>
    %7 = arith.subf %2, %6 : vector<512x128xf32>
    %8 = math.exp %7 : vector<512x128xf32>
    %cst_6 = arith.constant dense<0.000000e+00> : vector<512xf32>
    %9 = vector.multi_reduction <add>, %8, %cst_6 [1] : vector<512x128xf32> to vector<512xf32>
    %10 = vector.shape_cast %9 : vector<512xf32> to vector<512x1xf32>
    %11 = tpu.iota {dimensions = array<i32: 1>} : vector<512x128xi32>
    %12 = vector.broadcast %3 : vector<512x1xi32> to vector<512x128xi32>
    %13 = arith.cmpi eq, %11, %12 : vector<512x128xi32>
    %cst_7 = arith.constant 0.000000e+00 : f32
    %14 = vector.broadcast %cst_7 : f32 to vector<512x128xf32>
    %15 = arith.select %13, %8, %14 : vector<512x128xi1>, vector<512x128xf32>
    %cst_8 = arith.constant dense<0.000000e+00> : vector<512xf32>
    %16 = vector.multi_reduction <add>, %15, %cst_8 [1] : vector<512x128xf32> to vector<512xf32>
    %17 = vector.shape_cast %16 : vector<512xf32> to vector<512x1xf32>
    %18 = math.log %17 : vector<512x1xf32>
    %19 = math.log %10 : vector<512x1xf32>
    %20 = arith.subf %18, %19 : vector<512x1xf32>
    %21 = vector.broadcast %0 : f32 to vector<512x1xf32>
    %22 = arith.mulf %21, %20 : vector<512x1xf32>
    %23 = math.exp %22 : vector<512x1xf32>
    %cst_9 = arith.constant 1.000000e+00 : f32
    %24 = vector.broadcast %cst_9 : f32 to vector<512x1xf32>
    %25 = arith.subf %24, %23 : vector<512x1xf32>
    %26 = vector.broadcast %1 : f32 to vector<512x1xf32>
    %27 = arith.mulf %25, %26 : vector<512x1xf32>
    %c512_i32 = arith.constant 512 : i32
    %28 = arith.muli %arg0, %c512_i32 : i32
    %29 = tpu.iota {dimensions = array<i32: 0>} : vector<512x1xi32>
    %30 = vector.broadcast %28 : i32 to vector<512x1xi32>
    %31 = arith.addi %30, %29 : vector<512x1xi32>
    %c1024_i32 = arith.constant 1024 : i32
    %32 = vector.broadcast %c1024_i32 : i32 to vector<512x1xi32>
    %33 = arith.cmpi slt, %31, %32 : vector<512x1xi32>
    %cst_10 = arith.constant 0.000000e+00 : f32
    %34 = vector.broadcast %cst_10 : f32 to vector<512x1xf32>
    %35 = arith.select %33, %27, %34 : vector<512x1xi1>, vector<512x1xf32>
    %36 = vector.shape_cast %35 : vector<512x1xf32> to vector<1x512x1xf32>
    %cst_11 = arith.constant dense<0.000000e+00> : vector<1xf32>
    %37 = vector.multi_reduction <add>, %36, %cst_11 [1, 2] : vector<1x512x1xf32> to vector<1xf32>
    %38 = vector.shape_cast %37 : vector<1xf32> to vector<1x1x1xf32>
    %39 = vector.extract %38[0, 0, 0] : f32 from vector<1x1x1xf32>
    %40 = vector.broadcast %39 : f32 to vector<1x128xf32>
    %c0_12 = arith.constant 0 : index
    %c0_13 = arith.constant 0 : index
    %41 = vector.load %arg4[%c0_12, %c0_13] : memref<1x128xf32, #tpu.memory_space<vmem>>, vector<1x128xf32>
    tpu.vector_store %arg4[%c0_12, %c0_13], %40 {strides = array<i32>} : memref<1x128xf32, #tpu.memory_space<vmem>>, vector<1x128xf32>,
    return
  }
  func.func @transform_0(%arg0: i32) -> (i32, i32) {
    %c0_i32 = arith.constant 0 : i32
    %c0_i32_0 = arith.constant 0 : i32
    %c0_i32_1 = arith.constant 0 : i32
    return %c0_i32, %c0_i32_0 : i32, i32
  }
  func.func @transform_1(%arg0: i32) -> (i32, i32) {
    %c0_i32 = arith.constant 0 : i32
    %c0_i32_0 = arith.constant 0 : i32
    return %arg0, %c0_i32 : i32, i32
  }
  func.func @transform_2(%arg0: i32) -> (i32, i32) {
    %c0_i32 = arith.constant 0 : i32
    %c0_i32_0 = arith.constant 0 : i32
    return %arg0, %c0_i32 : i32, i32
  }
  func.func @transform_3(%arg0: i32) -> (i32, i32) {
    %c0_i32 = arith.constant 0 : i32
    %c0_i32_0 = arith.constant 0 : i32
    return %c0_i32, %arg0 : i32, i32
  }
}

</mosaic_0001>

<bundles_post_ra>
// kernel: tpu_custom_call.1
= control target key start
LH: loop header
LB: loop body
LE: loop exit
PB: predicated region body
PF: predicated region fallthrough
CT: control target
= control target key end

     0   :  { %8 = vsyncpa [#allocation4], 0  ;;  %s5063_s0 = inlined_call_operand.vmem [shape: f32[1,2], index: 0, kind: input, shape index: {}]   ;;  %s5064_s1 = inlined_call_operand.vmem [shape: f32[1024,128], index: 1, kind: input, shape index: {}]   ;;  %s5065_s2 = inlined_call_operand.vmem [shape: s32[1024,1], index: 2, kind: input, shape index: {}]   ;;  %s5066_s3 = inlined_call_operand.hbm [shape: f32[1,256], index: 3, kind: output, shape index: {}]  }
   0x1   :  { %9 = vsyncpa [#allocation3], 0 }
   0x2   :  { %11 = vsyncpa [#allocation3 + $0x1], 0  ;;  %s3063_s12 = smov 0   ;;  %s3065_s13 = smov 0  }
   0x3   :  { %s3067_s14 = smov 0   ;;  %s3069_s15 = smov 0  }
   0x4 LB: > { %s3084_s16 = sadd.s32 4294967295, %s3038_s15   ;;  %s2366_s17 = sadd.s32 4294967294, %s3038_s15   ;;  %s3038_s15 = sphi %s3069_s15, %s5364_s15   ;;  %s3034_s14 = sphi %s3067_s14, %s5363_s14   ;;  %s3030_s13 = sphi %s3065_s13, %s5362_s13   ;;  %s3026_s12 = sphi %s3063_s12, %s5361_s12  }
   0x5   : > { %s3088_s18 = sadd.s32 1, %s3038_s15   ;;  %s97_s19 = sadd.s32 1, %s3034_s14 }
   0x6   : > { %s94_s20 = ssub.s32 %s3038_s15, %s3088_s18  ;;  %p107_p0 = scmp.ne.s32.totalorder %s3034_s14, %s3030_s13 }
   0x7   : > { %p95_p1 = scmp.eq.s32.totalorder %s94_s20, 0  ;;  %p108_p2 = scmp.eq.s32.totalorder %s3084_s16, 1 }
   0x8   : > { %p113_p3 = scmp.ne.s32.totalorder %s3030_s13, %s3026_s12  ;;  %p114_p4 = scmp.eq.s32.totalorder %s2366_s17, 1 }
   0x9   : > { %s3099_s21 = scalar_select %p95_p1, %s3034_s14, %s97_s19  }
   0xa   : > { %p3101_p5 = por %p108_p2, %p107_p0  ;;  %p3105_p6 = por %p114_p4, %p113_p3 }
   0xb   : > { %p2367_p7 = scmp.ge.s32.totalorder %s3038_s15, 1  ;;  %p121_p8 = scmp.lt.s32.totalorder %s3038_s15, 3 }
   0xc   : > { %p2397_p9 = scmp.eq.s32.totalorder %s3084_s16, 0  ;;  %s134_s27 = sshll.u32 %s5063_s0, 4  ;;  %s135_s27 = int_to_ptr.vmem [resolvable:$true] %s134_s27 }
   0xd   : > { %p3112_p10 = pnand %p2367_p7, %p121_p8  ;;  %s2957_s28 = scalar_lea.vmem %s135_s27, 16 }
   0xe   : > { %p2958_p13 = scmp.ne.s32.totalorder %s135_s27, %s2957_s28  ;;  %p2965_p3 = scmp.lt.s32.totalorder %s135_s27, %s135_s27 }
   0xf   : > { %p2389_p11 = pneg %p3112_p10  ;;  %p2966_p4 = scmp.lt.s32.totalorder %s2957_s28, %s2957_s28 }
  0x11   : > { %p2390_p12 = pnand %p2397_p9, %p2389_p11  ;;  %p2967_p7 = por %p2966_p4, %p2965_p3 }
  0x13   : > { %p2959_p0 = pneg %p2390_p12 }
  0x15   : > { %p2960_p1 = pnand %p2959_p0, %p2958_p13 }
  0x17   : > { %p2961_p2 = pneg %p2960_p1 }
  0x19   : > { %p2968_p8 = pnand %p2967_p7, %p2961_p2 }
  0x1b   : > { %2971 = shalt.err (!%p2968_p8)
}
  0x1c   : > { %s3040_s29 = smov [#allocation2]   ;;  %165 = sbr.rel (%p3112_p10) target bundleno = 1363 (0x553), region = 32 }
  0x1d   : > { %2392 = dma.vmem_to_smem (!%p2390_p12), %s135_s27, 16, %s3040_s29, [#allocation4]  }
  0x23   : > { %3017 = dma.done.wait (%p2397_p9), [#allocation4], 16  }
  0x24   : > { %3019 = vsyncadd (%p2397_p9), [#allocation4], 4294967280 }
  0x25   : > { %171 = sfence }
  0x26   : > { %s2372_s30 = sshll.u32 %s3084_s16, 6  ;;  %s206_s11 = sld [smem:[#allocation2]]  ;;  %vm2135_vm13 = vcmask 7168  }
  0x27   : > { %p195_p11 = scmp.lt.s32.totalorder %s2372_s30, 127  ;;  %s3870_s17 = sld [smem:[#allocation2 + $0x1]] }
  0x28   : > { %s2377_s19 = sshll.u32 %s3084_s16, 9  ;;  %s192_s20 = sand.u32 1, %s3030_s13  }
  0x29   : > { %s5366_s30 = smov (!%p195_p11, %s2372_s30), 127  ;;  %s193_s24 = scalar_lea.vmem [#allocation5], %s192_s20 }
  0x2a   : > { %s2373_s4 = sshll.u32 %s5366_s30, 3  ;;  %s2287_s25 = sshll.u32 %s193_s24, 4  ;;  %s5018_s25 = int_to_ptr.vmem [resolvable:$true] %s2287_s25 }
  0x2b   : > { %s3138_s7 = scalar_lea.vmem %s5064_s1, %s2373_s4  ;;  %s3598_s10 = scalar_lea.vmem %s5065_s2, %s2373_s4 }
  0x2c   : > { %v3141_v0 = vld [vmem:[%s3138_s7] sm:$0xff]  ;;  %v3144_v1 = vld [vmem:[%s3138_s7 + $0x10] sm:$0xff]  ;;  %v3149_v2 = vld [vmem:[%s3138_s7 + $0x8] sm:$0xff]  ;;  %s2378_s26 = sshll.u32 %s3084_s16, 4  ;;  %s2275_s4 = scalar_lea.sflag [#allocation3], %s192_s20 }
  0x2d   : > { %336 = vmax.xlane.f32.xlu0 %v3141_v0  ;;  %340 = vmax.xlane.f32.xlu1 %v3144_v1  ;;  %v3152_v3 = vld [vmem:[%s3138_s7 + $0x18] sm:$0xff]  ;;  %v3157_v4 = vld [vmem:[%s3138_s7 + $0x20] sm:$0xff]  ;;  %v3160_v5 = vld [vmem:[%s3138_s7 + $0x28] sm:$0xff]  ;;  %s5023_s30 = scalar_lea.hbm %s5066_s3, %s2378_s26  ;;  %s2972_s5 = scalar_lea.vmem %s5018_s25, 16 }
  0x2e   : > { %v3165_v6 = vld [vmem:[%s3138_s7 + $0x30] sm:$0xff]  ;;  %v3168_v7 = vld [vmem:[%s3138_s7 + $0x38] sm:$0xff]  ;;  %v3173_v8 = vld [vmem:[%s3138_s7 + $0x40] sm:$0xff]  ;;  %p2973_p9 = scmp.ne.s32.totalorder %s5018_s25, %s2972_s5  ;;  %s3042_s16 = smov [#allocation5]  }
  0x2f   : > { %v3176_v9 = vld [vmem:[%s3138_s7 + $0x48] sm:$0xff]  ;;  %v3181_v10 = vld [vmem:[%s3138_s7 + $0x50] sm:$0xff]  ;;  %v3184_v11 = vld [vmem:[%s3138_s7 + $0x58] sm:$0xff]  ;;  %s2976_s6 = sshll.u32 %s3042_s16, 4  ;;  %s2977_s6 = int_to_ptr.vmem [resolvable:$false] %s2976_s6 }
  0x30   : > { %v3189_v12 = vld [vmem:[%s3138_s7 + $0x60] sm:$0xff]  ;;  %v3192_v13 = vld [vmem:[%s3138_s7 + $0x68] sm:$0xff]  ;;  %v3197_v14 = vld [vmem:[%s3138_s7 + $0x70] sm:$0xff]  ;;  %p2974_p10 = pnand %p2973_p9, %p3101_p5  ;;  %p2979_p13 = scmp.lt.s32.totalorder %s5018_s25, %s2977_s6 }
  0x31   : > { %338 = vmax.xlane.f32.xlu0 %v3149_v2  ;;  %342 = vmax.xlane.f32.xlu1 %v3152_v3  ;;  %v3200_v15 = vld [vmem:[%s3138_s7 + $0x78] sm:$0xff]  ;;  %v3205_v16 = vld [vmem:[%s3138_s7 + $0x80] sm:$0xff]  ;;  %v3208_v17 = vld [vmem:[%s3138_s7 + $0x88] sm:$0xff] }
  0x32   : > { %v3213_v18 = vld [vmem:[%s3138_s7 + $0x90] sm:$0xff]  ;;  %v3216_v19 = vld [vmem:[%s3138_s7 + $0x98] sm:$0xff]  ;;  %v3221_v20 = vld [vmem:[%s3138_s7 + $0xa0] sm:$0xff]  ;;  %p2975_p12 = pneg %p2974_p10 }
  0x33   : > { %v3224_v21 = vld [vmem:[%s3138_s7 + $0xa8] sm:$0xff]  ;;  %v3229_v22 = vld [vmem:[%s3138_s7 + $0xb0] sm:$0xff]  ;;  %v3232_v23 = vld [vmem:[%s3138_s7 + $0xb8] sm:$0xff] }
  0x34   : > { %v3237_v24 = vld [vmem:[%s3138_s7 + $0xc0] sm:$0xff]  ;;  %v3240_v25 = vld [vmem:[%s3138_s7 + $0xc8] sm:$0xff]  ;;  %v3245_v26 = vld [vmem:[%s3138_s7 + $0xd0] sm:$0xff] }
  0x35   : > { %344 = vmax.xlane.f32.xlu0 %v3157_v4  ;;  %346 = vmax.xlane.f32.xlu1 %v3160_v5  ;;  %v3248_v27 = vld [vmem:[%s3138_s7 + $0xd8] sm:$0xff]  ;;  %v3253_v28 = vld [vmem:[%s3138_s7 + $0xe0] sm:$0xff]  ;;  %v3256_v29 = vld [vmem:[%s3138_s7 + $0xe8] sm:$0xff] }
  0x36   : > { %v3261_v30 = vld [vmem:[%s3138_s7 + $0xf0] sm:$0xff]  ;;  %v3264_v31 = vld [vmem:[%s3138_s7 + $0xf8] sm:$0xff]  ;;  %v3269_v32 = vld [vmem:[%s3138_s7 + $0x100] sm:$0xff] }
  0x37   : > { %v3272_v33 = vld [vmem:[%s3138_s7 + $0x108] sm:$0xff]  ;;  %v3277_v34 = vld [vmem:[%s3138_s7 + $0x110] sm:$0xff]  ;;  %v3280_v35 = vld [vmem:[%s3138_s7 + $0x118] sm:$0xff] }
  0x38   : > { %v3285_v36 = vld [vmem:[%s3138_s7 + $0x120] sm:$0xff]  ;;  %v3288_v37 = vld [vmem:[%s3138_s7 + $0x128] sm:$0xff]  ;;  %v3293_v38 = vld [vmem:[%s3138_s7 + $0x130] sm:$0xff] }
  0x39   : > { %348 = vmax.xlane.f32.xlu0 %v3165_v6  ;;  %350 = vmax.xlane.f32.xlu1 %v3168_v7  ;;  %v3296_v39 = vld [vmem:[%s3138_s7 + $0x138] sm:$0xff]  ;;  %v3301_v40 = vld [vmem:[%s3138_s7 + $0x140] sm:$0xff]  ;;  %v3304_v41 = vld [vmem:[%s3138_s7 + $0x148] sm:$0xff] }
  0x3a   : > { %v3309_v42 = vld [vmem:[%s3138_s7 + $0x150] sm:$0xff]  ;;  %v3312_v43 = vld [vmem:[%s3138_s7 + $0x158] sm:$0xff]  ;;  %v3317_v44 = vld [vmem:[%s3138_s7 + $0x160] sm:$0xff] }
  0x3b   : > { %v3320_v45 = vld [vmem:[%s3138_s7 + $0x168] sm:$0xff]  ;;  %v3325_v46 = vld [vmem:[%s3138_s7 + $0x170] sm:$0xff]  ;;  %v3328_v47 = vld [vmem:[%s3138_s7 + $0x178] sm:$0xff] }
  0x3c   : > { %v3333_v48 = vld [vmem:[%s3138_s7 + $0x180] sm:$0xff]  ;;  %v3336_v49 = vld [vmem:[%s3138_s7 + $0x188] sm:$0xff]  ;;  %v3341_v50 = vld [vmem:[%s3138_s7 + $0x190] sm:$0xff] }
  0x3d   : > { %352 = vmax.xlane.f32.xlu0 %v3173_v8  ;;  %354 = vmax.xlane.f32.xlu1 %v3176_v9  ;;  %5118 = vst [vmem:[#allocation8_spill] sm:$0xff] %v3336_v49  ;;  %5119 = vst [vmem:[#allocation9_spill] sm:$0xff] %v3341_v50  ;;  %v3344_v51 = vld [vmem:[%s3138_s7 + $0x198] sm:$0xff]  ;;  %v3349_v52 = vld [vmem:[%s3138_s7 + $0x1a0] sm:$0xff] }
  0x3e   : > { %5120 = vst [vmem:[#allocation10_spill] sm:$0xff] %v3344_v51  ;;  %5121 = vst [vmem:[#allocation11_spill] sm:$0xff] %v3349_v52  ;;  %v3352_v53 = vld [vmem:[%s3138_s7 + $0x1a8] sm:$0xff]  ;;  %v3357_v54 = vld [vmem:[%s3138_s7 + $0x1b0] sm:$0xff] }
  0x3f   : > { %5122 = vst [vmem:[#allocation12_spill] sm:$0xff] %v3352_v53  ;;  %5123 = vst [vmem:[#allocation13_spill] sm:$0xff] %v3357_v54  ;;  %v263_v55 = vld [vmem:[%s3138_s7 + $0x1b8] sm:$0xff]  ;;  %v264_v56 = vld [vmem:[%s3138_s7 + $0x1c0] sm:$0xff] }
  0x40   : > { %v265_v57 = vld [vmem:[%s3138_s7 + $0x1c8] sm:$0xff]  ;;  %v266_v58 = vld [vmem:[%s3138_s7 + $0x1d0] sm:$0xff]  ;;  %v267_v59 = vld [vmem:[%s3138_s7 + $0x1d8] sm:$0xff] }
  0x41   : > { %356 = vmax.xlane.f32.xlu0 %v3181_v10  ;;  %358 = vmax.xlane.f32.xlu1 %v3184_v11  ;;  %v268_v60 = vld [vmem:[%s3138_s7 + $0x1e0] sm:$0xff]  ;;  %v269_v61 = vld [vmem:[%s3138_s7 + $0x1e8] sm:$0xff]  ;;  %v270_v62 = vld [vmem:[%s3138_s7 + $0x1f0] sm:$0xff] }
  0x42   : > { %v271_v63 = vld [vmem:[%s3138_s7 + $0x1f8] sm:$0xff] }
  0x45   : > { %360 = vmax.xlane.f32.xlu0 %v3189_v12  ;;  %362 = vmax.xlane.f32.xlu1 %v3192_v13 }
  0x49   : > { %364 = vmax.xlane.f32.xlu0 %v3197_v14  ;;  %366 = vmax.xlane.f32.xlu1 %v3200_v15 }
  0x4d   : > { %368 = vmax.xlane.f32.xlu0 %v3205_v16  ;;  %370 = vmax.xlane.f32.xlu1 %v3208_v17 }
  0x51   : > { %372 = vmax.xlane.f32.xlu0 %v3213_v18  ;;  %374 = vmax.xlane.f32.xlu1 %v3216_v19 }
  0x55   : > { %376 = vmax.xlane.f32.xlu0 %v3221_v20  ;;  %378 = vmax.xlane.f32.xlu1 %v3224_v21 }
  0x59   : > { %380 = vmax.xlane.f32.xlu0 %v3229_v22  ;;  %382 = vmax.xlane.f32.xlu1 %v3232_v23 }
  0x5d   : > { %384 = vmax.xlane.f32.xlu0 %v3237_v24  ;;  %386 = vmax.xlane.f32.xlu1 %v3240_v25 }
  0x61   : > { %388 = vmax.xlane.f32.xlu0 %v3245_v26  ;;  %390 = vmax.xlane.f32.xlu1 %v3248_v27 }
  0x65   : > { %392 = vmax.xlane.f32.xlu0 %v3253_v28  ;;  %394 = vmax.xlane.f32.xlu1 %v3256_v29 }
  0x69   : > { %396 = vmax.xlane.f32.xlu0 %v3261_v30  ;;  %398 = vmax.xlane.f32.xlu1 %v3264_v31 }
  0x6d   : > { %400 = vmax.xlane.f32.xlu0 %v3269_v32  ;;  %402 = vmax.xlane.f32.xlu1 %v3272_v33 }
  0x71   : > { %404 = vmax.xlane.f32.xlu0 %v3277_v34  ;;  %406 = vmax.xlane.f32.xlu1 %v3280_v35 }
  0x75   : > { %408 = vmax.xlane.f32.xlu0 %v3285_v36  ;;  %410 = vmax.xlane.f32.xlu1 %v3288_v37 }
  0x79   : > { %412 = vmax.xlane.f32.xlu0 %v3293_v38  ;;  %414 = vmax.xlane.f32.xlu1 %v3296_v39 }
  0x7d   : > { %416 = vmax.xlane.f32.xlu0 %v3301_v40  ;;  %418 = vmax.xlane.f32.xlu1 %v3304_v41 }
  0x81   : > { %420 = vmax.xlane.f32.xlu0 %v3309_v42  ;;  %422 = vmax.xlane.f32.xlu1 %v3312_v43 }
  0x85   : > { %424 = vmax.xlane.f32.xlu0 %v3317_v44  ;;  %426 = vmax.xlane.f32.xlu1 %v3320_v45 }
  0x89   : > { %428 = vmax.xlane.f32.xlu0 %v3325_v46  ;;  %430 = vmax.xlane.f32.xlu1 %v3328_v47 }
  0x8d   : > { %432 = vmax.xlane.f32.xlu0 %v3333_v48  ;;  %434 = vmax.xlane.f32.xlu1 %v3336_v49 }
  0x91   : > { %436 = vmax.xlane.f32.xlu0 %v3341_v50  ;;  %438 = vmax.xlane.f32.xlu1 %v3344_v51 }
  0x95   : > { %440 = vmax.xlane.f32.xlu0 %v3349_v52  ;;  %442 = vmax.xlane.f32.xlu1 %v3352_v53  ;;  %v3041_v53 = vmov 0  }
  0x96   : > { %2434 = vset.pattern.permute.xlu1 %v3041_v53  ;;  %2435 = vset.pattern.permute.xlu0 %v3041_v53 }
  0x99   : > { %444 = vmax.xlane.f32.xlu0 %v3357_v54  ;;  %446 = vmax.xlane.f32.xlu1 %v263_v55 }
  0x9d   : > { %448 = vmax.xlane.f32.xlu0 %v264_v56  ;;  %450 = vmax.xlane.f32.xlu1 %v265_v57 }
  0xa1   : > { %452 = vmax.xlane.f32.xlu0 %v266_v58  ;;  %454 = vmax.xlane.f32.xlu1 %v267_v59 }
  0xa5   : > { %456 = vmax.xlane.f32.xlu0 %v268_v60  ;;  %458 = vmax.xlane.f32.xlu1 %v269_v61 }
  0xa9   : > { %460 = vmax.xlane.f32.xlu0 %v270_v62  ;;  %462 = vmax.xlane.f32.xlu1 %v271_v63 }
  0xba   : > { %v337_v55 = vpop.xlane.xlu0 %336  ;;  %v341_v54 = vpop.xlane.xlu1 %340 }
  0xbb   : > { %v464_v56 = vsub.f32 %v3141_v0, %v337_v55  ;;  %v466_v57 = vsub.f32 %v3144_v1, %v341_v54 }
  0xbd   : > { %v528_v52 = vmul.f32 1.442695, %v464_v56  ;;  %v532_v58 = vmul.f32 1.442695, %v466_v57 }
  0xbe   : > { %v339_v59 = vpop.xlane.xlu0 %338  ;;  %v343_v51 = vpop.xlane.xlu1 %342 }
  0xbf   : > { %2436 = vpow2.f32 %v528_v52  ;;  %v465_v60 = vsub.f32 %v3149_v2, %v339_v59  ;;  %v467_v61 = vsub.f32 %v3152_v3, %v343_v51 }
  0xc0   : > { %2438 = vpow2.f32 %v532_v58 }
  0xc1   : > { %v530_v62 = vmul.f32 1.442695, %v465_v60  ;;  %v534_v63 = vmul.f32 1.442695, %v467_v61 }
  0xc2   : > { %v345_v50 = vpop.xlane.xlu0 %344  ;;  %v347_v53 = vpop.xlane.xlu1 %346 }
  0xc3   : > { %2440 = vpow2.f32 %v530_v62  ;;  %v468_v49 = vsub.f32 %v3157_v4, %v345_v50  ;;  %v469_v0 = vsub.f32 %v3160_v5, %v347_v53 }
  0xc4   : > { %2442 = vpow2.f32 %v534_v63 }
  0xc5   : > { %v536_v1 = vmul.f32 1.442695, %v468_v49  ;;  %v538_v54 = vmul.f32 1.442695, %v469_v0 }
  0xc6   : > { %v349_v55 = vpop.xlane.xlu0 %348  ;;  %v351_v56 = vpop.xlane.xlu1 %350 }
  0xc7   : > { %2444 = vpow2.f32 %v536_v1  ;;  %v470_v2 = vsub.f32 %v3165_v6, %v349_v55  ;;  %v471_v3 = vsub.f32 %v3168_v7, %v351_v56 }
  0xc8   : > { %2446 = vpow2.f32 %v538_v54 }
  0xc9   : > { %v3377_v51 = vpop.eup %2436  ;;  %v540_v52 = vmul.f32 1.442695, %v470_v2  ;;  %v542_v57 = vmul.f32 1.442695, %v471_v3 }
  0xca   : > { %656 = vadd.xlane.f32.xlu0 %v3377_v51  ;;  %v353_v4 = vpop.xlane.xlu0 %352  ;;  %v355_v50 = vpop.xlane.xlu1 %354 }
  0xcb   : > { %v3380_v5 = vpop.eup %2438  ;;  %2448 = vpow2.f32 %v540_v52  ;;  %v472_v49 = vsub.f32 %v3173_v8, %v353_v4  ;;  %v473_v58 = vsub.f32 %v3176_v9, %v355_v50 }
  0xcc   : > { %2450 = vpow2.f32 %v542_v57 }
  0xcd   : > { %v3384_v59 = vpop.eup %2440  ;;  %v544_v6 = vmul.f32 1.442695, %v472_v49  ;;  %v546_v7 = vmul.f32 1.442695, %v473_v58 }
  0xce   : > { %660 = vadd.xlane.f32.xlu0 %v3380_v5  ;;  %658 = vadd.xlane.f32.xlu1 %v3384_v59  ;;  %v357_v60 = vpop.xlane.xlu0 %356  ;;  %v359_v61 = vpop.xlane.xlu1 %358 }
  0xcf   : > { %v3388_v62 = vpop.eup %2442  ;;  %2452 = vpow2.f32 %v544_v6  ;;  %v474_v63 = vsub.f32 %v3181_v10, %v357_v60  ;;  %v475_v8 = vsub.f32 %v3184_v11, %v359_v61 }
  0xd0   : > { %2454 = vpow2.f32 %v546_v7 }
  0xd1   : > { %v3392_v53 = vpop.eup %2444  ;;  %v548_v9 = vmul.f32 1.442695, %v474_v63  ;;  %v550_v0 = vmul.f32 1.442695, %v475_v8 }
  0xd2   : > { %662 = vadd.xlane.f32.xlu1 %v3388_v62  ;;  %664 = vadd.xlane.f32.xlu0 %v3392_v53  ;;  %v361_v1 = vpop.xlane.xlu0 %360  ;;  %v363_v54 = vpop.xlane.xlu1 %362 }
  0xd3   : > { %v3396_v55 = vpop.eup %2446  ;;  %2456 = vpow2.f32 %v548_v9  ;;  %v476_v56 = vsub.f32 %v3189_v12, %v361_v1  ;;  %v477_v10 = vsub.f32 %v3192_v13, %v363_v54 }
  0xd4   : > { %2458 = vpow2.f32 %v550_v0 }
  0xd5   : > { %v3400_v2 = vpop.eup %2448  ;;  %v552_v11 = vmul.f32 1.442695, %v476_v56  ;;  %v554_v3 = vmul.f32 1.442695, %v477_v10 }
  0xd6   : > { %666 = vadd.xlane.f32.xlu1 %v3396_v55  ;;  %668 = vadd.xlane.f32.xlu0 %v3400_v2  ;;  %v365_v52 = vpop.xlane.xlu0 %364  ;;  %v367_v57 = vpop.xlane.xlu1 %366 }
  0xd7   : > { %v3404_v4 = vpop.eup %2450  ;;  %2460 = vpow2.f32 %v552_v11  ;;  %v478_v50 = vsub.f32 %v3197_v14, %v365_v52  ;;  %v479_v12 = vsub.f32 %v3200_v15, %v367_v57 }
  0xd8   : > { %2462 = vpow2.f32 %v554_v3 }
  0xd9   : > { %v3408_v49 = vpop.eup %2452  ;;  %v556_v13 = vmul.f32 1.442695, %v478_v50  ;;  %v558_v58 = vmul.f32 1.442695, %v479_v12 }
  0xda   : > { %670 = vadd.xlane.f32.xlu1 %v3404_v4  ;;  %672 = vadd.xlane.f32.xlu0 %v3408_v49  ;;  %v369_v6 = vpop.xlane.xlu0 %368  ;;  %v371_v7 = vpop.xlane.xlu1 %370 }
  0xdb   : > { %v3412_v60 = vpop.eup %2454  ;;  %2464 = vpow2.f32 %v556_v13  ;;  %v480_v61 = vsub.f32 %v3205_v16, %v369_v6  ;;  %v481_v14 = vsub.f32 %v3208_v17, %v371_v7 }
  0xdc   : > { %2466 = vpow2.f32 %v558_v58 }
  0xdd   : > { %v3416_v63 = vpop.eup %2456  ;;  %v560_v15 = vmul.f32 1.442695, %v480_v61  ;;  %v562_v8 = vmul.f32 1.442695, %v481_v14 }
  0xde   : > { %674 = vadd.xlane.f32.xlu1 %v3412_v60  ;;  %676 = vadd.xlane.f32.xlu0 %v3416_v63  ;;  %v373_v9 = vpop.xlane.xlu0 %372  ;;  %v375_v0 = vpop.xlane.xlu1 %374 }
  0xdf   : > { %v3420_v1 = vpop.eup %2458  ;;  %2468 = vpow2.f32 %v560_v15  ;;  %v482_v54 = vsub.f32 %v3213_v18, %v373_v9  ;;  %v483_v16 = vsub.f32 %v3216_v19, %v375_v0 }
  0xe0   : > { %2470 = vpow2.f32 %v562_v8 }
  0xe1   : > { %v3424_v56 = vpop.eup %2460  ;;  %v564_v17 = vmul.f32 1.442695, %v482_v54  ;;  %v566_v10 = vmul.f32 1.442695, %v483_v16 }
  0xe2   : > { %678 = vadd.xlane.f32.xlu1 %v3420_v1  ;;  %680 = vadd.xlane.f32.xlu0 %v3424_v56  ;;  %v377_v11 = vpop.xlane.xlu0 %376  ;;  %v379_v3 = vpop.xlane.xlu1 %378 }
  0xe3   : > { %v3428_v52 = vpop.eup %2462  ;;  %2472 = vpow2.f32 %v564_v17  ;;  %v484_v57 = vsub.f32 %v3221_v20, %v377_v11  ;;  %v485_v18 = vsub.f32 %v3224_v21, %v379_v3 }
  0xe4   : > { %2474 = vpow2.f32 %v566_v10 }
  0xe5   : > { %v3432_v50 = vpop.eup %2464  ;;  %v568_v19 = vmul.f32 1.442695, %v484_v57  ;;  %v570_v12 = vmul.f32 1.442695, %v485_v18 }
  0xe6   : > { %682 = vadd.xlane.f32.xlu1 %v3428_v52  ;;  %684 = vadd.xlane.f32.xlu0 %v3432_v50  ;;  %v381_v13 = vpop.xlane.xlu0 %380  ;;  %v383_v58 = vpop.xlane.xlu1 %382 }
  0xe7   : > { %v3436_v6 = vpop.eup %2466  ;;  %2476 = vpow2.f32 %v568_v19  ;;  %v486_v7 = vsub.f32 %v3229_v22, %v381_v13  ;;  %v487_v20 = vsub.f32 %v3232_v23, %v383_v58 }
  0xe8   : > { %2478 = vpow2.f32 %v570_v12 }
  0xe9   : > { %v3440_v61 = vpop.eup %2468  ;;  %v572_v21 = vmul.f32 1.442695, %v486_v7  ;;  %v574_v14 = vmul.f32 1.442695, %v487_v20 }
  0xea   : > { %686 = vadd.xlane.f32.xlu1 %v3436_v6  ;;  %688 = vadd.xlane.f32.xlu0 %v3440_v61  ;;  %v385_v15 = vpop.xlane.xlu0 %384  ;;  %v387_v8 = vpop.xlane.xlu1 %386 }
  0xeb   : > { %v3444_v9 = vpop.eup %2470  ;;  %2480 = vpow2.f32 %v572_v21  ;;  %v488_v0 = vsub.f32 %v3237_v24, %v385_v15  ;;  %v489_v22 = vsub.f32 %v3240_v25, %v387_v8 }
  0xec   : > { %2482 = vpow2.f32 %v574_v14 }
  0xed   : > { %v3448_v54 = vpop.eup %2472  ;;  %v576_v23 = vmul.f32 1.442695, %v488_v0  ;;  %v578_v16 = vmul.f32 1.442695, %v489_v22 }
  0xee   : > { %690 = vadd.xlane.f32.xlu1 %v3444_v9  ;;  %692 = vadd.xlane.f32.xlu0 %v3448_v54  ;;  %v389_v17 = vpop.xlane.xlu0 %388  ;;  %v391_v10 = vpop.xlane.xlu1 %390 }
  0xef   : > { %v3452_v11 = vpop.eup %2474  ;;  %2484 = vpow2.f32 %v576_v23  ;;  %v490_v3 = vsub.f32 %v3245_v26, %v389_v17  ;;  %v491_v24 = vsub.f32 %v3248_v27, %v391_v10 }
  0xf0   : > { %2486 = vpow2.f32 %v578_v16 }
  0xf1   : > { %v3456_v57 = vpop.eup %2476  ;;  %v580_v25 = vmul.f32 1.442695, %v490_v3  ;;  %v582_v18 = vmul.f32 1.442695, %v491_v24 }
  0xf2   : > { %694 = vadd.xlane.f32.xlu1 %v3452_v11  ;;  %696 = vadd.xlane.f32.xlu0 %v3456_v57  ;;  %v393_v19 = vpop.xlane.xlu0 %392  ;;  %v395_v12 = vpop.xlane.xlu1 %394 }
  0xf3   : > { %v3460_v13 = vpop.eup %2478  ;;  %2488 = vpow2.f32 %v580_v25  ;;  %v492_v58 = vsub.f32 %v3253_v28, %v393_v19  ;;  %v493_v26 = vsub.f32 %v3256_v29, %v395_v12 }
  0xf4   : > { %2490 = vpow2.f32 %v582_v18 }
  0xf5   : > { %v3464_v7 = vpop.eup %2480  ;;  %v584_v27 = vmul.f32 1.442695, %v492_v58  ;;  %v586_v20 = vmul.f32 1.442695, %v493_v26 }
  0xf6   : > { %698 = vadd.xlane.f32.xlu1 %v3460_v13  ;;  %700 = vadd.xlane.f32.xlu0 %v3464_v7  ;;  %v397_v21 = vpop.xlane.xlu0 %396  ;;  %v399_v14 = vpop.xlane.xlu1 %398 }
  0xf7   : > { %v3468_v15 = vpop.eup %2482  ;;  %2492 = vpow2.f32 %v584_v27  ;;  %v494_v8 = vsub.f32 %v3261_v30, %v397_v21  ;;  %v495_v28 = vsub.f32 %v3264_v31, %v399_v14 }
  0xf8   : > { %2494 = vpow2.f32 %v586_v20 }
  0xf9   : > { %v3472_v0 = vpop.eup %2484  ;;  %v588_v29 = vmul.f32 1.442695, %v494_v8  ;;  %v590_v22 = vmul.f32 1.442695, %v495_v28 }
  0xfa   : > { %702 = vadd.xlane.f32.xlu1 %v3468_v15  ;;  %704 = vadd.xlane.f32.xlu0 %v3472_v0  ;;  %v401_v23 = vpop.xlane.xlu0 %400  ;;  %v403_v16 = vpop.xlane.xlu1 %402 }
  0xfb   : > { %v3476_v17 = vpop.eup %2486  ;;  %2496 = vpow2.f32 %v588_v29  ;;  %v496_v10 = vsub.f32 %v3269_v32, %v401_v23  ;;  %v497_v30 = vsub.f32 %v3272_v33, %v403_v16 }
  0xfc   : > { %2498 = vpow2.f32 %v590_v22 }
  0xfd   : > { %v3480_v3 = vpop.eup %2488  ;;  %v592_v31 = vmul.f32 1.442695, %v496_v10  ;;  %v594_v24 = vmul.f32 1.442695, %v497_v30 }
  0xfe   : > { %706 = vadd.xlane.f32.xlu1 %v3476_v17  ;;  %708 = vadd.xlane.f32.xlu0 %v3480_v3  ;;  %v405_v25 = vpop.xlane.xlu0 %404  ;;  %v407_v18 = vpop.xlane.xlu1 %406 }
  0xff   : > { %v3484_v19 = vpop.eup %2490  ;;  %2500 = vpow2.f32 %v592_v31  ;;  %v498_v12 = vsub.f32 %v3277_v34, %v405_v25  ;;  %v499_v32 = vsub.f32 %v3280_v35, %v407_v18 }
 0x100   : > { %2502 = vpow2.f32 %v594_v24 }
 0x101   : > { %v3488_v58 = vpop.eup %2492  ;;  %v596_v33 = vmul.f32 1.442695, %v498_v12  ;;  %v598_v26 = vmul.f32 1.442695, %v499_v32 }
 0x102   : > { %710 = vadd.xlane.f32.xlu1 %v3484_v19  ;;  %712 = vadd.xlane.f32.xlu0 %v3488_v58  ;;  %v409_v27 = vpop.xlane.xlu0 %408  ;;  %v411_v20 = vpop.xlane.xlu1 %410 }
 0x103   : > { %v3492_v21 = vpop.eup %2494  ;;  %2504 = vpow2.f32 %v596_v33  ;;  %v500_v14 = vsub.f32 %v3285_v36, %v409_v27  ;;  %v501_v34 = vsub.f32 %v3288_v37, %v411_v20 }
 0x104   : > { %2506 = vpow2.f32 %v598_v26 }
 0x105   : > { %v3496_v8 = vpop.eup %2496  ;;  %v600_v35 = vmul.f32 1.442695, %v500_v14  ;;  %v602_v28 = vmul.f32 1.442695, %v501_v34 }
 0x106   : > { %5124 = vst [vmem:[#allocation14_spill] sm:$0xff] %v3496_v8  ;;  %714 = vadd.xlane.f32.xlu1 %v3492_v21  ;;  %716 = vadd.xlane.f32.xlu0 %v3496_v8  ;;  %v413_v29 = vpop.xlane.xlu0 %412  ;;  %v415_v22 = vpop.xlane.xlu1 %414 }
 0x107   : > { %v3500_v23 = vpop.eup %2498  ;;  %2508 = vpow2.f32 %v600_v35  ;;  %v502_v16 = vsub.f32 %v3293_v38, %v413_v29  ;;  %v503_v36 = vsub.f32 %v3296_v39, %v415_v22 }
 0x108   : > { %2510 = vpow2.f32 %v602_v28 }
 0x109   : > { %v3504_v10 = vpop.eup %2500  ;;  %v604_v37 = vmul.f32 1.442695, %v502_v16  ;;  %v606_v30 = vmul.f32 1.442695, %v503_v36 }
 0x10a   : > { %5125 = vst [vmem:[#allocation15_spill] sm:$0xff] %v3504_v10  ;;  %718 = vadd.xlane.f32.xlu1 %v3500_v23  ;;  %720 = vadd.xlane.f32.xlu0 %v3504_v10  ;;  %v417_v31 = vpop.xlane.xlu0 %416  ;;  %v419_v24 = vpop.xlane.xlu1 %418 }
 0x10b   : > { %v3508_v25 = vpop.eup %2502  ;;  %2512 = vpow2.f32 %v604_v37  ;;  %v504_v18 = vsub.f32 %v3301_v40, %v417_v31  ;;  %v505_v38 = vsub.f32 %v3304_v41, %v419_v24 }
 0x10c   : > { %5126 = vst [vmem:[#allocation16_spill] sm:$0xff] %v3508_v25  ;;  %2514 = vpow2.f32 %v606_v30 }
 0x10d   : > { %v3512_v12 = vpop.eup %2504  ;;  %v608_v39 = vmul.f32 1.442695, %v504_v18  ;;  %v610_v32 = vmul.f32 1.442695, %v505_v38 }
 0x10e   : > { %5127 = vst [vmem:[#allocation17_spill] sm:$0xff] %v3512_v12  ;;  %722 = vadd.xlane.f32.xlu1 %v3508_v25  ;;  %724 = vadd.xlane.f32.xlu0 %v3512_v12  ;;  %v421_v33 = vpop.xlane.xlu0 %420  ;;  %v423_v26 = vpop.xlane.xlu1 %422 }
 0x10f   : > { %v3516_v27 = vpop.eup %2506  ;;  %2516 = vpow2.f32 %v608_v39  ;;  %v506_v20 = vsub.f32 %v3309_v42, %v421_v33  ;;  %v507_v40 = vsub.f32 %v3312_v43, %v423_v26 }
 0x110   : > { %5128 = vst [vmem:[#allocation18_spill] sm:$0xff] %v3516_v27  ;;  %2518 = vpow2.f32 %v610_v32 }
 0x111   : > { %v3520_v14 = vpop.eup %2508  ;;  %v612_v41 = vmul.f32 1.442695, %v506_v20  ;;  %v614_v34 = vmul.f32 1.442695, %v507_v40  ;;  %v5134_v20 = vld [vmem:[#allocation8_spill] sm:$0xff] }
 0x112   : > { %5129 = vst [vmem:[#allocation19_spill] sm:$0xff] %v3520_v14  ;;  %726 = vadd.xlane.f32.xlu1 %v3516_v27  ;;  %728 = vadd.xlane.f32.xlu0 %v3520_v14  ;;  %v425_v35 = vpop.xlane.xlu0 %424  ;;  %v427_v28 = vpop.xlane.xlu1 %426 }
 0x113   : > { %v3524_v29 = vpop.eup %2510  ;;  %2520 = vpow2.f32 %v612_v41  ;;  %v508_v22 = vsub.f32 %v3317_v44, %v425_v35  ;;  %v509_v42 = vsub.f32 %v3320_v45, %v427_v28 }
 0x114   : > { %5130 = vst [vmem:[#allocation20_spill] sm:$0xff] %v3524_v29  ;;  %2522 = vpow2.f32 %v614_v34 }
 0x115   : > { %v3528_v16 = vpop.eup %2512  ;;  %v616_v43 = vmul.f32 1.442695, %v508_v22  ;;  %v618_v36 = vmul.f32 1.442695, %v509_v42  ;;  %v5136_v22 = vld [vmem:[#allocation9_spill] sm:$0xff] }
 0x116   : > { %5131 = vst [vmem:[#allocation21_spill] sm:$0xff] %v3528_v16  ;;  %730 = vadd.xlane.f32.xlu1 %v3524_v29  ;;  %732 = vadd.xlane.f32.xlu0 %v3528_v16  ;;  %v429_v37 = vpop.xlane.xlu0 %428  ;;  %v431_v30 = vpop.xlane.xlu1 %430 }
 0x117   : > { %v3532_v31 = vpop.eup %2514  ;;  %2524 = vpow2.f32 %v616_v43  ;;  %v510_v24 = vsub.f32 %v3325_v46, %v429_v37  ;;  %v511_v44 = vsub.f32 %v3328_v47, %v431_v30  ;;  %v5137_v43 = vld [vmem:[#allocation10_spill] sm:$0xff] }
 0x118   : > { %5132 = vst [vmem:[#allocation22_spill] sm:$0xff] %v3532_v31  ;;  %2526 = vpow2.f32 %v618_v36 }
 0x119   : > { %v3536_v18 = vpop.eup %2516  ;;  %v620_v45 = vmul.f32 1.442695, %v510_v24  ;;  %v622_v38 = vmul.f32 1.442695, %v511_v44 }
 0x11a   : > { %734 = vadd.xlane.f32.xlu1 %v3532_v31  ;;  %736 = vadd.xlane.f32.xlu0 %v3536_v18  ;;  %v433_v39 = vpop.xlane.xlu0 %432  ;;  %v435_v32 = vpop.xlane.xlu1 %434 }
 0x11b   : > { %v3540_v33 = vpop.eup %2518  ;;  %2528 = vpow2.f32 %v620_v45  ;;  %v512_v26 = vsub.f32 %v3333_v48, %v433_v39  ;;  %v513_v46 = vsub.f32 %v5134_v20, %v435_v32  ;;  %v5140_v32 = vld [vmem:[#allocation12_spill] sm:$0xff] }
 0x11c   : > { %5133 = vst [vmem:[#allocation23_spill] sm:$0xff] %v3540_v33  ;;  %2530 = vpow2.f32 %v622_v38  ;;  %v5139_v38 = vld [vmem:[#allocation11_spill] sm:$0xff] }
 0x11d   : > { %v3544_v40 = vpop.eup %2520  ;;  %v624_v47 = vmul.f32 1.442695, %v512_v26  ;;  %v626_v41 = vmul.f32 1.442695, %v513_v46 }
 0x11e   : > { %738 = vadd.xlane.f32.xlu1 %v3540_v33  ;;  %740 = vadd.xlane.f32.xlu0 %v3544_v40  ;;  %v437_v34 = vpop.xlane.xlu0 %436  ;;  %v439_v35 = vpop.xlane.xlu1 %438 }
 0x11f   : > { %v3548_v28 = vpop.eup %2522  ;;  %2532 = vpow2.f32 %v624_v47  ;;  %v514_v42 = vsub.f32 %v5136_v22, %v437_v34  ;;  %v515_v48 = vsub.f32 %v5137_v43, %v439_v35  ;;  %v5143_v35 = vld [vmem:[#allocation13_spill] sm:$0xff] }
 0x120   : > { %5135 = vst [vmem:[#allocation8_spill] sm:$0xff] %v3548_v28  ;;  %2534 = vpow2.f32 %v626_v41 }
 0x121   : > { %v3552_v36 = vpop.eup %2524  ;;  %v628_v37 = vmul.f32 1.442695, %v514_v42  ;;  %v630_v30 = vmul.f32 1.442695, %v515_v48 }
 0x122   : > { %742 = vadd.xlane.f32.xlu1 %v3548_v28  ;;  %744 = vadd.xlane.f32.xlu0 %v3552_v36  ;;  %v441_v24 = vpop.xlane.xlu0 %440  ;;  %v443_v44 = vpop.xlane.xlu1 %442 }
 0x123   : > { %v3556_v45 = vpop.eup %2526  ;;  %2536 = vpow2.f32 %v628_v37  ;;  %v516_v39 = vsub.f32 %v5139_v38, %v441_v24  ;;  %v517_v26 = vsub.f32 %v5140_v32, %v443_v44 }
 0x124   : > { %5138 = vst [vmem:[#allocation9_spill] sm:$0xff] %v3556_v45  ;;  %2538 = vpow2.f32 %v630_v30 }
 0x125   : > { %v3560_v20 = vpop.eup %2528  ;;  %v632_v46 = vmul.f32 1.442695, %v516_v39  ;;  %v634_v47 = vmul.f32 1.442695, %v517_v26 }
 0x126   : > { %5141 = vst [vmem:[#allocation10_spill] sm:$0xff] %v3560_v20  ;;  %746 = vadd.xlane.f32.xlu1 %v3556_v45  ;;  %748 = vadd.xlane.f32.xlu0 %v3560_v20  ;;  %v445_v41 = vpop.xlane.xlu0 %444  ;;  %v3564_v34 = vpop.eup %2530  ;;  %v277_v45 = vld [vmem:[%s3598_s10 + $0x28] sm:$0xff] }
 0x127   : > { %5142 = vst [vmem:[#allocation11_spill] sm:$0xff] %v3564_v34  ;;  %2540 = vpow2.f32 %v632_v46  ;;  %v518_v22 = vsub.f32 %v5143_v35, %v445_v41  ;;  %v3589_v39 = vpop.xlane.xlu1 %446  ;;  %v272_v46 = vld [vmem:[%s3598_s10] sm:$0xff]  ;;  %v274_v41 = vld [vmem:[%s3598_s10 + $0x10] sm:$0xff]  ;;  %v273_v35 = vld [vmem:[%s3598_s10 + $0x8] sm:$0xff] }
 0x128   : > { %2542 = vpow2.f32 %v634_v47  ;;  %5151 = vst [vmem:[#allocation29_spill] sm:$0xff] %v3589_v39  ;;  %v321_v39 = vld [vmem:[%s3598_s10 + $0x188] sm:$0xff] }
 0x129   : > { %v3567_v42 = vpop.eup %2532  ;;  %v636_v43 = vmul.f32 1.442695, %v518_v22 }
 0x12a   : > { %5144 = vst [vmem:[#allocation12_spill] sm:$0xff] %v3567_v42  ;;  %750 = vadd.xlane.f32.xlu1 %v3564_v34  ;;  %752 = vadd.xlane.f32.xlu0 %v3567_v42  ;;  %v3571_v48 = vpop.eup %2534  ;;  %v3591_v32 = vpop.xlane.xlu0 %448  ;;  %v3848_v42 = vstv %s206_s11 }
 0x12b   : > { %5145 = vst [vmem:[#allocation13_spill] sm:$0xff] %v3571_v48  ;;  %2544 = vpow2.f32 %v636_v43  ;;  %5152 = vst [vmem:[#allocation30_spill] sm:$0xff] %v3591_v32  ;;  %v3600_v26 = vpop.xlane.xlu1 %450 }
 0x12c   : > { %5153 = vst [vmem:[#allocation31_spill] sm:$0xff] %v3600_v26 }
 0x12d   : > { %v3573_v37 = vpop.eup %2536 }
 0x12e   : > { %5146 = vst [vmem:[#allocation24_spill] sm:$0xff] %v3573_v37  ;;  %754 = vadd.xlane.f32.xlu1 %v3571_v48  ;;  %756 = vadd.xlane.f32.xlu0 %v3573_v37  ;;  %v3577_v30 = vpop.eup %2538  ;;  %v3603_v47 = vpop.xlane.xlu0 %452  ;;  %v276_v48 = vld [vmem:[%s3598_s10 + $0x20] sm:$0xff] }
 0x12f   : > { %5147 = vst [vmem:[#allocation25_spill] sm:$0xff] %v3577_v30  ;;  %5154 = vst [vmem:[#allocation32_spill] sm:$0xff] %v3603_v47  ;;  %v3607_v22 = vpop.xlane.xlu1 %454 }
 0x130   : > { %5155 = vst [vmem:[#allocation33_spill] sm:$0xff] %v3607_v22 }
 0x131   : > { %v3579_v24 = vpop.eup %2540 }
 0x132   : > { %5148 = vst [vmem:[#allocation26_spill] sm:$0xff] %v3579_v24  ;;  %758 = vadd.xlane.f32.xlu1 %v3577_v30  ;;  %760 = vadd.xlane.f32.xlu0 %v3579_v24  ;;  %v3583_v44 = vpop.eup %2542  ;;  %v3609_v43 = vpop.xlane.xlu0 %456 }
 0x133   : > { %5149 = vst [vmem:[#allocation27_spill] sm:$0xff] %v3583_v44  ;;  %5156 = vst [vmem:[#allocation34_spill] sm:$0xff] %v3609_v43  ;;  %v3612_v30 = vpop.xlane.xlu1 %458 }
 0x134   : > { %5157 = vst [vmem:[#allocation35_spill] sm:$0xff] %v3612_v30 }
 0x135   : > { %v3585_v38 = vpop.eup %2544 }
 0x136   : > { %5150 = vst [vmem:[#allocation28_spill] sm:$0xff] %v3585_v38  ;;  %762 = vadd.xlane.f32.xlu1 %v3583_v44  ;;  %764 = vadd.xlane.f32.xlu0 %v3585_v38  ;;  %v275_v44 = vld [vmem:[%s3598_s10 + $0x18] sm:$0xff]  ;;  %v3615_v34 = vpop.xlane.xlu0 %460 }
 0x137   : > { %5158 = vst [vmem:[#allocation36_spill] sm:$0xff] %v3615_v34  ;;  %v3618_v28 = vpop.xlane.xlu1 %462 }
 0x138   : > { %5159 = vst [vmem:[#allocation37_spill] sm:$0xff] %v3618_v28 }
 0x147   : > { %787 = vperm.xlu1 %2434, %v272_v46  }
 0x14b   : > { %793 = vperm.xlu1 %2434, %v274_v41  }
 0x14c   : > { %790 = vperm.xlu0 %2435, %v273_v35  }
 0x14f   : > { %796 = vperm.xlu1 %2434, %v275_v44  }
 0x153   : > { %799 = vperm.xlu1 %2434, %v276_v48  }
 0x157   : > { %802 = vperm.xlu1 %2434, %v277_v45   ;;  %v3620_v46 = vpop.xlane.xlu0 %656 }
 0x15b   : > { %v3622_v33 = vpop.xlane.xlu1 %658  ;;  %v3624_v41 = vpop.xlane.xlu0 %660 }
 0x15f   : > { %v3626_v31 = vpop.xlane.xlu1 %662  ;;  %v3628_v35 = vpop.xlane.xlu0 %664 }
 0x163   : > { %v3630_v44 = vpop.xlane.xlu1 %666  ;;  %v3632_v38 = vpop.xlane.xlu0 %668 }
 0x167   : > { %v3634_v16 = vpop.xlane.xlu1 %670  ;;  %v3636_v48 = vpop.xlane.xlu0 %672 }
 0x16b   : > { %v3638_v28 = vpop.xlane.xlu1 %674  ;;  %v3640_v45 = vpop.xlane.xlu0 %676 }
 0x16c   : > { %5160 = vst [vmem:[#allocation38_spill] sm:$0xff] %v3638_v28  ;;  %5161 = vst [vmem:[#allocation39_spill] sm:$0xff] %v3640_v45 }
 0x16f   : > { %v3642_v34 = vpop.xlane.xlu1 %678  ;;  %v3644_v30 = vpop.xlane.xlu0 %680 }
 0x170   : > { %5162 = vst [vmem:[#allocation40_spill] sm:$0xff] %v3642_v34  ;;  %5163 = vst [vmem:[#allocation41_spill] sm:$0xff] %v3644_v30 }
 0x173   : > { %v3646_v43 = vpop.xlane.xlu1 %682  ;;  %v3648_v22 = vpop.xlane.xlu0 %684 }
 0x174   : > { %5164 = vst [vmem:[#allocation42_spill] sm:$0xff] %v3646_v43  ;;  %5165 = vst [vmem:[#allocation43_spill] sm:$0xff] %v3648_v22 }
 0x177   : > { %v3650_v29 = vpop.xlane.xlu1 %686  ;;  %v3652_v24 = vpop.xlane.xlu0 %688 }
 0x178   : > { %5166 = vst [vmem:[#allocation44_spill] sm:$0xff] %v3650_v29  ;;  %5167 = vst [vmem:[#allocation45_spill] sm:$0xff] %v3652_v24 }
 0x17b   : > { %v3654_v47 = vpop.xlane.xlu1 %690  ;;  %v3656_v26 = vpop.xlane.xlu0 %692 }
 0x17c   : > { %5168 = vst [vmem:[#allocation46_spill] sm:$0xff] %v3654_v47  ;;  %5169 = vst [vmem:[#allocation47_spill] sm:$0xff] %v3656_v26 }
 0x17f   : > { %v3658_v32 = vpop.xlane.xlu1 %694  ;;  %v3660_v28 = vpop.xlane.xlu0 %696 }
 0x180   : > { %5170 = vst [vmem:[#allocation48_spill] sm:$0xff] %v3658_v32  ;;  %5171 = vst [vmem:[#allocation49_spill] sm:$0xff] %v3660_v28 }
 0x183   : > { %v3662_v45 = vpop.xlane.xlu1 %698  ;;  %v3664_v34 = vpop.xlane.xlu0 %700 }
 0x184   : > { %5172 = vst [vmem:[#allocation50_spill] sm:$0xff] %v3662_v45  ;;  %5173 = vst [vmem:[#allocation51_spill] sm:$0xff] %v3664_v34 }
 0x187   : > { %v3666_v30 = vpop.xlane.xlu1 %702  ;;  %v3668_v43 = vpop.xlane.xlu0 %704 }
 0x188   : > { %5174 = vst [vmem:[#allocation52_spill] sm:$0xff] %v3666_v30  ;;  %5175 = vst [vmem:[#allocation53_spill] sm:$0xff] %v3668_v43 }
 0x18b   : > { %v3670_v22 = vpop.xlane.xlu1 %706  ;;  %v3672_v29 = vpop.xlane.xlu0 %708 }
 0x18c   : > { %5176 = vst [vmem:[#allocation54_spill] sm:$0xff] %v3670_v22  ;;  %5177 = vst [vmem:[#allocation55_spill] sm:$0xff] %v3672_v29 }
 0x18f   : > { %v3674_v24 = vpop.xlane.xlu1 %710  ;;  %v3676_v47 = vpop.xlane.xlu0 %712 }
 0x190   : > { %5178 = vst [vmem:[#allocation56_spill] sm:$0xff] %v3674_v24  ;;  %5179 = vst [vmem:[#allocation57_spill] sm:$0xff] %v3676_v47 }
 0x193   : > { %v3678_v26 = vpop.xlane.xlu1 %714  ;;  %v3680_v32 = vpop.xlane.xlu0 %716 }
 0x194   : > { %5180 = vst [vmem:[#allocation58_spill] sm:$0xff] %v3678_v26  ;;  %5181 = vst [vmem:[#allocation59_spill] sm:$0xff] %v3680_v32 }
 0x197   : > { %v3682_v28 = vpop.xlane.xlu1 %718  ;;  %v3684_v45 = vpop.xlane.xlu0 %720 }
 0x198   : > { %5182 = vst [vmem:[#allocation60_spill] sm:$0xff] %v3682_v28  ;;  %5183 = vst [vmem:[#allocation61_spill] sm:$0xff] %v3684_v45 }
 0x19b   : > { %v3686_v34 = vpop.xlane.xlu1 %722  ;;  %v3688_v30 = vpop.xlane.xlu0 %724 }
 0x19c   : > { %5184 = vst [vmem:[#allocation62_spill] sm:$0xff] %v3686_v34  ;;  %5185 = vst [vmem:[#allocation63_spill] sm:$0xff] %v3688_v30 }
 0x19f   : > { %v3690_v43 = vpop.xlane.xlu1 %726  ;;  %v3692_v22 = vpop.xlane.xlu0 %728 }
 0x1a0   : > { %5186 = vst [vmem:[#allocation64_spill] sm:$0xff] %v3690_v43  ;;  %5187 = vst [vmem:[#allocation65_spill] sm:$0xff] %v3692_v22 }
 0x1a3   : > { %v3694_v29 = vpop.xlane.xlu1 %730  ;;  %v3696_v24 = vpop.xlane.xlu0 %732 }
 0x1a4   : > { %5188 = vst [vmem:[#allocation66_spill] sm:$0xff] %v3694_v29  ;;  %5189 = vst [vmem:[#allocation67_spill] sm:$0xff] %v3696_v24 }
 0x1a7   : > { %v3698_v47 = vpop.xlane.xlu1 %734  ;;  %v3700_v26 = vpop.xlane.xlu0 %736 }
 0x1a8   : > { %5190 = vst [vmem:[#allocation68_spill] sm:$0xff] %v3698_v47  ;;  %5191 = vst [vmem:[#allocation69_spill] sm:$0xff] %v3700_v26 }
 0x1ab   : > { %v3702_v32 = vpop.xlane.xlu1 %738  ;;  %v3704_v28 = vpop.xlane.xlu0 %740 }
 0x1ac   : > { %5192 = vst [vmem:[#allocation70_spill] sm:$0xff] %v3702_v32  ;;  %5193 = vst [vmem:[#allocation71_spill] sm:$0xff] %v3704_v28  ;;  %v5085_v28 = vlaneseq }
 0x1af   : > { %v3706_v45 = vpop.xlane.xlu1 %742  ;;  %v3708_v34 = vpop.xlane.xlu0 %744 }
 0x1b0   : > { %5194 = vst [vmem:[#allocation72_spill] sm:$0xff] %v3706_v45  ;;  %5195 = vst [vmem:[#allocation73_spill] sm:$0xff] %v3708_v34  ;;  %v3729_v34 = vand.u32 127, %v5085_v28 }
 0x1b3   : > { %v3710_v30 = vpop.xlane.xlu1 %746  ;;  %v3712_v43 = vpop.xlane.xlu0 %748 }
 0x1b4   : > { %5196 = vst [vmem:[#allocation74_spill] sm:$0xff] %v3710_v30  ;;  %5197 = vst [vmem:[#allocation75_spill] sm:$0xff] %v3712_v43 }
 0x1b7   : > { %v3714_v22 = vpop.xlane.xlu1 %750  ;;  %v3716_v29 = vpop.xlane.xlu0 %752 }
 0x1b8   : > { %5198 = vst [vmem:[#allocation76_spill] sm:$0xff] %v3714_v22  ;;  %5199 = vst [vmem:[#allocation77_spill] sm:$0xff] %v3716_v29 }
 0x1bb   : > { %v3718_v24 = vpop.xlane.xlu1 %754  ;;  %v3720_v47 = vpop.xlane.xlu0 %756 }
 0x1bc   : > { %5200 = vst [vmem:[#allocation78_spill] sm:$0xff] %v3718_v24  ;;  %5201 = vst [vmem:[#allocation79_spill] sm:$0xff] %v3720_v47 }
 0x1bf   : > { %v3722_v26 = vpop.xlane.xlu1 %758  ;;  %v3724_v32 = vpop.xlane.xlu0 %760 }
 0x1c0   : > { %5202 = vst [vmem:[#allocation80_spill] sm:$0xff] %v3722_v26  ;;  %5203 = vst [vmem:[#allocation81_spill] sm:$0xff] %v3724_v32  ;;  %v318_v26 = vld [vmem:[%s3598_s10 + $0x170] sm:$0xff] }
 0x1c3   : > { %v3726_v45 = vpop.xlane.xlu1 %762  ;;  %v3731_v30 = vpop.xlane.xlu0 %764 }
 0x1c4   : > { %5204 = vst [vmem:[#allocation82_spill] sm:$0xff] %v3726_v45  ;;  %5205 = vst [vmem:[#allocation83_spill] sm:$0xff] %v3731_v30  ;;  %v317_v45 = vld [vmem:[%s3598_s10 + $0x168] sm:$0xff] }
 0x1c7   : > { %v788_v43 = vpop.permute.xlu1 %787 }
 0x1c8   : > { %vm978_vm0 = vcmp.eq.s32.totalorder %v3729_v34, %v788_v43  ;;  %v289_v43 = vld [vmem:[%s3598_s10 + $0x88] sm:$0xff] }
 0x1c9   : > { %v1042_v29 = vsel %vm978_vm0, %v3377_v51, 0.0 }
 0x1ca   : > { %1106 = vadd.xlane.f32.xlu1 %v1042_v29 }
 0x1cb   : > { %v794_v24 = vpop.permute.xlu1 %793  ;;  %v791_v47 = vpop.permute.xlu0 %790 }
 0x1cc   : > { %vm980_vm1 = vcmp.eq.s32.totalorder %v3729_v34, %v794_v24  ;;  %vm979_vm2 = vcmp.eq.s32.totalorder %v3729_v34, %v791_v47  ;;  %v280_v24 = vld [vmem:[%s3598_s10 + $0x40] sm:$0xff]  ;;  %v285_v47 = vld [vmem:[%s3598_s10 + $0x68] sm:$0xff] }
 0x1cd   : > { %v1044_v32 = vsel %vm980_vm1, %v3380_v5, 0.0  ;;  %v1043_v28 = vsel %vm979_vm2, %v3384_v59, 0.0 }
 0x1ce   : > { %1110 = vadd.xlane.f32.xlu1 %v1044_v32  ;;  %1108 = vadd.xlane.f32.xlu0 %v1043_v28  ;;  %v283_v32 = vld [vmem:[%s3598_s10 + $0x58] sm:$0xff] }
 0x1cf   : > { %v797_v30 = vpop.permute.xlu1 %796 }
 0x1d0   : > { %vm981_vm3 = vcmp.eq.s32.totalorder %v3729_v34, %v797_v30  ;;  %v278_v30 = vld [vmem:[%s3598_s10 + $0x30] sm:$0xff] }
 0x1d1   : > { %v1045_v51 = vsel %vm981_vm3, %v3388_v62, 0.0  ;;  %v279_v62 = vld [vmem:[%s3598_s10 + $0x38] sm:$0xff] }
 0x1d2   : > { %1112 = vadd.xlane.f32.xlu0 %v1045_v51  ;;  %v291_v51 = vld [vmem:[%s3598_s10 + $0x98] sm:$0xff] }
 0x1d3   : > { %v800_v29 = vpop.permute.xlu1 %799 }
 0x1d4   : > { %vm982_vm4 = vcmp.eq.s32.totalorder %v3729_v34, %v800_v29  ;;  %v293_v29 = vld [vmem:[%s3598_s10 + $0xa8] sm:$0xff] }
 0x1d5   : > { %v1046_v5 = vsel %vm982_vm4, %v3392_v53, 0.0  ;;  %v281_v53 = vld [vmem:[%s3598_s10 + $0x48] sm:$0xff] }
 0x1d6   : > { %1114 = vadd.xlane.f32.xlu1 %v1046_v5  ;;  %v295_v5 = vld [vmem:[%s3598_s10 + $0xb8] sm:$0xff] }
 0x1d7   : > { %v803_v59 = vpop.permute.xlu1 %802 }
 0x1d8   : > { %vm983_vm5 = vcmp.eq.s32.totalorder %v3729_v34, %v803_v59  ;;  %v297_v59 = vld [vmem:[%s3598_s10 + $0xc8] sm:$0xff] }
 0x1d9   : > { %v1047_v28 = vsel %vm983_vm5, %v3396_v55, 0.0  ;;  %v287_v55 = vld [vmem:[%s3598_s10 + $0x78] sm:$0xff] }
 0x1da   : > { %1116 = vadd.xlane.f32.xlu1 %v1047_v28  ;;  %v299_v28 = vld [vmem:[%s3598_s10 + $0xd8] sm:$0xff] }
 0x1eb   : > { %805 = vperm.xlu1 %2434, %v278_v30   ;;  %v301_v30 = vld [vmem:[%s3598_s10 + $0xe8] sm:$0xff] }
 0x1ef   : > { %808 = vperm.xlu1 %2434, %v279_v62   ;;  %v303_v62 = vld [vmem:[%s3598_s10 + $0xf8] sm:$0xff] }
 0x1f3   : > { %811 = vperm.xlu1 %2434, %v280_v24   ;;  %v305_v24 = vld [vmem:[%s3598_s10 + $0x108] sm:$0xff] }
 0x1f7   : > { %814 = vperm.xlu1 %2434, %v281_v53   ;;  %v308_v53 = vld [vmem:[%s3598_s10 + $0x120] sm:$0xff] }
 0x1fb   : > { %820 = vperm.xlu1 %2434, %v283_v32   ;;  %v309_v32 = vld [vmem:[%s3598_s10 + $0x128] sm:$0xff] }
 0x1ff   : > { %826 = vperm.xlu1 %2434, %v285_v47   ;;  %v311_v47 = vld [vmem:[%s3598_s10 + $0x138] sm:$0xff] }
 0x203   : > { %832 = vperm.xlu1 %2434, %v287_v55   ;;  %v312_v55 = vld [vmem:[%s3598_s10 + $0x140] sm:$0xff] }
 0x207   : > { %838 = vperm.xlu1 %2434, %v289_v43  }
 0x20b   : > { %844 = vperm.xlu1 %2434, %v291_v51  }
 0x20f   : > { %850 = vperm.xlu1 %2434, %v293_v29  }
 0x213   : > { %856 = vperm.xlu1 %2434, %v295_v5  }
 0x217   : > { %862 = vperm.xlu1 %2434, %v297_v59  }
 0x21b   : > { %868 = vperm.xlu1 %2434, %v299_v28  }
 0x21f   : > { %874 = vperm.xlu1 %2434, %v301_v30  }
 0x223   : > { %880 = vperm.xlu1 %2434, %v303_v62  }
 0x227   : > { %886 = vperm.xlu1 %2434, %v305_v24  }
 0x22b   : > { %895 = vperm.xlu1 %2434, %v308_v53  }
 0x22f   : > { %898 = vperm.xlu1 %2434, %v309_v32  }
 0x233   : > { %904 = vperm.xlu1 %2434, %v311_v47   ;;  %v282_v47 = vld [vmem:[%s3598_s10 + $0x50] sm:$0xff] }
 0x237   : > { %907 = vperm.xlu1 %2434, %v312_v55   ;;  %v286_v55 = vld [vmem:[%s3598_s10 + $0x70] sm:$0xff] }
 0x257   : > { %v3765_v43 = vpop.xlane.xlu1 %1106 }
 0x25b   : > { %v3767_v51 = vpop.xlane.xlu1 %1110  ;;  %v1109_v14 = vpop.xlane.xlu0 %1108 }
 0x25c   : > { %2546 = vlog2.f32 %v1109_v14 }
 0x25d   : > { %2548 = vlog2.f32 %v3622_v33 }
 0x25e   : > { %2550 = vlog2.f32 %v3765_v43 }
 0x25f   : > { %2552 = vlog2.f32 %v3620_v46  ;;  %v324_v46 = vld [vmem:[%s3598_s10 + $0x1a0] sm:$0xff] }
 0x260   : > { %2554 = vlog2.f32 %v3767_v51 }
 0x261   : > { %2556 = vlog2.f32 %v3624_v41 }
 0x263   : > { %v3769_v29 = vpop.xlane.xlu1 %1114 }
 0x266   : > { %v2547_v14 = vpop.eup %2546 }
 0x267   : > { %v3771_v5 = vpop.xlane.xlu1 %1116  ;;  %v2549_v33 = vpop.eup %2548  ;;  %v1237_v41 = vmul.f32 0.6931472, %v2547_v14  ;;  %v326_v14 = vld [vmem:[%s3598_s10 + $0x1b0] sm:$0xff] }
 0x268   : > { %v2551_v43 = vpop.eup %2550 }
 0x269   : > { %v2553_v51 = vpop.eup %2552 }
 0x26b   : > { %v806_v59 = vpop.permute.xlu1 %805 }
 0x26c   : > { %vm984_vm6 = vcmp.eq.s32.totalorder %v3729_v34, %v806_v59  ;;  %v288_v59 = vld [vmem:[%s3598_s10 + $0x80] sm:$0xff] }
 0x26d   : > { %v1048_v28 = vsel %vm984_vm6, %v3400_v2, 0.0 }
 0x26e   : > { %1118 = vadd.xlane.f32.xlu0 %v1048_v28  ;;  %v292_v28 = vld [vmem:[%s3598_s10 + $0xa0] sm:$0xff] }
 0x26f   : > { %v809_v30 = vpop.permute.xlu1 %808 }
 0x270   : > { %vm985_vm7 = vcmp.eq.s32.totalorder %v3729_v34, %v809_v30  ;;  %v296_v30 = vld [vmem:[%s3598_s10 + $0xc0] sm:$0xff] }
 0x271   : > { %v1049_v62 = vsel %vm985_vm7, %v3404_v4, 0.0  ;;  %v284_v4 = vld [vmem:[%s3598_s10 + $0x60] sm:$0xff] }
 0x272   : > { %1120 = vadd.xlane.f32.xlu1 %v1049_v62 }
 0x273   : > { %v812_v24 = vpop.permute.xlu1 %811 }
 0x274   : > { %vm986_vm8 = vcmp.eq.s32.totalorder %v3729_v34, %v812_v24  ;;  %v298_v24 = vld [vmem:[%s3598_s10 + $0xd0] sm:$0xff] }
 0x275   : > { %v1050_v53 = vsel %vm986_vm8, %v3408_v49, 0.0  ;;  %v290_v49 = vld [vmem:[%s3598_s10 + $0x90] sm:$0xff] }
 0x276   : > { %1122 = vadd.xlane.f32.xlu1 %v1050_v53  ;;  %v300_v53 = vld [vmem:[%s3598_s10 + $0xe0] sm:$0xff] }
 0x277   : > { %v815_v32 = vpop.permute.xlu1 %814 }
 0x278   : > { %vm987_vm9 = vcmp.eq.s32.totalorder %v3729_v34, %v815_v32 }
 0x279   : > { %v1051_v2 = vsel %vm987_vm9, %v3412_v60, 0.0  ;;  %v294_v60 = vld [vmem:[%s3598_s10 + $0xb0] sm:$0xff] }
 0x27a   : > { %1124 = vadd.xlane.f32.xlu1 %v1051_v2  ;;  %v302_v2 = vld [vmem:[%s3598_s10 + $0xf0] sm:$0xff] }
 0x27b   : > { %v3789_v62 = vpop.permute.xlu1 %820 }
 0x27c   : > { %vm989_vm11 = vcmp.eq.s32.totalorder %v3729_v34, %v3789_v62 }
 0x27f   : > { %v3793_v32 = vpop.permute.xlu1 %826 }
 0x280   : > { %vm991_vm0 = vcmp.eq.s32.totalorder %v3729_v34, %v3793_v32 }
 0x284   : > { %817 = vperm.xlu0 %2435, %v282_v47   ;;  %v3796_v47 = vpop.permute.xlu1 %832 }
 0x285   : > { %vm993_vm4 = vcmp.eq.s32.totalorder %v3729_v34, %v3796_v47 }
 0x288   : > { %823 = vperm.xlu0 %2435, %v284_v4   ;;  %v304_v4 = vld [vmem:[%s3598_s10 + $0x100] sm:$0xff] }
 0x28c   : > { %829 = vperm.xlu0 %2435, %v286_v55   ;;  %v306_v55 = vld [vmem:[%s3598_s10 + $0x110] sm:$0xff] }
 0x290   : > { %835 = vperm.xlu0 %2435, %v288_v59   ;;  %v3800_v59 = vpop.permute.xlu1 %838 }
 0x291   : > { %vm995_vm9 = vcmp.eq.s32.totalorder %v3729_v34, %v3800_v59 }
 0x294   : > { %841 = vperm.xlu0 %2435, %v290_v49   ;;  %v307_v49 = vld [vmem:[%s3598_s10 + $0x118] sm:$0xff] }
 0x298   : > { %847 = vperm.xlu0 %2435, %v292_v28   ;;  %v3803_v28 = vpop.permute.xlu1 %844 }
 0x29c   : > { %853 = vperm.xlu0 %2435, %v294_v60   ;;  %v310_v60 = vld [vmem:[%s3598_s10 + $0x130] sm:$0xff] }
 0x2a0   : > { %859 = vperm.xlu0 %2435, %v296_v30   ;;  %v313_v30 = vld [vmem:[%s3598_s10 + $0x148] sm:$0xff] }
 0x2a4   : > { %865 = vperm.xlu0 %2435, %v298_v24   ;;  %v3807_v24 = vpop.permute.xlu1 %850 }
 0x2a8   : > { %871 = vperm.xlu0 %2435, %v300_v53   ;;  %v314_v53 = vld [vmem:[%s3598_s10 + $0x150] sm:$0xff] }
 0x2ac   : > { %877 = vperm.xlu0 %2435, %v302_v2   ;;  %v3810_v2 = vpop.permute.xlu1 %856 }
 0x2b0   : > { %883 = vperm.xlu0 %2435, %v304_v4   ;;  %v315_v4 = vld [vmem:[%s3598_s10 + $0x158] sm:$0xff] }
 0x2b4   : > { %889 = vperm.xlu0 %2435, %v306_v55   ;;  %v316_v55 = vld [vmem:[%s3598_s10 + $0x160] sm:$0xff] }
 0x2b8   : > { %892 = vperm.xlu0 %2435, %v307_v49   ;;  %v3814_v49 = vpop.permute.xlu1 %862 }
 0x2bc   : > { %901 = vperm.xlu0 %2435, %v310_v60   ;;  %v3817_v60 = vpop.permute.xlu1 %868 }
 0x2c0   : > { %910 = vperm.xlu0 %2435, %v313_v30   ;;  %v319_v30 = vld [vmem:[%s3598_s10 + $0x178] sm:$0xff]  ;;  %v3821_v22 = vpop.permute.xlu1 %874 }
 0x2c4   : > { %913 = vperm.xlu0 %2435, %v314_v53   ;;  %v320_v53 = vld [vmem:[%s3598_s10 + $0x180] sm:$0xff] }
 0x2c8   : > { %916 = vperm.xlu0 %2435, %v315_v4   ;;  %v3824_v4 = vpop.permute.xlu1 %880 }
 0x2cc   : > { %919 = vperm.xlu0 %2435, %v316_v55   ;;  %v3831_v55 = vpop.permute.xlu1 %886 }
 0x2cd   : > { %5206 = vst [vmem:[#allocation84_spill] sm:$0xff] %v3831_v55 }
 0x2d0   : > { %922 = vperm.xlu0 %2435, %v317_v45   ;;  %v322_v45 = vld [vmem:[%s3598_s10 + $0x190] sm:$0xff] }
 0x2d4   : > { %925 = vperm.xlu0 %2435, %v318_v26   ;;  %v1113_v26 = vpop.xlane.xlu0 %1112 }
 0x2d5   : > { %2558 = vlog2.f32 %v1113_v26 }
 0x2d6   : > { %2560 = vlog2.f32 %v3626_v31  ;;  %v1365_v31 = vmul.f32 0.6931472, %v2549_v33 }
 0x2d7   : > { %2562 = vlog2.f32 %v3769_v29  ;;  %v325_v29 = vld [vmem:[%s3598_s10 + $0x1a8] sm:$0xff] }
 0x2d8   : > { %928 = vperm.xlu0 %2435, %v319_v30   ;;  %v323_v30 = vld [vmem:[%s3598_s10 + $0x198] sm:$0xff]  ;;  %2564 = vlog2.f32 %v3628_v35  ;;  %v1491_v35 = vsub.f32 %v1237_v41, %v1365_v31 }
 0x2d9   : > { %2566 = vlog2.f32 %v3771_v5 }
 0x2da   : > { %2568 = vlog2.f32 %v3630_v44 }
 0x2db   : > { %2570 = vlog2.f32 %v3632_v38 }
 0x2dc   : > { %931 = vperm.xlu0 %2435, %v320_v53   ;;  %v1235_v53 = vmul.f32 0.6931472, %v2551_v43  ;;  %2572 = vlog2.f32 %v3634_v16 }
 0x2dd   : > { %2574 = vlog2.f32 %v3636_v48 }
 0x2e0   : > { %934 = vperm.xlu0 %2435, %v321_v39   ;;  %v3839_v39 = vpop.permute.xlu1 %895 }
 0x2e1   : > { %5207 = vst [vmem:[#allocation85_spill] sm:$0xff] %v3839_v39 }
 0x2e4   : > { %937 = vperm.xlu0 %2435, %v322_v45   ;;  %v2555_v45 = vpop.eup %2554  ;;  %v3845_v37 = vpop.permute.xlu1 %898 }
 0x2e5   : > { %v2557_v26 = vpop.eup %2556  ;;  %5208 = vst [vmem:[#allocation86_spill] sm:$0xff] %v3845_v37  ;;  %v1239_v5 = vmul.f32 0.6931472, %v2555_v45  ;;  %v327_v45 = vld [vmem:[%s3598_s10 + $0x1b8] sm:$0xff] }
 0x2e6   : > { %v2559_v39 = vpop.eup %2558  ;;  %v1367_v33 = vmul.f32 0.6931472, %v2557_v26 }
 0x2e7   : > { %v2561_v27 = vpop.eup %2560  ;;  %v1241_v43 = vmul.f32 0.6931472, %v2559_v39 }
 0x2e8   : > { %940 = vperm.xlu0 %2435, %v323_v30   ;;  %v1363_v30 = vmul.f32 0.6931472, %v2553_v51  ;;  %v2563_v25 = vpop.eup %2562  ;;  %v1369_v41 = vmul.f32 0.6931472, %v2561_v27  ;;  %v1492_v31 = vsub.f32 %v1239_v5, %v1367_v33  ;;  %v329_v33 = vld [vmem:[%s3598_s10 + $0x1c8] sm:$0xff] }
 0x2e9   : > { %v2565_v44 = vpop.eup %2564 }
 0x2ea   : > { %v1490_v12 = vsub.f32 %v1235_v53, %v1363_v30  ;;  %v2567_v55 = vpop.eup %2566  ;;  %v3852_v53 = vpop.permute.xlu1 %904  ;;  %v1371_v37 = vmul.f32 0.6931472, %v2565_v44  ;;  %v1493_v26 = vsub.f32 %v1241_v43, %v1369_v41  ;;  %v330_v43 = vld [vmem:[%s3598_s10 + $0x1d0] sm:$0xff] }
 0x2eb   : > { %5209 = vst [vmem:[#allocation87_spill] sm:$0xff] %v3852_v53  ;;  %v2569_v30 = vpop.eup %2568  ;;  %v1245_v20 = vmul.f32 0.6931472, %v2567_v55 }
 0x2ec   : > { %943 = vperm.xlu0 %2435, %v324_v46   ;;  %v1556_v46 = vmul.f32 %v3848_v42, %v1491_v35  ;;  %v1555_v51 = vmul.f32 %v3848_v42, %v1490_v12  ;;  %v1373_v39 = vmul.f32 0.6931472, %v2569_v30  ;;  %v1557_v12 = vmul.f32 %v3848_v42, %v1492_v31 }
 0x2ed   : > { %v1558_v5 = vmul.f32 %v3848_v42, %v1493_v26 }
 0x2ee   : > { %v1621_v10 = vmul.f32 1.442695, %v1556_v46  ;;  %v1619_v27 = vmul.f32 1.442695, %v1555_v51  ;;  %v1495_v38 = vsub.f32 %v1245_v20, %v1373_v39  ;;  %v1623_v16 = vmul.f32 1.442695, %v1557_v12 }
 0x2ef   : > { %v1625_v46 = vmul.f32 1.442695, %v1558_v5  ;;  %v5210_v51 = vlaneseq }
 0x2f0   : > { %946 = vperm.xlu0 %2435, %v325_v29   ;;  %v1243_v29 = vmul.f32 0.6931472, %v2563_v25  ;;  %v328_v25 = vld [vmem:[%s3598_s10 + $0x1c0] sm:$0xff]  ;;  %2576 = vpow2.f32 %v1621_v10  ;;  %v2571_v10 = vpop.eup %2570 }
 0x2f1   : > { %v2573_v41 = vpop.eup %2572  ;;  %v3868_v31 = vshrl.u32 %v5210_v51, 7  ;;  %v1375_v5 = vmul.f32 0.6931472, %v2571_v10  ;;  %v1053_v10 = vsel %vm989_vm11, %v3420_v1, 0.0 }
 0x2f2   : > { %v1494_v35 = vsub.f32 %v1243_v29, %v1371_v37  ;;  %v1560_v37 = vmul.f32 %v3848_v42, %v1495_v38  ;;  %v2575_v26 = vpop.eup %2574 }
 0x2f4   : > { %949 = vperm.xlu0 %2435, %v326_v14   ;;  %v3861_v14 = vpop.permute.xlu1 %907  ;;  %v1559_v44 = vmul.f32 %v3848_v42, %v1494_v35  ;;  %v1629_v29 = vmul.f32 1.442695, %v1560_v37  ;;  %v331_v35 = vld [vmem:[%s3598_s10 + $0x1d8] sm:$0xff] }
 0x2f6   : > { %v1627_v20 = vmul.f32 1.442695, %v1559_v44 }
 0x2f8   : > { %952 = vperm.xlu0 %2435, %v327_v45  }
 0x2fa   : > { %v2577_v39 = vpop.eup %2576 }
 0x2fb   : > { %v1119_v55 = vpop.xlane.xlu0 %1118 }
 0x2fc   : > { %2578 = vlog2.f32 %v1119_v55  ;;  %955 = vperm.xlu0 %2435, %v328_v25   ;;  %v3879_v55 = vstv %s2377_s19 }
 0x2fd   : > { %2580 = vpow2.f32 %v1619_v27  ;;  %v1879_v27 = vadd.s32 8, %v3868_v31  ;;  %v1943_v51 = vadd.s32 %v3879_v55, %v3868_v31 }
 0x2ff   : > { %v1121_v48 = vpop.xlane.xlu1 %1120  ;;  %v1944_v37 = vadd.s32 %v3879_v55, %v1879_v27  ;;  %vm2007_vm15 = vcmp.lt.s32.totalorder %v1943_v51, 1024 }
 0x300   : > { %2582 = vlog2.f32 %v1121_v48  ;;  %958 = vperm.xlu0 %2435, %v329_v33  }
 0x301   : > { %2584 = vpow2.f32 %v1623_v16  ;;  %v1880_v16 = vadd.s32 16, %v3868_v31  ;;  %vm2008_vm14 = vcmp.lt.s32.totalorder %v1944_v37, 1024 }
 0x302   : > { %2586 = vpow2.f32 %v1625_v46  ;;  %v1748_v46 = vsub.f32 1.0, %v2577_v39 }
 0x303   : > { %v1123_v45 = vpop.xlane.xlu1 %1122  ;;  %v818_v30 = vpop.permute.xlu0 %817 }
 0x304   : > { %2588 = vlog2.f32 %v1123_v45  ;;  %vm988_vm10 = vcmp.eq.s32.totalorder %v3729_v34, %v818_v30  ;;  %961 = vperm.xlu0 %2435, %v330_v43   ;;  %v1379_v43 = vmul.f32 0.6931472, %v2575_v26  ;;  %v3889_v30 = vstv %s3870_s17 }
 0x305   : > { %2590 = vpow2.f32 %v1627_v20  ;;  %v1052_v12 = vsel %vm988_vm10, %v3416_v63, 0.0  ;;  %v1377_v63 = vmul.f32 0.6931472, %v2573_v41  ;;  %v332_v20 = vld [vmem:[%s3598_s10 + $0x1e0] sm:$0xff]  ;;  %v1945_v41 = vadd.s32 %v3879_v55, %v1880_v16 }
 0x306   : > { %v2579_v25 = vpop.eup %2578  ;;  %1126 = vadd.xlane.f32.xlu1 %v1052_v12  ;;  %2592 = vpow2.f32 %v1629_v29  ;;  %v1813_v26 = vmul.f32 %v3889_v30, %v1748_v46  ;;  %v1881_v12 = vadd.s32 24, %v3868_v31 }
 0x307   : > { %v2581_v38 = vpop.eup %2580  ;;  %v1247_v44 = vmul.f32 0.6931472, %v2579_v25  ;;  %v824_v33 = vpop.permute.xlu0 %823  ;;  %vm2009_vm1 = vcmp.lt.s32.totalorder %v1945_v41, 1024 }
 0x308   : > { %964 = vperm.xlu0 %2435, %v331_v35   ;;  %v1747_v45 = vsub.f32 1.0, %v2581_v38  ;;  %vm990_vm12 = vcmp.eq.s32.totalorder %v3729_v34, %v824_v33  ;;  %v1882_v35 = vadd.s32 32, %v3868_v31  ;;  %v1946_v33 = vadd.s32 %v3879_v55, %v1881_v12 }
 0x309   : > { %v1496_v48 = vsub.f32 %v1247_v44, %v1375_v5  ;;  %v1054_v16 = vsel %vm990_vm12, %v3424_v56, 0.0  ;;  %v333_v44 = vld [vmem:[%s3598_s10 + $0x1e8] sm:$0xff]  ;;  %v2072_v56 = vsel %vm2008_vm14, %v1813_v26, 0.0  ;;  %vm997_vm14 = vcmp.eq.s32.totalorder %v3729_v34, %v3803_v28 }
 0x30a   : > { %v2583_v62 = vpop.eup %2582  ;;  %1128 = vadd.xlane.f32.xlu1 %v1053_v10  ;;  %v1812_v10 = vmul.f32 %v3889_v30, %v1747_v45  ;;  %v1947_v45 = vadd.s32 %v3879_v55, %v1882_v35  ;;  %v2137_v35 = vsel %vm2135_vm13, %v2072_v56, 0.0  ;;  %vm2010_vm3 = vcmp.lt.s32.totalorder %v1946_v33, 1024 }
 0x30b   : > { %v2585_v29 = vpop.eup %2584  ;;  %v1561_v39 = vmul.f32 %v3848_v42, %v1496_v48  ;;  %v1249_v27 = vmul.f32 0.6931472, %v2583_v62  ;;  %v830_v1 = vpop.permute.xlu0 %829 }
 0x30c   : > { %967 = vperm.xlu0 %2435, %v332_v20   ;;  %v2587_v25 = vpop.eup %2586  ;;  %v1749_v62 = vsub.f32 1.0, %v2585_v29  ;;  %v2071_v37 = vsel %vm2007_vm15, %v1812_v10, 0.0  ;;  %vm992_vm2 = vcmp.eq.s32.totalorder %v3729_v34, %v830_v1  ;;  %vm2011_vm5 = vcmp.lt.s32.totalorder %v1947_v45, 1024 }
 0x30d   : > { %v1631_v5 = vmul.f32 1.442695, %v1561_v39  ;;  %v1497_v38 = vsub.f32 %v1249_v27, %v1377_v63  ;;  %v1750_v27 = vsub.f32 1.0, %v2587_v25  ;;  %v1884_v25 = vadd.s32 48, %v3868_v31 }
 0x30e   : > { %v2589_v48 = vpop.eup %2588  ;;  %1130 = vadd.xlane.f32.xlu1 %v1054_v16  ;;  %v1883_v16 = vadd.s32 40, %v3868_v31  ;;  %v1814_v26 = vmul.f32 %v3889_v30, %v1749_v62  ;;  %v2136_v51 = vsel %vm2135_vm13, %v2071_v37, 0.0  ;;  %v1056_v10 = vsel %vm992_vm2, %v3432_v50, 0.0  ;;  %v335_v62 = vld [vmem:[%s3598_s10 + $0x1f8] sm:$0xff] }
 0x30f   : > { %v2591_v46 = vpop.eup %2590  ;;  %2594 = vpow2.f32 %v1631_v5  ;;  %v1562_v63 = vmul.f32 %v3848_v42, %v1497_v38  ;;  %v1251_v20 = vmul.f32 0.6931472, %v2589_v48  ;;  %v3904_v39 = vpop.permute.xlu0 %835  ;;  %v1055_v5 = vsel %vm991_vm0, %v3428_v52, 0.0  ;;  %v334_v38 = vld [vmem:[%s3598_s10 + $0x1f0] sm:$0xff] }
 0x310   : > { %970 = vperm.xlu0 %2435, %v333_v44   ;;  %v2593_v29 = vpop.eup %2592  ;;  %v1751_v12 = vsub.f32 1.0, %v2591_v46  ;;  %v1815_v52 = vmul.f32 %v3889_v30, %v1750_v27  ;;  %v1948_v48 = vadd.s32 %v3879_v55, %v1883_v16  ;;  %v2073_v46 = vsel %vm2009_vm1, %v1814_v26, 0.0 }
 0x311   : > { %v1633_v53 = vmul.f32 1.442695, %v1562_v63  ;;  %v1498_v8 = vsub.f32 %v1251_v20, %v1379_v43  ;;  %v1752_v32 = vsub.f32 1.0, %v2593_v29  ;;  %v1949_v63 = vadd.s32 %v3879_v55, %v1884_v25 }
 0x312   : > { %1132 = vadd.xlane.f32.xlu1 %v1055_v5  ;;  %v1885_v20 = vadd.s32 56, %v3868_v31  ;;  %v2074_v27 = vsel %vm2010_vm3, %v1815_v52, 0.0  ;;  %v2139_v29 = vsel %vm2135_vm13, %v2073_v46, 0.0  ;;  %vm2012_vm6 = vcmp.lt.s32.totalorder %v1948_v48, 1024 }
 0x313   : > { %2596 = vpow2.f32 %v1633_v53  ;;  %v1563_v43 = vmul.f32 %v3848_v42, %v1498_v8  ;;  %v3921_v44 = vpop.permute.xlu0 %841  ;;  %v2138_v53 = vadd.f32 %v2137_v35, %v2136_v51  ;;  %v1816_v8 = vmul.f32 %v3889_v30, %v1751_v12 }
 0x314   : > { %973 = vperm.xlu0 %2435, %v334_v38   ;;  %v1817_v50 = vmul.f32 %v3889_v30, %v1752_v32  ;;  %v1057_v16 = vsel %vm993_vm4, %v3436_v6, 0.0  ;;  %vm994_vm7 = vcmp.eq.s32.totalorder %v3729_v34, %v3904_v39  ;;  %v2141_v38 = vsel %vm2135_vm13, %v2074_v27, 0.0 }
 0x315   : > { %v1635_v1 = vmul.f32 1.442695, %v1563_v43  ;;  %v2140_v47 = vadd.f32 %v2139_v29, %v2138_v53  ;;  %v2075_v5 = vsel %vm2011_vm5, %v1816_v8, 0.0  ;;  %vm2013_vm8 = vcmp.lt.s32.totalorder %v1949_v63, 1024 }
 0x316   : > { %1134 = vadd.xlane.f32.xlu1 %v1056_v10  ;;  %v1950_v33 = vadd.s32 %v3879_v55, %v1885_v20  ;;  %v1886_v37 = vadd.s32 64, %v3868_v31  ;;  %v2076_v12 = vsel %vm2012_vm6, %v1817_v50, 0.0  ;;  %v2143_v6 = vsel %vm2135_vm13, %v2075_v5, 0.0 }
 0x317   : > { %2598 = vpow2.f32 %v1635_v1  ;;  %v848_v56 = vpop.permute.xlu0 %847  ;;  %v1058_v43 = vsel %vm994_vm7, %v3440_v61, 0.0  ;;  %v2142_v52 = vadd.f32 %v2141_v38, %v2140_v47  ;;  %v2145_v51 = vsel %vm2135_vm13, %v2076_v12, 0.0  ;;  %v5211_v12 = vld [vmem:[#allocation14_spill] sm:$0xff] }
 0x318   : > { %976 = vperm.xlu0 %2435, %v335_v62   ;;  %vm2014_vm10 = vcmp.lt.s32.totalorder %v1950_v33, 1024  ;;  %v1951_v48 = vadd.s32 %v3879_v55, %v1886_v37  ;;  %v1059_v61 = vsel %vm995_vm9, %v3444_v9, 0.0  ;;  %vm996_vm11 = vcmp.eq.s32.totalorder %v3729_v34, %v3921_v44 }
 0x319   : > { %v2595_v41 = vpop.eup %2594  ;;  %v2144_v10 = vadd.f32 %v2143_v6, %v2142_v52  ;;  %v1060_v29 = vsel %vm996_vm11, %v3448_v54, 0.0  ;;  %vm998_vm15 = vcmp.eq.s32.totalorder %v3729_v34, %v848_v56  ;;  %vm999_vm0 = vcmp.eq.s32.totalorder %v3729_v34, %v3807_v24  ;;  %v5215_v52 = vld [vmem:[#allocation12_spill] sm:$0xff] }
 0x31a   : > { %v1753_v45 = vsub.f32 1.0, %v2595_v41  ;;  %1136 = vadd.xlane.f32.xlu1 %v1057_v16  ;;  %vm2015_vm12 = vcmp.lt.s32.totalorder %v1951_v48, 1024  ;;  %v1062_v33 = vsel %vm998_vm15, %v3456_v57, 0.0  ;;  %v1063_v28 = vsel %vm999_vm0, %v3460_v13, 0.0 }
 0x31b   : > { %v854_v26 = vpop.permute.xlu0 %853  ;;  %v2146_v8 = vadd.f32 %v2145_v51, %v2144_v10  ;;  %vm1009_vm2 = vcmp.eq.s32.totalorder %v3729_v34, %v3824_v4  ;;  %vm1001_vm3 = vcmp.eq.s32.totalorder %v3729_v34, %v3810_v2  ;;  %vm1018_vm4 = vcmp.eq.s32.totalorder %v3729_v34, %v3861_v14 }
 0x31c   : > { %v1818_v35 = vmul.f32 %v3889_v30, %v1753_v45  ;;  %v1061_v45 = vsel %vm997_vm14, %v3452_v11, 0.0  ;;  %vm1000_vm1 = vcmp.eq.s32.totalorder %v3729_v34, %v854_v26  ;;  %v1073_v57 = vsel %vm1009_vm2, %v3500_v23, 0.0 }
 0x31d   : > { %v2597_v25 = vpop.eup %2596  ;;  %v1064_v56 = vsel %vm1000_vm1, %v3464_v7, 0.0  ;;  %v1065_v24 = vsel %vm1001_vm3, %v3468_v15, 0.0  ;;  %v1082_v4 = vsel %vm1018_vm4, %v3536_v18, 0.0  ;;  %vm1003_vm6 = vcmp.eq.s32.totalorder %v3729_v34, %v3814_v49 }
 0x31e   : > { %v2077_v39 = vsel %vm2013_vm8, %v1818_v35, 0.0  ;;  %v1754_v32 = vsub.f32 1.0, %v2597_v25  ;;  %1138 = vadd.xlane.f32.xlu1 %v1058_v43  ;;  %v1067_v14 = vsel %vm1003_vm6, %v3476_v17, 0.0  ;;  %vm1005_vm9 = vcmp.eq.s32.totalorder %v3729_v34, %v3817_v60  ;;  %v5214_v43 = vld [vmem:[#allocation84_spill] sm:$0xff] }
 0x31f   : > { %v860_v1 = vpop.permute.xlu0 %859  ;;  %v2147_v53 = vsel %vm2135_vm13, %v2077_v39, 0.0  ;;  %v1069_v49 = vsel %vm1005_vm9, %v3484_v19, 0.0  ;;  %vm1011_vm1 = vcmp.eq.s32.totalorder %v3729_v34, %v5214_v43  ;;  %v5233_v43 = vld [vmem:[#allocation21_spill] sm:$0xff] }
 0x320   : > { %v1819_v62 = vmul.f32 %v3889_v30, %v1754_v32  ;;  %v2148_v50 = vadd.f32 %v2147_v53, %v2146_v8  ;;  %vm1002_vm5 = vcmp.eq.s32.totalorder %v3729_v34, %v860_v1  ;;  %v5216_v32 = vld [vmem:[#allocation16_spill] sm:$0xff]  ;;  %v5217_v1 = vld [vmem:[#allocation17_spill] sm:$0xff] }
 0x321   : > { %v2599_v46 = vpop.eup %2598  ;;  %v1066_v2 = vsel %vm1002_vm5, %v3472_v0, 0.0  ;;  %v1075_v51 = vsel %vm1011_vm1, %v5216_v32, 0.0 }
 0x322   : > { %v2078_v63 = vsel %vm2014_vm10, %v1819_v62, 0.0  ;;  %v1755_v59 = vsub.f32 1.0, %v2599_v46  ;;  %1140 = vadd.xlane.f32.xlu1 %v1059_v61  ;;  %v5218_v46 = vld [vmem:[#allocation18_spill] sm:$0xff]  ;;  %v5219_v61 = vld [vmem:[#allocation24_spill] sm:$0xff] }
 0x323   : > { %v2149_v20 = vsel %vm2135_vm13, %v2078_v63, 0.0  ;;  %v866_v27 = vpop.permute.xlu0 %865  ;;  %v2948_v63 = vld [vmem:[%s3138_s7 + $0x1b8] sm:$0xff] }
 0x324   : > { %v1820_v41 = vmul.f32 %v3889_v30, %v1755_v59  ;;  %v2150_v9 = vadd.f32 %v2149_v20, %v2148_v50  ;;  %vm1004_vm7 = vcmp.eq.s32.totalorder %v3729_v34, %v866_v27  ;;  %v5220_v59 = vld [vmem:[#allocation29_spill] sm:$0xff] }
 0x325   : > { %v1068_v18 = vsel %vm1004_vm7, %v3480_v3, 0.0  ;;  %v519_v20 = vsub.f32 %v2948_v63, %v5220_v59  ;;  %v5221_v27 = vld [vmem:[#allocation85_spill] sm:$0xff] }
 0x326   : > { %v2079_v16 = vsel %vm2015_vm12, %v1820_v41, 0.0  ;;  %1142 = vadd.xlane.f32.xlu1 %v1060_v29  ;;  %vm1007_vm12 = vcmp.eq.s32.totalorder %v3729_v34, %v3821_v22  ;;  %v5213_v22 = vld [vmem:[#allocation15_spill] sm:$0xff]  ;;  %vm1014_vm6 = vcmp.eq.s32.totalorder %v3729_v34, %v5221_v27 }
 0x327   : > { %v2151_v47 = vsel %vm2135_vm13, %v2079_v16, 0.0  ;;  %v872_v5 = vpop.permute.xlu0 %871  ;;  %v1071_v60 = vsel %vm1007_vm12, %v3492_v21, 0.0  ;;  %v5222_v41 = vld [vmem:[#allocation19_spill] sm:$0xff] }
 0x328   : > { %v3961_v44 = vadd.f32 %v2151_v47, %v2150_v9  ;;  %vm1006_vm10 = vcmp.eq.s32.totalorder %v3729_v34, %v872_v5  ;;  %v1078_v29 = vsel %vm1014_vm6, %v5222_v41, 0.0  ;;  %v638_v9 = vmul.f32 1.442695, %v519_v20  ;;  %v2949_v16 = vld [vmem:[%s3138_s7 + $0x1c0] sm:$0xff]  ;;  %v5223_v47 = vld [vmem:[#allocation30_spill] sm:$0xff] }
 0x329   : > { %v1070_v26 = vsel %vm1006_vm10, %v3488_v58, 0.0  ;;  %v5212_v58 = vld [vmem:[#allocation10_spill] sm:$0xff]  ;;  %v520_v5 = vsub.f32 %v2949_v16, %v5223_v47  ;;  %v5238_v41 = vld [vmem:[#allocation23_spill] sm:$0xff]  ;;  %v1125_v16 = vpop.xlane.xlu1 %1124 }
 0x32a   : > { %1144 = vadd.xlane.f32.xlu1 %v1061_v45  ;;  %v5224_v45 = vld [vmem:[#allocation86_spill] sm:$0xff]  ;;  %2600 = vpow2.f32 %v638_v9 }
 0x32b   : > { %v878_v38 = vpop.permute.xlu0 %877  ;;  %vm1015_vm7 = vcmp.eq.s32.totalorder %v3729_v34, %v5224_v45  ;;  %v5240_v45 = vld [vmem:[#allocation39_spill] sm:$0xff] }
 0x32c   : > { %vm1008_vm14 = vcmp.eq.s32.totalorder %v3729_v34, %v878_v38 }
 0x32d   : > { %v1072_v35 = vsel %vm1008_vm14, %v5211_v12, 0.0  ;;  %v5231_v12 = vld [vmem:[#allocation35_spill] sm:$0xff] }
 0x32e   : > { %1146 = vadd.xlane.f32.xlu1 %v1062_v33  ;;  %v2950_v33 = vld [vmem:[%s3138_s7 + $0x1c8] sm:$0xff] }
 0x32f   : > { %v884_v54 = vpop.permute.xlu0 %883 }
 0x330   : > { %vm1010_vm0 = vcmp.eq.s32.totalorder %v3729_v34, %v884_v54  ;;  %v5225_v54 = vld [vmem:[#allocation31_spill] sm:$0xff] }
 0x331   : > { %v1074_v6 = vsel %vm1010_vm0, %v5213_v22, 0.0  ;;  %v5232_v22 = vld [vmem:[#allocation36_spill] sm:$0xff] }
 0x332   : > { %1148 = vadd.xlane.f32.xlu1 %v1063_v28  ;;  %v521_v28 = vsub.f32 %v2950_v33, %v5225_v54 }
 0x333   : > { %v3972_v11 = vpop.permute.xlu0 %889 }
 0x334   : > { %vm1012_vm3 = vcmp.eq.s32.totalorder %v3729_v34, %v3972_v11  ;;  %v2951_v11 = vld [vmem:[%s3138_s7 + $0x1d0] sm:$0xff]  ;;  %v4071_v27 = vpop.eup %2600 }
 0x335   : > { %v1076_v10 = vsel %vm1012_vm3, %v5217_v1, 0.0 }
 0x336   : > { %1150 = vadd.xlane.f32.xlu1 %v1064_v56  ;;  %v5226_v56 = vld [vmem:[#allocation32_spill] sm:$0xff] }
 0x337   : > { %1168 = vadd.xlane.f32.xlu0 %v1073_v57  ;;  %v893_v13 = vpop.permute.xlu0 %892  ;;  %v522_v57 = vsub.f32 %v2951_v11, %v5226_v56  ;;  %v5242_v11 = vld [vmem:[#allocation40_spill] sm:$0xff]  ;;  %v5243_v56 = vld [vmem:[#allocation41_spill] sm:$0xff] }
 0x338   : > { %vm1013_vm4 = vcmp.eq.s32.totalorder %v3729_v34, %v893_v13  ;;  %v5227_v13 = vld [vmem:[#allocation26_spill] sm:$0xff] }
 0x339   : > { %v1077_v53 = vsel %vm1013_vm4, %v5218_v46, 0.0 }
 0x33a   : > { %1152 = vadd.xlane.f32.xlu1 %v1065_v24 }
 0x33b   : > { %1186 = vadd.xlane.f32.xlu0 %v1082_v4  ;;  %v3983_v7 = vpop.permute.xlu0 %901  ;;  %v5228_v4 = vld [vmem:[#allocation20_spill] sm:$0xff] }
 0x33c   : > { %vm1016_vm9 = vcmp.eq.s32.totalorder %v3729_v34, %v3983_v7  ;;  %v2956_v7 = vld [vmem:[%s3138_s7 + $0x1f8] sm:$0xff] }
 0x33e   : > { %1154 = vadd.xlane.f32.xlu1 %v1066_v2  ;;  %v1079_v2 = vsel %vm1015_vm7, %v5228_v4, 0.0 }
 0x33f   : > { %v3988_v23 = vpop.permute.xlu0 %910 }
 0x340   : > { %vm1019_vm12 = vcmp.eq.s32.totalorder %v3729_v34, %v3988_v23  ;;  %v5239_v23 = vld [vmem:[#allocation38_spill] sm:$0xff] }
 0x342   : > { %1156 = vadd.xlane.f32.xlu1 %v1067_v14  ;;  %v640_v14 = vmul.f32 1.442695, %v520_v5 }
 0x343   : > { %v914_v15 = vpop.permute.xlu0 %913 }
 0x344   : > { %vm1020_vm8 = vcmp.eq.s32.totalorder %v3729_v34, %v914_v15  ;;  %v2952_v15 = vld [vmem:[%s3138_s7 + $0x1d8] sm:$0xff]  ;;  %2602 = vpow2.f32 %v640_v14  ;;  %v5246_v14 = vld [vmem:[#allocation9_spill] sm:$0xff] }
 0x345   : > { %v1084_v37 = vsel %vm1020_vm8, %v3544_v40, 0.0 }
 0x346   : > { %1158 = vadd.xlane.f32.xlu1 %v1068_v18  ;;  %1190 = vadd.xlane.f32.xlu0 %v1084_v37  ;;  %v5229_v18 = vld [vmem:[#allocation33_spill] sm:$0xff] }
 0x347   : > { %v3997_v0 = vpop.permute.xlu0 %916  ;;  %v523_v37 = vsub.f32 %v2952_v15, %v5229_v18 }
 0x34a   : > { %1160 = vadd.xlane.f32.xlu1 %v1069_v49  ;;  %v2953_v49 = vld [vmem:[%s3138_s7 + $0x1e0] sm:$0xff] }
 0x34b   : > { %v920_v17 = vpop.permute.xlu0 %919 }
 0x34c   : > { %vm1022_vm11 = vcmp.eq.s32.totalorder %v3729_v34, %v920_v17  ;;  %v5230_v17 = vld [vmem:[#allocation34_spill] sm:$0xff] }
 0x34d   : > { %v1086_v3 = vsel %vm1022_vm11, %v3552_v36, 0.0 }
 0x34e   : > { %1162 = vadd.xlane.f32.xlu1 %v1070_v26  ;;  %1194 = vadd.xlane.f32.xlu0 %v1086_v3  ;;  %v524_v26 = vsub.f32 %v2953_v49, %v5230_v17  ;;  %v4079_v5 = vpop.eup %2602  ;;  %v5248_v17 = vld [vmem:[#allocation45_spill] sm:$0xff] }
 0x34f   : > { %v4006_v40 = vpop.permute.xlu0 %922 }
 0x350   : > { %v648_v1 = vmul.f32 1.442695, %v524_v26  ;;  %vm1023_vm1 = vcmp.eq.s32.totalorder %v3729_v34, %v4006_v40 }
 0x351   : > { %v1087_v15 = vsel %vm1023_vm1, %v5246_v14, 0.0  ;;  %v5266_v14 = vld [vmem:[#allocation27_spill] sm:$0xff] }
 0x352   : > { %1164 = vadd.xlane.f32.xlu1 %v1071_v60  ;;  %v642_v60 = vmul.f32 1.442695, %v521_v28 }
 0x353   : > { %v926_v19 = vpop.permute.xlu0 %925 }
 0x354   : > { %vm1024_vm15 = vcmp.eq.s32.totalorder %v3729_v34, %v926_v19  ;;  %v2954_v19 = vld [vmem:[%s3138_s7 + $0x1e8] sm:$0xff]  ;;  %2604 = vpow2.f32 %v642_v60 }
 0x355   : > { %v1088_v25 = vsel %vm1024_vm15, %v5212_v58, 0.0  ;;  %v644_v58 = vmul.f32 1.442695, %v522_v57  ;;  %vm1021_vm15 = vcmp.eq.s32.totalorder %v3729_v34, %v3997_v0 }
 0x356   : > { %1166 = vadd.xlane.f32.xlu1 %v1072_v35  ;;  %1198 = vadd.xlane.f32.xlu0 %v1088_v25  ;;  %v525_v35 = vsub.f32 %v2954_v19, %v5231_v12  ;;  %v2955_v25 = vld [vmem:[%s3138_s7 + $0x1f0] sm:$0xff]  ;;  %s2978_s7 = scalar_lea.vmem %s2977_s6, 32 }
 0x357   : > { %v4014_v36 = vpop.permute.xlu0 %928  ;;  %2606 = vpow2.f32 %v644_v58  ;;  %v5249_v19 = vld [vmem:[#allocation46_spill] sm:$0xff]  ;;  %v5251_v58 = vld [vmem:[#allocation11_spill] sm:$0xff]  ;;  %p2980_p0 = scmp.lt.s32.totalorder %s2978_s7, %s2972_s5 }
 0x358   : > { %vm1025_vm3 = vcmp.eq.s32.totalorder %v3729_v34, %v4014_v36 }
 0x359   : > { %p2981_p1 = por %p2980_p0, %p2979_p13 }
 0x35a   : > { %1170 = vadd.xlane.f32.xlu1 %v1074_v6  ;;  %v526_v6 = vsub.f32 %v2955_v25, %v5232_v22  ;;  %v1089_v25 = vsel %vm1025_vm3, %v5251_v58, 0.0 }
 0x35b   : > { %v932_v21 = vpop.permute.xlu0 %931  ;;  %p2982_p2 = pnand %p2981_p1, %p2975_p12 }
 0x35c   : > { %vm1026_vm2 = vcmp.eq.s32.totalorder %v3729_v34, %v932_v21  ;;  %v1080_v21 = vsel %vm1016_vm9, %v5233_v43, 0.0  ;;  %v652_v46 = vmul.f32 1.442695, %v526_v6  ;;  %v5252_v6 = vld [vmem:[#allocation48_spill] sm:$0xff] }
 0x35d   : > { %v1090_v39 = vsel %vm1026_vm2, %v5215_v52, 0.0  ;;  %v646_v52 = vmul.f32 1.442695, %v523_v37  ;;  %v5247_v37 = vld [vmem:[#allocation44_spill] sm:$0xff] }
 0x35e   : > { %1172 = vadd.xlane.f32.xlu1 %v1075_v51  ;;  %1202 = vadd.xlane.f32.xlu0 %v1090_v39  ;;  %v5234_v39 = vld [vmem:[#allocation37_spill] sm:$0xff]  ;;  %v5235_v51 = vld [vmem:[#allocation87_spill] sm:$0xff]  ;;  %v4085_v28 = vpop.eup %2604 }
 0x35f   : > { %v4024_v48 = vpop.permute.xlu0 %934  ;;  %v527_v32 = vsub.f32 %v2956_v7, %v5234_v39  ;;  %vm1017_vm10 = vcmp.eq.s32.totalorder %v3729_v34, %v5235_v51  ;;  %2608 = vpow2.f32 %v646_v52  ;;  %v5254_v39 = vld [vmem:[#allocation50_spill] sm:$0xff]  ;;  %v5255_v51 = vld [vmem:[#allocation51_spill] sm:$0xff] }
 0x360   : > { %2610 = vpow2.f32 %v648_v1  ;;  %v5256_v1 = vld [vmem:[#allocation13_spill] sm:$0xff] }
 0x361   : > { %v654_v59 = vmul.f32 1.442695, %v527_v32  ;;  %v4090_v0 = vpop.eup %2606 }
 0x362   : > { %1174 = vadd.xlane.f32.xlu1 %v1076_v10 }
 0x363   : > { %v938_v62 = vpop.permute.xlu0 %937 }
 0x364   : > { %vm1028_vm5 = vcmp.eq.s32.totalorder %v3729_v34, %v938_v62  ;;  %v650_v62 = vmul.f32 1.442695, %v525_v35  ;;  %v5250_v35 = vld [vmem:[#allocation47_spill] sm:$0xff] }
 0x365   : > { %v1092_v8 = vsel %vm1028_vm5, %v5219_v61, 0.0  ;;  %vm1027_vm5 = vcmp.eq.s32.totalorder %v3729_v34, %v4024_v48 }
 0x366   : > { %1176 = vadd.xlane.f32.xlu1 %v1077_v53  ;;  %1206 = vadd.xlane.f32.xlu0 %v1092_v8  ;;  %v5236_v53 = vld [vmem:[#allocation28_spill] sm:$0xff]  ;;  %v5237_v8 = vld [vmem:[#allocation22_spill] sm:$0xff]  ;;  %2612 = vpow2.f32 %v650_v62 }
 0x367   : > { %v4035_v50 = vpop.permute.xlu0 %940  ;;  %v1081_v63 = vsel %vm1017_vm10, %v5237_v8, 0.0  ;;  %2614 = vpow2.f32 %v652_v46  ;;  %v5257_v46 = vld [vmem:[#allocation52_spill] sm:$0xff]  ;;  %v5258_v8 = vld [vmem:[#allocation53_spill] sm:$0xff] }
 0x368   : > { %2616 = vpow2.f32 %v654_v59  ;;  %vm1029_vm7 = vcmp.eq.s32.totalorder %v3729_v34, %v4035_v50 }
 0x369   : > { %2618 = vlog2.f32 %v5239_v23 }
 0x36a   : > { %1178 = vadd.xlane.f32.xlu1 %v1078_v29  ;;  %v1083_v29 = vsel %vm1019_vm12, %v5238_v41, 0.0  ;;  %2620 = vlog2.f32 %v5240_v45  ;;  %v5259_v41 = vld [vmem:[#allocation54_spill] sm:$0xff]  ;;  %v5262_v45 = vld [vmem:[#allocation56_spill] sm:$0xff] }
 0x36b   : > { %v944_v38 = vpop.permute.xlu0 %943  ;;  %2622 = vlog2.f32 %v1125_v16  ;;  %v5261_v16 = vld [vmem:[#allocation25_spill] sm:$0xff] }
 0x36c   : > { %vm1030_vm8 = vcmp.eq.s32.totalorder %v3729_v34, %v944_v38  ;;  %v5241_v38 = vld [vmem:[#allocation8_spill] sm:$0xff]  ;;  %2624 = vlog2.f32 %v5242_v11  ;;  %v1093_v50 = vsel %vm1029_vm7, %v5261_v16, 0.0  ;;  %v5274_v16 = vld [vmem:[#allocation67_spill] sm:$0xff] }
 0x36d   : > { %v1094_v24 = vsel %vm1030_vm8, %v5227_v13, 0.0  ;;  %v1085_v33 = vsel %vm1021_vm15, %v5241_v38, 0.0  ;;  %2626 = vlog2.f32 %v5243_v56  ;;  %v4093_v13 = vpop.eup %2608 }
 0x36e   : > { %1180 = vadd.xlane.f32.xlu1 %v1079_v2  ;;  %1210 = vadd.xlane.f32.xlu0 %v1094_v24  ;;  %v5244_v24 = vld [vmem:[#allocation42_spill] sm:$0xff]  ;;  %v4097_v4 = vpop.eup %2610  ;;  %v5245_v2 = vld [vmem:[#allocation43_spill] sm:$0xff] }
 0x36f   : > { %v4055_v3 = vpop.permute.xlu0 %946  ;;  %2628 = vlog2.f32 %v5244_v24 }
 0x370   : > { %2630 = vlog2.f32 %v5245_v2  ;;  %v4102_v18 = vpop.eup %2612  ;;  %vm1031_vm9 = vcmp.eq.s32.totalorder %v3729_v34, %v4055_v3  ;;  %v5265_v2 = vld [vmem:[#allocation59_spill] sm:$0xff] }
 0x371   : > { %2632 = vlog2.f32 %v5247_v37  ;;  %v4107_v49 = vpop.eup %2614  ;;  %v5267_v37 = vld [vmem:[#allocation60_spill] sm:$0xff] }
 0x372   : > { %1182 = vadd.xlane.f32.xlu1 %v1080_v21  ;;  %2634 = vlog2.f32 %v5248_v17  ;;  %v4110_v60 = vpop.eup %2616  ;;  %v5253_v21 = vld [vmem:[#allocation49_spill] sm:$0xff] }
 0x373   : > { %v950_v10 = vpop.permute.xlu0 %949  ;;  %2636 = vlog2.f32 %v5249_v19  ;;  %v2619_v12 = vpop.eup %2618  ;;  %v5268_v19 = vld [vmem:[#allocation61_spill] sm:$0xff] }
 0x374   : > { %vm1032_vm11 = vcmp.eq.s32.totalorder %v3729_v34, %v950_v10  ;;  %2638 = vlog2.f32 %v5250_v35  ;;  %v4117_v22 = vpop.eup %2620  ;;  %v1091_v10 = vsel %vm1027_vm5, %v5256_v1, 0.0 }
 0x375   : > { %v1096_v61 = vsel %vm1032_vm11, %v5236_v53, 0.0  ;;  %2640 = vlog2.f32 %v5252_v6  ;;  %v2623_v43 = vpop.eup %2622 }
 0x376   : > { %1184 = vadd.xlane.f32.xlu1 %v1081_v63  ;;  %1214 = vadd.xlane.f32.xlu0 %v1096_v61  ;;  %2642 = vlog2.f32 %v5253_v21  ;;  %v4123_v7 = vpop.eup %2624  ;;  %v1253_v53 = vmul.f32 0.6931472, %v2623_v43  ;;  %v5270_v21 = vld [vmem:[#allocation63_spill] sm:$0xff] }
 0x377   : > { %v953_v20 = vpop.permute.xlu0 %952  ;;  %2644 = vlog2.f32 %v5254_v39  ;;  %v4127_v32 = vpop.eup %2626 }
 0x378   : > { %vm1033_vm14 = vcmp.eq.s32.totalorder %v3729_v34, %v953_v20  ;;  %2646 = vlog2.f32 %v5255_v51  ;;  %v1381_v20 = vmul.f32 0.6931472, %v2619_v12  ;;  %v5271_v51 = vld [vmem:[#allocation64_spill] sm:$0xff] }
 0x379   : > { %v1097_v9 = vsel %vm1033_vm14, %v4071_v27, 0.0  ;;  %v4132_v62 = vpop.eup %2628  ;;  %2648 = vlog2.f32 %v5257_v46 }
 0x37a   : > { %1188 = vadd.xlane.f32.xlu1 %v1083_v29  ;;  %1216 = vadd.xlane.f32.xlu0 %v1097_v9  ;;  %v4137_v61 = vpop.eup %2630  ;;  %2650 = vlog2.f32 %v5258_v8  ;;  %v5260_v9 = vld [vmem:[#allocation55_spill] sm:$0xff]  ;;  %v1499_v38 = vsub.f32 %v1253_v53, %v1381_v20  ;;  %v5272_v53 = vld [vmem:[#allocation65_spill] sm:$0xff]  ;;  %v5273_v20 = vld [vmem:[#allocation66_spill] sm:$0xff] }
 0x37b   : > { %v956_v47 = vpop.permute.xlu0 %955  ;;  %v4140_v59 = vpop.eup %2632  ;;  %2652 = vlog2.f32 %v5259_v41 }
 0x37c   : > { %vm1034_vm0 = vcmp.eq.s32.totalorder %v3729_v34, %v956_v47  ;;  %v4144_v29 = vpop.eup %2634  ;;  %2654 = vlog2.f32 %v5260_v9  ;;  %v1564_v17 = vmul.f32 %v3848_v42, %v1499_v38  ;;  %v5276_v38 = vld [vmem:[#allocation69_spill] sm:$0xff] }
 0x37d   : > { %v1098_v54 = vsel %vm1034_vm0, %v4079_v5, 0.0  ;;  %v4149_v47 = vpop.eup %2636  ;;  %2656 = vlog2.f32 %v5262_v45 }
 0x37e   : > { %1192 = vadd.xlane.f32.xlu1 %v1085_v33  ;;  %1218 = vadd.xlane.f32.xlu0 %v1098_v54  ;;  %v4154_v33 = vpop.eup %2638  ;;  %v5263_v54 = vld [vmem:[#allocation57_spill] sm:$0xff] }
 0x37f   : > { %v959_v57 = vpop.permute.xlu0 %958  ;;  %2658 = vlog2.f32 %v5263_v54  ;;  %v4157_v56 = vpop.eup %2640 }
 0x380   : > { %vm1035_vm2 = vcmp.eq.s32.totalorder %v3729_v34, %v959_v57  ;;  %v5264_v57 = vld [vmem:[#allocation58_spill] sm:$0xff]  ;;  %v4161_v24 = vpop.eup %2642 }
 0x381   : > { %v1099_v40 = vsel %vm1035_vm2, %v4085_v28, 0.0  ;;  %2660 = vlog2.f32 %v5264_v57 }
 0x382   : > { %1196 = vadd.xlane.f32.xlu1 %v1087_v15  ;;  %1220 = vadd.xlane.f32.xlu0 %v1099_v40  ;;  %2662 = vlog2.f32 %v5265_v2  ;;  %v1095_v15 = vsel %vm1031_vm9, %v5266_v14, 0.0  ;;  %v4166_v40 = vpop.eup %2644  ;;  %v5277_v14 = vld [vmem:[#allocation70_spill] sm:$0xff] }
 0x383   : > { %v962_v26 = vpop.permute.xlu0 %961  ;;  %2664 = vlog2.f32 %v5267_v37  ;;  %v1385_v37 = vmul.f32 0.6931472, %v4123_v7  ;;  %v4228_v7 = vmul.f32 0.6931472, %v4140_v59  ;;  %v4242_v59 = vmul.f32 0.6931472, %v4149_v47 }
 0x384   : > { %vm1036_vm4 = vcmp.eq.s32.totalorder %v3729_v34, %v962_v26  ;;  %v4170_v26 = vpop.eup %2646  ;;  %2666 = vlog2.f32 %v5268_v19  ;;  %v4223_v19 = vmul.f32 0.6931472, %v4132_v62  ;;  %v4238_v62 = vmul.f32 0.6931472, %v4144_v29 }
 0x385   : > { %v1100_v36 = vsel %vm1036_vm4, %v4090_v0, 0.0  ;;  %v4173_v58 = vpop.eup %2648 }
 0x386   : > { %1200 = vadd.xlane.f32.xlu1 %v1089_v25  ;;  %1222 = vadd.xlane.f32.xlu0 %v1100_v36  ;;  %v4176_v25 = vpop.eup %2650  ;;  %v5269_v36 = vld [vmem:[#allocation62_spill] sm:$0xff] }
 0x387   : > { %v965_v52 = vpop.permute.xlu0 %964  ;;  %v4180_v43 = vpop.eup %2652 }
 0x388   : > { %vm1037_vm6 = vcmp.eq.s32.totalorder %v3729_v34, %v965_v52  ;;  %v1637_v52 = vmul.f32 1.442695, %v1564_v17  ;;  %v4184_v39 = vpop.eup %2654  ;;  %v5278_v17 = vld [vmem:[#allocation71_spill] sm:$0xff] }
 0x389   : > { %v1101_v48 = vsel %vm1037_vm6, %v4093_v13, 0.0 }
 0x38a   : > { %1204 = vadd.xlane.f32.xlu1 %v1091_v10  ;;  %1224 = vadd.xlane.f32.xlu0 %v1101_v48  ;;  %v4187_v48 = vpop.eup %2656 }
 0x38b   : > { %v968_v63 = vpop.permute.xlu0 %967  ;;  %v4190_v46 = vpop.eup %2658 }
 0x38c   : > { %vm1038_vm8 = vcmp.eq.s32.totalorder %v3729_v34, %v968_v63  ;;  %v4194_v63 = vpop.eup %2660 }
 0x38d   : > { %v1102_v23 = vsel %vm1038_vm8, %v4097_v4, 0.0 }
 0x38e   : > { %1208 = vadd.xlane.f32.xlu1 %v1093_v50  ;;  %1226 = vadd.xlane.f32.xlu0 %v1102_v23  ;;  %v5275_v23 = vld [vmem:[#allocation68_spill] sm:$0xff] }
 0x38f   : > { %v971_v11 = vpop.permute.xlu0 %970 }
 0x390   : > { %vm1039_vm10 = vcmp.eq.s32.totalorder %v3729_v34, %v971_v11 }
 0x391   : > { %v1103_v3 = vsel %vm1039_vm10, %v4102_v18, 0.0 }
 0x392   : > { %1212 = vadd.xlane.f32.xlu1 %v1095_v15  ;;  %1228 = vadd.xlane.f32.xlu0 %v1103_v3 }
 0x393   : > { %v1127_v12 = vpop.xlane.xlu1 %1126  ;;  %v974_v35 = vpop.permute.xlu0 %973 }
 0x394   : > { %2668 = vlog2.f32 %v1127_v12  ;;  %vm1040_vm11 = vcmp.eq.s32.totalorder %v3729_v34, %v974_v35  ;;  %v5279_v12 = vld [vmem:[#allocation72_spill] sm:$0xff] }
 0x395   : > { %2670 = vlog2.f32 %v5269_v36  ;;  %v1104_v6 = vsel %vm1040_vm11, %v4107_v49, 0.0 }
 0x396   : > { %2672 = vlog2.f32 %v5270_v21  ;;  %766 = vadd.xlane.f32.xlu1 %v4071_v27  ;;  %1230 = vadd.xlane.f32.xlu0 %v1104_v6  ;;  %v4197_v27 = vpop.eup %2662 }
 0x397   : > { %2674 = vlog2.f32 %v5271_v51  ;;  %v1129_v1 = vpop.xlane.xlu1 %1128  ;;  %v977_v10 = vpop.permute.xlu0 %976 }
 0x398   : > { %2676 = vlog2.f32 %v1129_v1  ;;  %vm1041_vm12 = vcmp.eq.s32.totalorder %v3729_v34, %v977_v10  ;;  %v4200_v9 = vpop.eup %2664  ;;  %v5281_v1 = vld [vmem:[#allocation74_spill] sm:$0xff] }
 0x399   : > { %2678 = vlog2.f32 %v5272_v53  ;;  %v1105_v8 = vsel %vm1041_vm12, %v4110_v60, 0.0  ;;  %v4202_v34 = vpop.eup %2666 }
 0x39a   : > { %2680 = vpow2.f32 %v1637_v52  ;;  %768 = vadd.xlane.f32.xlu1 %v4079_v5  ;;  %1232 = vadd.xlane.f32.xlu0 %v1105_v8  ;;  %v1383_v5 = vmul.f32 0.6931472, %v4117_v22  ;;  %v5280_v52 = vld [vmem:[#allocation73_spill] sm:$0xff] }
 0x39b   : > { %2682 = vlog2.f32 %v5273_v20  ;;  %v1131_v41 = vpop.xlane.xlu1 %1130  ;;  %v4248_v20 = vmul.f32 0.6931472, %v4154_v33  ;;  %v4263_v33 = vmul.f32 0.6931472, %v4161_v24  ;;  %v4277_v24 = vmul.f32 0.6931472, %v4176_v25 }
 0x39c   : > { %2684 = vlog2.f32 %v1131_v41  ;;  %v5282_v41 = vld [vmem:[#allocation75_spill] sm:$0xff]  ;;  %v4289_v25 = vmul.f32 0.6931472, %v4180_v43  ;;  %v4305_v43 = vmul.f32 0.6931472, %v4194_v63 }
 0x39d   : > { %2686 = vlog2.f32 %v5274_v16  ;;  %v4315_v63 = vmul.f32 0.6931472, %v4200_v9 }
 0x39e   : > { %v2669_v50 = vpop.eup %2668  ;;  %2688 = vlog2.f32 %v5275_v23  ;;  %770 = vadd.xlane.f32.xlu1 %v4085_v28  ;;  %v1387_v28 = vmul.f32 0.6931472, %v4127_v32  ;;  %v4231_v32 = vmul.f32 0.6931472, %v4137_v61  ;;  %v4245_v61 = vmul.f32 0.6931472, %v4157_v56 }
 0x39f   : > { %v4207_v45 = vpop.eup %2670  ;;  %2690 = vlog2.f32 %v5276_v38  ;;  %v1255_v54 = vmul.f32 0.6931472, %v2669_v50  ;;  %v1133_v11 = vpop.xlane.xlu1 %1132  ;;  %v4260_v56 = vmul.f32 0.6931472, %v4166_v40  ;;  %v5283_v38 = vld [vmem:[#allocation76_spill] sm:$0xff] }
 0x3a0   : > { %v4211_v57 = vpop.eup %2672  ;;  %2692 = vlog2.f32 %v1133_v11  ;;  %v4270_v11 = vmul.f32 0.6931472, %v4170_v26  ;;  %v4274_v40 = vmul.f32 0.6931472, %v4173_v58 }
 0x3a1   : > { %v4213_v2 = vpop.eup %2674  ;;  %2694 = vlog2.f32 %v5277_v14  ;;  %v1500_v15 = vsub.f32 %v1255_v54, %v1383_v5  ;;  %v5284_v14 = vld [vmem:[#allocation77_spill] sm:$0xff] }
 0x3a2   : > { %v2677_v3 = vpop.eup %2676  ;;  %2696 = vlog2.f32 %v5278_v17  ;;  %772 = vadd.xlane.f32.xlu1 %v4090_v0  ;;  %v1887_v0 = vadd.s32 72, %v3868_v31  ;;  %v5285_v17 = vld [vmem:[#allocation78_spill] sm:$0xff] }
 0x3a3   : > { %v4220_v22 = vpop.eup %2678  ;;  %2698 = vlog2.f32 %v5279_v12  ;;  %v1565_v35 = vmul.f32 %v3848_v42, %v1500_v15  ;;  %v1257_v36 = vmul.f32 0.6931472, %v2677_v3  ;;  %v1135_v6 = vpop.xlane.xlu1 %1134  ;;  %v1888_v12 = vadd.s32 80, %v3868_v31 }
 0x3a4   : > { %v2681_v21 = vpop.eup %2680  ;;  %2700 = vlog2.f32 %v5280_v52  ;;  %v4292_v52 = vmul.f32 0.6931472, %v4184_v39  ;;  %v4308_v39 = vmul.f32 0.6931472, %v4190_v46  ;;  %v4318_v46 = vmul.f32 0.6931472, %v4197_v27 }
 0x3a5   : > { %v4235_v51 = vpop.eup %2682  ;;  %2702 = vlog2.f32 %v5281_v1  ;;  %v1639_v10 = vmul.f32 1.442695, %v1565_v35  ;;  %v1501_v53 = vsub.f32 %v1257_v36, %v1385_v37  ;;  %v1756_v16 = vsub.f32 1.0, %v2681_v21 }
 0x3a6   : > { %v2685_v8 = vpop.eup %2684  ;;  %2704 = vlog2.f32 %v5282_v41  ;;  %774 = vadd.xlane.f32.xlu1 %v4093_v13  ;;  %v1952_v13 = vadd.s32 %v3879_v55, %v1887_v0  ;;  %v5286_v0 = vld [vmem:[#allocation79_spill] sm:$0xff]  ;;  %v4298_v1 = vmul.f32 0.6931472, %v4187_v48 }
 0x3a7   : > { %v4252_v29 = vpop.eup %2686  ;;  %2706 = vpow2.f32 %v1639_v10  ;;  %v1566_v50 = vmul.f32 %v3848_v42, %v1501_v53  ;;  %v1259_v23 = vmul.f32 0.6931472, %v2685_v8  ;;  %v4255_v5 = vpop.xlane.xlu1 %1136  ;;  %v1821_v26 = vmul.f32 %v3889_v30, %v1756_v16  ;;  %v5287_v10 = vld [vmem:[#allocation80_spill] sm:$0xff] }
 0x3a8   : > { %v4257_v47 = vpop.eup %2688  ;;  %2708 = vlog2.f32 %v5283_v38  ;;  %vm2016_vm14 = vcmp.lt.s32.totalorder %v1952_v13, 1024  ;;  %v1889_v16 = vadd.s32 88, %v3868_v31 }
 0x3a9   : > { %v4267_v54 = vpop.eup %2690  ;;  %2710 = vlog2.f32 %v5284_v14  ;;  %v1641_v15 = vmul.f32 1.442695, %v1566_v50  ;;  %v1502_v3 = vsub.f32 %v1259_v23, %v1387_v28  ;;  %v2080_v50 = vsel %vm2016_vm14, %v1821_v26, 0.0 }
 0x3aa   : > { %v2693_v37 = vpop.eup %2692  ;;  %2712 = vlog2.f32 %v5285_v17  ;;  %776 = vadd.xlane.f32.xlu1 %v4097_v4  ;;  %v1953_v23 = vadd.s32 %v3879_v55, %v1888_v12  ;;  %v4321_v14 = vmul.f32 0.6931472, %v4202_v34  ;;  %v5290_v12 = vld [vmem:[#allocation83_spill] sm:$0xff]  ;;  %v2153_v27 = vsel %vm2135_vm13, %v2080_v50, 0.0 }
 0x3ab   : > { %v4282_v35 = vpop.eup %2694  ;;  %2714 = vpow2.f32 %v1641_v15  ;;  %v1567_v28 = vmul.f32 %v3848_v42, %v1502_v3  ;;  %v1261_v36 = vmul.f32 0.6931472, %v2693_v37  ;;  %v1139_v21 = vpop.xlane.xlu1 %1138  ;;  %v4325_v15 = vmul.f32 0.6931472, %v4207_v45  ;;  %v5289_v37 = vld [vmem:[#allocation82_spill] sm:$0xff] }
 0x3ac   : > { %v4286_v58 = vpop.eup %2696  ;;  %2716 = vlog2.f32 %v5286_v0  ;;  %v4328_v3 = vmul.f32 0.6931472, %v4211_v57  ;;  %v1954_v34 = vadd.s32 %v3879_v55, %v1889_v16  ;;  %v4336_v45 = vmul.f32 0.6931472, %v4213_v2 }
 0x3ad   : > { %v4295_v4 = vpop.eup %2698  ;;  %2718 = vlog2.f32 %v5287_v10  ;;  %v1643_v53 = vmul.f32 1.442695, %v1567_v28  ;;  %v1503_v8 = vsub.f32 %v1261_v36, %v4223_v19  ;;  %vm2017_vm15 = vcmp.lt.s32.totalorder %v1953_v23, 1024 }
 0x3ae   : > { %v4302_v41 = vpop.eup %2700  ;;  %2720 = vlog2.f32 %v1135_v6  ;;  %778 = vadd.xlane.f32.xlu1 %v4102_v18  ;;  %v5288_v6 = vld [vmem:[#allocation81_spill] sm:$0xff]  ;;  %v1890_v57 = vadd.s32 96, %v3868_v31  ;;  %v4340_v10 = vmul.f32 0.6931472, %v4235_v51  ;;  %v4348_v2 = vmul.f32 0.6931472, %v4257_v47 }
 0x3af   : > { %v2703_v48 = vpop.eup %2702  ;;  %2722 = vpow2.f32 %v1643_v53  ;;  %v1568_v19 = vmul.f32 %v3848_v42, %v1503_v8  ;;  %v1141_v38 = vpop.xlane.xlu1 %1140  ;;  %v4343_v53 = vmul.f32 0.6931472, %v4220_v22  ;;  %v4351_v16 = vmul.f32 0.6931472, %v4252_v29 }
 0x3b0   : > { %v2705_v13 = vpop.eup %2704  ;;  %2724 = vlog2.f32 %v5288_v6  ;;  %5291 = vst [vmem:[#allocation14_spill] sm:$0xff] %v4340_v10  ;;  %5293 = vst [vmem:[#allocation15_spill] sm:$0xff] %v4348_v2  ;;  %v4354_v50 = vmul.f32 0.6931472, %v4267_v54  ;;  %v2154_v51 = vadd.f32 %v2153_v27, %v3961_v44  ;;  %vm2018_vm0 = vcmp.lt.s32.totalorder %v1954_v34, 1024 }
 0x3b1   : > { %v2707_v18 = vpop.eup %2706  ;;  %2726 = vlog2.f32 %v5289_v37  ;;  %v1645_v17 = vmul.f32 1.442695, %v1568_v19  ;;  %5292 = vst [vmem:[#allocation10_spill] sm:$0xff] %v4343_v53  ;;  %5294 = vst [vmem:[#allocation84_spill] sm:$0xff] %v4351_v16  ;;  %v1955_v47 = vadd.s32 %v3879_v55, %v1890_v57  ;;  %v1891_v29 = vadd.s32 104, %v3868_v31 }
 0x3b2   : > { %v2709_v9 = vpop.eup %2708  ;;  %2728 = vlog2.f32 %v5290_v12  ;;  %v1757_v26 = vsub.f32 1.0, %v2707_v18  ;;  %780 = vadd.xlane.f32.xlu1 %v4107_v49  ;;  %v4362_v37 = vmul.f32 0.6931472, %v4282_v35  ;;  %v4365_v44 = vmul.f32 0.6931472, %v4286_v58 }
 0x3b3   : > { %v2711_v28 = vpop.eup %2710  ;;  %2730 = vpow2.f32 %v1645_v17  ;;  %v1143_v36 = vpop.xlane.xlu1 %1142  ;;  %v4369_v12 = vmul.f32 0.6931472, %v4295_v4  ;;  %v4371_v27 = vmul.f32 0.6931472, %v2703_v48  ;;  %v4376_v57 = vmul.f32 0.6931472, %v2709_v9 }
 0x3b4   : > { %v2713_v0 = vpop.eup %2712  ;;  %v1822_v8 = vmul.f32 %v3889_v30, %v1757_v26  ;;  %2732 = vlog2.f32 %v4255_v5  ;;  %5295 = vst [vmem:[#allocation12_spill] sm:$0xff] %v4362_v37  ;;  %v4374_v26 = vmul.f32 0.6931472, %v4302_v41  ;;  %v4378_v35 = vmul.f32 0.6931472, %v2705_v13 }
 0x3b5   : > { %v2715_v49 = vpop.eup %2714  ;;  %2734 = vlog2.f32 %v1139_v21  ;;  %5296 = vst [vmem:[#allocation16_spill] sm:$0xff] %v4369_v12  ;;  %5297 = vst [vmem:[#allocation17_spill] sm:$0xff] %v4371_v27  ;;  %vm2019_vm1 = vcmp.lt.s32.totalorder %v1955_v47, 1024  ;;  %v1956_v4 = vadd.s32 %v3879_v55, %v1891_v29  ;;  %v4385_v41 = vmul.f32 0.6931472, %v2713_v0 }
 0x3b6   : > { %v2717_v23 = vpop.eup %2716  ;;  %v2081_v19 = vsel %vm2017_vm15, %v1822_v8, 0.0  ;;  %v1758_v22 = vsub.f32 1.0, %v2715_v49  ;;  %782 = vadd.xlane.f32.xlu1 %v4110_v60  ;;  %2736 = vlog2.f32 %v1141_v38  ;;  %5298 = vst [vmem:[#allocation18_spill] sm:$0xff] %v4376_v57  ;;  %v1893_v0 = vadd.s32 120, %v3868_v31 }
 0x3b7   : > { %v2719_v5 = vpop.eup %2718  ;;  %v2155_v6 = vsel %vm2135_vm13, %v2081_v19, 0.0  ;;  %v1145_v18 = vpop.xlane.xlu1 %1144  ;;  %5300 = vst [vmem:[#allocation29_spill] sm:$0xff] %v4385_v41  ;;  %2738 = vlog2.f32 %v1143_v36  ;;  %vm2020_vm2 = vcmp.lt.s32.totalorder %v1956_v4, 1024  ;;  %v1902_v12 = vadd.s32 192, %v3868_v31 }
 0x3b8   : > { %v2721_v54 = vpop.eup %2720  ;;  %v2156_v17 = vadd.f32 %v2155_v6, %v2154_v51  ;;  %v1823_v21 = vmul.f32 %v3889_v30, %v1758_v22  ;;  %v4381_v51 = vmul.f32 0.6931472, %v2711_v28  ;;  %v4388_v34 = vmul.f32 0.6931472, %v2719_v5 }
 0x3b9   : > { %v2723_v60 = vpop.eup %2722  ;;  %v1263_v13 = vmul.f32 0.6931472, %v2721_v54  ;;  %v1892_v28 = vadd.s32 112, %v3868_v31  ;;  %2740 = vlog2.f32 %v1145_v18  ;;  %v4409_v4 = vadd.s32 %v3879_v55, %v1893_v0 }
 0x3ba   : > { %v2725_v38 = vpop.eup %2724  ;;  %v2082_v58 = vsel %vm2018_vm0, %v1823_v21, 0.0  ;;  %v1759_v8 = vsub.f32 1.0, %v2723_v60  ;;  %5299 = vst [vmem:[#allocation24_spill] sm:$0xff] %v4381_v51  ;;  %5301 = vst [vmem:[#allocation85_spill] sm:$0xff] %v4388_v34  ;;  %v4390_v21 = vmul.f32 0.6931472, %v2717_v23 }
 0x3bb   : > { %v2727_v49 = vpop.eup %2726  ;;  %v2157_v19 = vsel %vm2135_vm13, %v2082_v58, 0.0  ;;  %v1147_v48 = vpop.xlane.xlu1 %1146  ;;  %v4393_v47 = vmul.f32 0.6931472, %v2725_v38  ;;  %v1504_v36 = vsub.f32 %v1263_v13, %v4231_v32  ;;  %v1894_v38 = vadd.s32 128, %v3868_v31 }
 0x3bc   : > { %v2729_v22 = vpop.eup %2728  ;;  %v2158_v6 = vadd.f32 %v2157_v19, %v2156_v17  ;;  %v1824_v9 = vmul.f32 %v3889_v30, %v1759_v8  ;;  %5302 = vst [vmem:[#allocation19_spill] sm:$0xff] %v4390_v21  ;;  %v4396_v41 = vmul.f32 0.6931472, %v2727_v49  ;;  %2742 = vlog2.f32 %v1147_v48 }
 0x3bd   : > { %v2731_v57 = vpop.eup %2730  ;;  %5303 = vst [vmem:[#allocation30_spill] sm:$0xff] %v4393_v47  ;;  %v4398_v17 = vmul.f32 0.6931472, %v2729_v22  ;;  %v1895_v22 = vadd.s32 136, %v3868_v31  ;;  %v1569_v18 = vmul.f32 %v3848_v42, %v1504_v36  ;;  %v1918_v36 = vadd.s32 320, %v3868_v31 }
 0x3be   : > { %v2733_v60 = vpop.eup %2732  ;;  %v2083_v29 = vsel %vm2019_vm1, %v1824_v9, 0.0  ;;  %v1760_v58 = vsub.f32 1.0, %v2731_v57  ;;  %5304 = vst [vmem:[#allocation86_spill] sm:$0xff] %v4396_v41  ;;  %v4405_v57 = vadd.s32 %v3879_v55, %v1892_v28  ;;  %v1899_v28 = vadd.s32 168, %v3868_v31 }
 0x3bf   : > { %5305 = vst [vmem:[#allocation31_spill] sm:$0xff] %v4398_v17  ;;  %v2159_v54 = vsel %vm2135_vm13, %v2083_v29, 0.0  ;;  %v1149_v5 = vpop.xlane.xlu1 %1148  ;;  %v2735_v23 = vpop.eup %2734  ;;  %v1265_v49 = vmul.f32 0.6931472, %v2733_v60  ;;  %v1897_v29 = vadd.s32 152, %v3868_v31  ;;  %v4424_v17 = vadd.s32 %v3879_v55, %v1895_v22 }
 0x3c0   : > { %v2160_v8 = vadd.f32 %v2159_v54, %v2158_v6  ;;  %v1825_v19 = vmul.f32 %v3889_v30, %v1760_v58  ;;  %v2737_v9 = vpop.eup %2736  ;;  %v1896_v6 = vadd.s32 144, %v3868_v31  ;;  %v1267_v13 = vmul.f32 0.6931472, %v2735_v23 }
 0x3c1   : > { %v1898_v58 = vadd.s32 160, %v3868_v31  ;;  %v1269_v0 = vmul.f32 0.6931472, %v2737_v9  ;;  %v1505_v34 = vsub.f32 %v1265_v49, %v4228_v7  ;;  %v1909_v23 = vadd.s32 248, %v3868_v31 }
 0x3c2   : > { %v2084_v41 = vsel %vm2020_vm2, %v1825_v19, 0.0  ;;  %v4420_v19 = vadd.s32 %v3879_v55, %v1894_v38  ;;  %v4429_v27 = vadd.s32 %v3879_v55, %v1896_v6  ;;  %v2739_v38 = vpop.eup %2738  ;;  %v1506_v9 = vsub.f32 %v1267_v13, %v4238_v62 }
 0x3c3   : > { %v2161_v32 = vsel %vm2135_vm13, %v2084_v41, 0.0  ;;  %v1151_v54 = vpop.xlane.xlu1 %1150  ;;  %v1900_v41 = vadd.s32 176, %v3868_v31  ;;  %v4435_v7 = vadd.s32 %v3879_v55, %v1897_v29  ;;  %v4438_v49 = vadd.s32 %v3879_v55, %v1898_v58 }
 0x3c4   : > { %v4416_v60 = vadd.f32 %v2161_v32, %v2160_v8  ;;  %v1901_v8 = vadd.s32 184, %v3868_v31  ;;  %v4441_v22 = vadd.s32 %v3879_v55, %v1899_v28  ;;  %v1647_v6 = vmul.f32 1.442695, %v1569_v18  ;;  %v2741_v18 = vpop.eup %2740 }
 0x3c5   : > { %v1507_v48 = vsub.f32 %v1269_v0, %v4242_v59  ;;  %v1903_v37 = vadd.s32 200, %v3868_v31  ;;  %v1570_v2 = vmul.f32 %v3848_v42, %v1505_v34  ;;  %v4448_v62 = vadd.s32 %v3879_v55, %v1900_v41 }
 0x3c6   : > { %v4451_v29 = vadd.s32 %v3879_v55, %v1909_v23  ;;  %v1904_v13 = vadd.s32 208, %v3868_v31  ;;  %v1271_v58 = vmul.f32 0.6931472, %v2739_v38  ;;  %2744 = vlog2.f32 %v1149_v5 }
 0x3c7   : > { %v1153_v32 = vpop.xlane.xlu1 %1152  ;;  %v4455_v28 = vadd.s32 %v3879_v55, %v1901_v8  ;;  %v4458_v59 = vadd.s32 %v3879_v55, %v1918_v36  ;;  %v1571_v0 = vmul.f32 %v3848_v42, %v1506_v9  ;;  %2746 = vlog2.f32 %v1151_v54 }
 0x3c8   : > { %5306 = vst [vmem:[#allocation32_spill] sm:$0xff] %v4451_v29  ;;  %v1920_v41 = vadd.s32 336, %v3868_v31  ;;  %v1905_v23 = vadd.s32 216, %v3868_v31  ;;  %2748 = vpow2.f32 %v1647_v6  ;;  %v1572_v47 = vmul.f32 %v3848_v42, %v1507_v48 }
 0x3c9   : > { %5307 = vst [vmem:[#allocation26_spill] sm:$0xff] %v4458_v59  ;;  %v4465_v5 = vadd.s32 %v3879_v55, %v1902_v12  ;;  %v4468_v8 = vadd.s32 %v3879_v55, %v1903_v37  ;;  %v1649_v36 = vmul.f32 1.442695, %v1570_v2  ;;  %v4471_v38 = vadd.s32 %v3879_v55, %v1904_v13  ;;  %v1169_v12 = vpop.xlane.xlu0 %1168  ;;  %v2743_v59 = vpop.eup %2742 }
 0x3ca   : > { %v1906_v54 = vadd.s32 224, %v3868_v31  ;;  %v1922_v9 = vadd.s32 352, %v3868_v31  ;;  %v1508_v21 = vsub.f32 %v1271_v58, %v4248_v20  ;;  %v1273_v51 = vmul.f32 0.6931472, %v2741_v18 }
 0x3cb   : > { %v1155_v34 = vpop.xlane.xlu1 %1154  ;;  %2750 = vlog2.f32 %v1153_v32  ;;  %v1907_v6 = vadd.s32 232, %v3868_v31  ;;  %v1651_v48 = vmul.f32 1.442695, %v1571_v0  ;;  %v4478_v37 = vadd.s32 %v3879_v55, %v1920_v41 }
 0x3cc   : > { %v4481_v2 = vadd.s32 %v3879_v55, %v1905_v23  ;;  %v1908_v13 = vadd.s32 240, %v3868_v31  ;;  %v1653_v29 = vmul.f32 1.442695, %v1572_v47  ;;  %2752 = vlog2.f32 %v1155_v34 }
 0x3cd   : > { %5308 = vst [vmem:[#allocation20_spill] sm:$0xff] %v4478_v37  ;;  %v1924_v20 = vadd.s32 368, %v3868_v31  ;;  %v1910_v32 = vadd.s32 256, %v3868_v31  ;;  %2754 = vpow2.f32 %v1649_v36  ;;  %v4487_v58 = vadd.s32 %v3879_v55, %v1906_v54 }
 0x3ce   : > { %v4490_v18 = vadd.s32 %v3879_v55, %v1922_v9  ;;  %v1911_v0 = vadd.s32 264, %v3868_v31  ;;  %v1573_v41 = vmul.f32 %v3848_v42, %v1508_v21  ;;  %v1509_v23 = vsub.f32 %v1273_v51, %v4245_v61 }
 0x3cf   : > { %v1157_v16 = vpop.xlane.xlu1 %1156  ;;  %v4496_v47 = vadd.s32 %v3879_v55, %v1907_v6  ;;  %v1926_v34 = vadd.s32 384, %v3868_v31  ;;  %2756 = vpow2.f32 %v1651_v48  ;;  %v1275_v37 = vmul.f32 0.6931472, %v2743_v59  ;;  %v1187_v6 = vpop.xlane.xlu0 %1186 }
 0x3d0   : > { %5309 = vst [vmem:[#allocation33_spill] sm:$0xff] %v4490_v18  ;;  %v1912_v54 = vadd.s32 272, %v3868_v31  ;;  %v1913_v10 = vadd.s32 280, %v3868_v31  ;;  %v2745_v9 = vpop.eup %2744  ;;  %2758 = vpow2.f32 %v1653_v29  ;;  %v4502_v18 = vadd.s32 %v3879_v55, %v1908_v13 }
 0x3d1   : > { %5310 = vst [vmem:[#allocation34_spill] sm:$0xff] %v4496_v47  ;;  %v4505_v21 = vadd.s32 %v3879_v55, %v1924_v20  ;;  %v4508_v61 = vadd.s32 %v3879_v55, %v1910_v32  ;;  %v2747_v51 = vpop.eup %2746  ;;  %2760 = vlog2.f32 %v1157_v16  ;;  %v4511_v59 = vadd.s32 %v3879_v55, %v1911_v0 }
 0x3d2   : > { %5311 = vst [vmem:[#allocation35_spill] sm:$0xff] %v4502_v18  ;;  %v1928_v48 = vadd.s32 400, %v3868_v31  ;;  %v1914_v53 = vadd.s32 288, %v3868_v31  ;;  %v2749_v29 = vpop.eup %2748  ;;  %vm2021_vm3 = vcmp.lt.s32.totalorder %v4405_v57, 1024  ;;  %v1655_v13 = vmul.f32 1.442695, %v1573_v41 }
 0x3d3   : > { %v1159_v36 = vpop.xlane.xlu1 %1158  ;;  %5312 = vst [vmem:[#allocation36_spill] sm:$0xff] %v4505_v21  ;;  %5313 = vst [vmem:[#allocation21_spill] sm:$0xff] %v4508_v61  ;;  %v1574_v20 = vmul.f32 %v3848_v42, %v1509_v23  ;;  %2762 = vlog2.f32 %v1169_v12  ;;  %v4518_v32 = vadd.s32 %v3879_v55, %v1926_v34  ;;  %v1510_v21 = vsub.f32 %v1275_v37, %v4263_v33 }
 0x3d4   : > { %5314 = vst [vmem:[#allocation37_spill] sm:$0xff] %v4511_v59  ;;  %v1277_v16 = vmul.f32 0.6931472, %v2745_v9  ;;  %v4522_v0 = vadd.s32 %v3879_v55, %v1912_v54  ;;  %v4525_v59 = vadd.s32 %v3879_v55, %v1913_v10  ;;  %v1279_v47 = vmul.f32 0.6931472, %v2747_v51 }
 0x3d5   : > { %5315 = vst [vmem:[#allocation87_spill] sm:$0xff] %v4518_v32  ;;  %v2751_v18 = vpop.eup %2750  ;;  %2764 = vlog2.f32 %v1187_v6  ;;  %v1915_v41 = vadd.s32 296, %v3868_v31  ;;  %v1930_v12 = vadd.s32 416, %v3868_v31  ;;  %v1761_v23 = vsub.f32 1.0, %v2749_v29 }
 0x3d6   : > { %5316 = vst [vmem:[#allocation28_spill] sm:$0xff] %v4522_v0  ;;  %5317 = vst [vmem:[#allocation22_spill] sm:$0xff] %v4525_v59  ;;  %v4530_v34 = vadd.s32 %v3879_v55, %v1928_v48  ;;  %v4533_v33 = vadd.s32 %v3879_v55, %v1914_v53  ;;  %v1916_v37 = vadd.s32 304, %v3868_v31  ;;  %v2753_v54 = vpop.eup %2752  ;;  %2766 = vpow2.f32 %v1655_v13 }
 0x3d7   : > { %v1161_v61 = vpop.xlane.xlu1 %1160  ;;  %v1657_v10 = vmul.f32 1.442695, %v1574_v20  ;;  %v1917_v9 = vadd.s32 312, %v3868_v31  ;;  %v1932_v51 = vadd.s32 432, %v3868_v31  ;;  %v2755_v6 = vpop.eup %2754  ;;  %vm2022_vm4 = vcmp.lt.s32.totalorder %v4409_v4, 1024 }
 0x3d8   : > { %5318 = vst [vmem:[#allocation23_spill] sm:$0xff] %v4530_v34  ;;  %5319 = vst [vmem:[#allocation38_spill] sm:$0xff] %v4533_v33  ;;  %v1575_v29 = vmul.f32 %v3848_v42, %v1510_v21  ;;  %v1511_v48 = vsub.f32 %v1277_v16, %v4260_v56  ;;  %v1281_v34 = vmul.f32 0.6931472, %v2751_v18  ;;  %2768 = vlog2.f32 %v1159_v36 }
 0x3d9   : > { %v1512_v32 = vsub.f32 %v1279_v47, %v4270_v11  ;;  %2770 = vlog2.f32 %v1161_v61  ;;  %v4543_v13 = vadd.s32 %v3879_v55, %v1915_v41  ;;  %v4546_v20 = vadd.s32 %v3879_v55, %v1930_v12  ;;  %v2757_v33 = vpop.eup %2756 }
 0x3da   : > { %v1826_v59 = vmul.f32 %v3889_v30, %v1761_v23  ;;  %v1283_v0 = vmul.f32 0.6931472, %v2753_v54  ;;  %v4550_v21 = vadd.s32 %v3879_v55, %v1916_v37  ;;  %v1919_v56 = vadd.s32 328, %v3868_v31  ;;  %v2759_v18 = vpop.eup %2758 }
 0x3db   : > { %v1163_v53 = vpop.xlane.xlu1 %1162  ;;  %5320 = vst [vmem:[#allocation39_spill] sm:$0xff] %v4543_v13  ;;  %5321 = vst [vmem:[#allocation8_spill] sm:$0xff] %v4546_v20  ;;  %v1762_v36 = vsub.f32 1.0, %v2755_v6  ;;  %v4554_v11 = vadd.s32 %v3879_v55, %v1917_v9  ;;  %v4557_v47 = vadd.s32 %v3879_v55, %v1932_v51  ;;  %v2761_v61 = vpop.eup %2760  ;;  %vm2023_vm5 = vcmp.lt.s32.totalorder %v4420_v19, 1024 }
 0x3dc   : > { %5322 = vst [vmem:[#allocation40_spill] sm:$0xff] %v4550_v21  ;;  %2772 = vlog2.f32 %v1163_v53  ;;  %vm2024_vm6 = vcmp.lt.s32.totalorder %v4424_v17, 1024  ;;  %v1659_v16 = vmul.f32 1.442695, %v1575_v29  ;;  %v1576_v41 = vmul.f32 %v3848_v42, %v1511_v48  ;;  %v1191_v13 = vpop.xlane.xlu0 %1190 }
 0x3dd   : > { %5323 = vst [vmem:[#allocation41_spill] sm:$0xff] %v4554_v11  ;;  %5324 = vst [vmem:[#allocation42_spill] sm:$0xff] %v4557_v47  ;;  %2774 = vpow2.f32 %v1657_v10  ;;  %v1513_v12 = vsub.f32 %v1281_v34, %v4274_v40  ;;  %v2763_v37 = vpop.eup %2762  ;;  %v1577_v54 = vmul.f32 %v3848_v42, %v1512_v32  ;;  %v1921_v9 = vadd.s32 344, %v3868_v31 }
 0x3de   : > { %v1923_v51 = vadd.s32 360, %v3868_v31  ;;  %v1925_v6 = vadd.s32 376, %v3868_v31  ;;  %v2085_v53 = vsel %vm2021_vm3, %v1826_v59, 0.0  ;;  %v1514_v10 = vsub.f32 %v1283_v0, %v4277_v24 }
 0x3df   : > { %v1165_v23 = vpop.xlane.xlu1 %1164  ;;  %v4571_v29 = vadd.s32 %v3879_v55, %v1919_v56  ;;  %v2765_v40 = vpop.eup %2764  ;;  %v1827_v34 = vmul.f32 %v3889_v30, %v1762_v36  ;;  %v1763_v48 = vsub.f32 1.0, %v2757_v33  ;;  %v1764_v32 = vsub.f32 1.0, %v2759_v18 }
 0x3e0   : > { %2776 = vlog2.f32 %v1165_v23  ;;  %v1285_v47 = vmul.f32 0.6931472, %v2761_v61  ;;  %v1661_v20 = vmul.f32 1.442695, %v1576_v41  ;;  %v1297_v11 = vmul.f32 0.6931472, %v2763_v37  ;;  %v2767_v59 = vpop.eup %2766 }
 0x3e1   : > { %2778 = vpow2.f32 %v1659_v16  ;;  %v1578_v21 = vmul.f32 %v3848_v42, %v1513_v12  ;;  %vm2025_vm7 = vcmp.lt.s32.totalorder %v4429_v27, 1024  ;;  %v1663_v24 = vmul.f32 1.442695, %v1577_v54 }
 0x3e2   : > { %v4577_v0 = vadd.s32 %v3879_v55, %v1921_v9  ;;  %v4580_v56 = vadd.s32 %v3879_v55, %v1923_v51  ;;  %v4583_v33 = vadd.s32 %v3879_v55, %v1925_v6  ;;  %v2769_v18 = vpop.eup %2768  ;;  %v2163_v36 = vsel %vm2135_vm13, %v2085_v53, 0.0  ;;  %v1195_v53 = vpop.xlane.xlu0 %1194 }
 0x3e3   : > { %v1167_v57 = vpop.xlane.xlu1 %1166  ;;  %v1315_v61 = vmul.f32 0.6931472, %v2765_v40  ;;  %v1579_v16 = vmul.f32 %v3848_v42, %v1514_v10  ;;  %v2771_v41 = vpop.eup %2770  ;;  %v2086_v12 = vsel %vm2022_vm4, %v1827_v34, 0.0  ;;  %v1828_v23 = vmul.f32 %v3889_v30, %v1763_v48 }
 0x3e4   : > { %5325 = vst [vmem:[#allocation43_spill] sm:$0xff] %v4583_v33  ;;  %2780 = vlog2.f32 %v1167_v57  ;;  %v1829_v37 = vmul.f32 %v3889_v30, %v1764_v32  ;;  %v1515_v54 = vsub.f32 %v1285_v47, %v4289_v25  ;;  %v1765_v9 = vsub.f32 1.0, %v2767_v59 }
 0x3e5   : > { %2782 = vpow2.f32 %v1661_v20  ;;  %v1521_v51 = vsub.f32 %v1297_v11, %v4315_v63  ;;  %v1665_v6 = vmul.f32 1.442695, %v1578_v21  ;;  %v2164_v10 = vadd.f32 %v2163_v36, %v4416_v60 }
 0x3e6   : > { %v2773_v33 = vpop.eup %2772  ;;  %2784 = vpow2.f32 %v1663_v24  ;;  %v1287_v57 = vmul.f32 0.6931472, %v2769_v18  ;;  %v1927_v4 = vadd.s32 392, %v3868_v31  ;;  %v2165_v48 = vsel %vm2135_vm13, %v2086_v12, 0.0  ;;  %v1199_v18 = vpop.xlane.xlu0 %1198 }
 0x3e7   : > { %v1171_v40 = vpop.xlane.xlu1 %1170  ;;  %v2775_v34 = vpop.eup %2774  ;;  %vm2026_vm8 = vcmp.lt.s32.totalorder %v4435_v7, 1024  ;;  %v1530_v25 = vsub.f32 %v1315_v61, %v4354_v50  ;;  %v1667_v20 = vmul.f32 1.442695, %v1579_v16  ;;  %v1289_v47 = vmul.f32 0.6931472, %v2771_v41 }
 0x3e8   : > { %v2087_v63 = vsel %vm2023_vm5, %v1828_v23, 0.0  ;;  %v2088_v21 = vsel %vm2024_vm6, %v1829_v37, 0.0  ;;  %v1580_v60 = vmul.f32 %v3848_v42, %v1515_v54  ;;  %2786 = vlog2.f32 %v1191_v13 }
 0x3e9   : > { %v1830_v32 = vmul.f32 %v3889_v30, %v1765_v9  ;;  %v1586_v59 = vmul.f32 %v3848_v42, %v1521_v51  ;;  %2788 = vpow2.f32 %v1665_v6  ;;  %v1291_v24 = vmul.f32 0.6931472, %v2773_v33 }
 0x3ea   : > { %v2777_v11 = vpop.eup %2776  ;;  %v2166_v36 = vadd.f32 %v2165_v48, %v2164_v10  ;;  %v1766_v61 = vsub.f32 1.0, %v2775_v34  ;;  %v1516_v19 = vsub.f32 %v1287_v57, %v4292_v52  ;;  %2790 = vlog2.f32 %v1195_v53 }
 0x3eb   : > { %v1173_v50 = vpop.xlane.xlu1 %1172  ;;  %v2779_v16 = vpop.eup %2778  ;;  %v2167_v17 = vsel %vm2135_vm13, %v2087_v63, 0.0  ;;  %vm2027_vm9 = vcmp.lt.s32.totalorder %v4438_v49, 1024  ;;  %v1595_v13 = vmul.f32 %v3848_v42, %v1530_v25  ;;  %2792 = vpow2.f32 %v1667_v20 }
 0x3ec   : > { %v1517_v41 = vsub.f32 %v1289_v47, %v4298_v1  ;;  %v2169_v12 = vsel %vm2135_vm13, %v2088_v21, 0.0  ;;  %v1669_v33 = vmul.f32 1.442695, %v1580_v60  ;;  %v1293_v23 = vmul.f32 0.6931472, %v2777_v11 }
 0x3ed   : > { %2794 = vlog2.f32 %v1199_v18  ;;  %v2089_v52 = vsel %vm2025_vm7, %v1830_v32, 0.0  ;;  %v1681_v54 = vmul.f32 1.442695, %v1586_v59  ;;  %v1518_v9 = vsub.f32 %v1291_v24, %v4308_v39 }
 0x3ee   : > { %v2781_v37 = vpop.eup %2780  ;;  %2796 = vlog2.f32 %v1171_v40  ;;  %v1831_v6 = vmul.f32 %v3889_v30, %v1766_v61  ;;  %v1767_v53 = vsub.f32 1.0, %v2779_v16  ;;  %v1581_v10 = vmul.f32 %v3848_v42, %v1516_v19 }
 0x3ef   : > { %v1175_v51 = vpop.xlane.xlu1 %1174  ;;  %v1295_v1 = vmul.f32 0.6931472, %v2781_v37  ;;  %v2783_v57 = vpop.eup %2782  ;;  %v2168_v34 = vadd.f32 %v2167_v17, %v2166_v36  ;;  %v1699_v48 = vmul.f32 1.442695, %v1595_v13  ;;  %v1582_v25 = vmul.f32 %v3848_v42, %v1517_v41 }
 0x3f0   : > { %2798 = vlog2.f32 %v1173_v50  ;;  %v2785_v20 = vpop.eup %2784  ;;  %vm2028_vm10 = vcmp.lt.s32.totalorder %v4441_v22, 1024  ;;  %vm2029_vm11 = vcmp.lt.s32.totalorder %v4448_v62, 1024  ;;  %v1519_v39 = vsub.f32 %v1293_v23, %v4305_v43 }
 0x3f1   : > { %2800 = vpow2.f32 %v1669_v33  ;;  %v4621_v27 = vadd.s32 %v3879_v55, %v1927_v4  ;;  %v1929_v40 = vadd.s32 408, %v3868_v31  ;;  %v2170_v47 = vadd.f32 %v2169_v12, %v2168_v34 }
 0x3f2   : > { %v2171_v63 = vsel %vm2135_vm13, %v2089_v52, 0.0  ;;  %2802 = vpow2.f32 %v1681_v54  ;;  %v1583_v21 = vmul.f32 %v3848_v42, %v1518_v9  ;;  %v2787_v11 = vpop.eup %2786  ;;  %v2090_v32 = vsel %vm2026_vm8, %v1831_v6, 0.0 }
 0x3f3   : > { %v1177_v60 = vpop.xlane.xlu1 %1176  ;;  %v1832_v59 = vmul.f32 %v3889_v30, %v1767_v53  ;;  %v1671_v24 = vmul.f32 1.442695, %v1581_v10  ;;  %v1520_v43 = vsub.f32 %v1295_v1, %v4318_v46  ;;  %v2789_v4 = vpop.eup %2788  ;;  %v1768_v18 = vsub.f32 1.0, %v2783_v57 }
 0x3f4   : > { %v1769_v50 = vsub.f32 1.0, %v2785_v20  ;;  %2804 = vpow2.f32 %v1699_v48  ;;  %v1673_v36 = vmul.f32 1.442695, %v1582_v25  ;;  %v2791_v61 = vpop.eup %2790  ;;  %v1584_v19 = vmul.f32 %v3848_v42, %v1519_v39 }
 0x3f5   : > { %2806 = vlog2.f32 %v1175_v51  ;;  %v4632_v16 = vadd.s32 %v3879_v55, %v1929_v40  ;;  %v4635_v7 = vadd.s32 424, %v3868_v31  ;;  %v2793_v17 = vpop.eup %2792  ;;  %v2172_v13 = vadd.f32 %v2171_v63, %v2170_v47  ;;  %v1203_v63 = vpop.xlane.xlu0 %1202 }
 0x3f6   : > { %vm2030_vm12 = vcmp.lt.s32.totalorder %v4455_v28, 1024  ;;  %v1319_v46 = vmul.f32 0.6931472, %v2787_v11  ;;  %v1675_v41 = vmul.f32 1.442695, %v1583_v21  ;;  %2808 = vlog2.f32 %v1177_v60 }
 0x3f7   : > { %v1179_v12 = vpop.xlane.xlu1 %1178  ;;  %v2795_v33 = vpop.eup %2794  ;;  %v2173_v23 = vsel %vm2135_vm13, %v2090_v32, 0.0  ;;  %v2091_v37 = vsel %vm2027_vm9, %v1832_v59, 0.0  ;;  %vm2031_vm14 = vcmp.lt.s32.totalorder %v4465_v5, 1024  ;;  %2810 = vpow2.f32 %v1671_v24 }
 0x3f8   : > { %v1585_v52 = vmul.f32 %v3848_v42, %v1520_v43  ;;  %v2797_v54 = vpop.eup %2796  ;;  %v1833_v9 = vmul.f32 %v3889_v30, %v1768_v18  ;;  %v1834_v51 = vmul.f32 %v3889_v30, %v1769_v50  ;;  %v1770_v6 = vsub.f32 1.0, %v2789_v4 }
 0x3f9   : > { %2812 = vpow2.f32 %v1673_v36  ;;  %v1323_v53 = vmul.f32 0.6931472, %v2791_v61  ;;  %v1677_v10 = vmul.f32 1.442695, %v1584_v19  ;;  %v1299_v1 = vmul.f32 0.6931472, %v2797_v54 }
 0x3fa   : > { %2814 = vlog2.f32 %v1179_v12  ;;  %v2799_v57 = vpop.eup %2798  ;;  %v2174_v34 = vadd.f32 %v2173_v23, %v2172_v13  ;;  %v1771_v49 = vsub.f32 1.0, %v2793_v17  ;;  %v1532_v48 = vsub.f32 %v1319_v46, %v4365_v44  ;;  %v1207_v46 = vpop.xlane.xlu0 %1206 }
 0x3fb   : > { %2816 = vpow2.f32 %v1675_v41  ;;  %v1181_v25 = vpop.xlane.xlu1 %1180  ;;  %v2801_v20 = vpop.eup %2800  ;;  %v1679_v39 = vmul.f32 1.442695, %v1585_v52  ;;  %v1327_v40 = vmul.f32 0.6931472, %v2795_v33  ;;  %v1301_v47 = vmul.f32 0.6931472, %v2799_v57 }
 0x3fc   : > { %2818 = vlog2.f32 %v1181_v25  ;;  %v4646_v21 = vpop.eup %2802  ;;  %v2175_v60 = vsel %vm2135_vm13, %v2091_v37, 0.0  ;;  %v2092_v11 = vsel %vm2028_vm10, %v1833_v9, 0.0  ;;  %v2093_v32 = vsel %vm2029_vm11, %v1834_v51, 0.0 }
 0x3fd   : > { %vm2032_vm15 = vcmp.lt.s32.totalorder %v4468_v8, 1024  ;;  %v1522_v44 = vsub.f32 %v1299_v1, %v4321_v14  ;;  %v1835_v59 = vmul.f32 %v3889_v30, %v1770_v6  ;;  %v1534_v24 = vsub.f32 %v1323_v53, %v4374_v26 }
 0x3fe   : > { %2820 = vpow2.f32 %v1677_v10  ;;  %v1523_v43 = vsub.f32 %v1301_v47, %v4325_v15  ;;  %v4658_v4 = vpop.eup %2804  ;;  %v1836_v18 = vmul.f32 %v3889_v30, %v1771_v49  ;;  %v1772_v22 = vsub.f32 1.0, %v2801_v20 }
 0x3ff   : > { %v1597_v50 = vmul.f32 %v3848_v42, %v1532_v48  ;;  %2822 = vlog2.f32 %v1203_v63  ;;  %v1183_v62 = vpop.xlane.xlu1 %1182  ;;  %v2807_v36 = vpop.eup %2806  ;;  %v2176_v61 = vadd.f32 %v2175_v60, %v2174_v34  ;;  %v2177_v14 = vsel %vm2135_vm13, %v2092_v11, 0.0 }
 0x400   : > { %2824 = vpow2.f32 %v1679_v39  ;;  %v1536_v19 = vsub.f32 %v1327_v40, %v4378_v35  ;;  %v2809_v26 = vpop.eup %2808  ;;  %v1778_v17 = vsub.f32 1.0, %v4646_v21  ;;  %v1587_v15 = vmul.f32 %v3848_v42, %v1522_v44  ;;  %v1211_v63 = vpop.xlane.xlu0 %1210 }
 0x401   : > { %v1303_v13 = vmul.f32 0.6931472, %v2807_v36  ;;  %2826 = vlog2.f32 %v1183_v62  ;;  %v2811_v41 = vpop.eup %2810  ;;  %v2179_v12 = vsel %vm2135_vm13, %v2093_v32, 0.0  ;;  %v2094_v33 = vsel %vm2030_vm12, %v1835_v59, 0.0  ;;  %v5327_v36 = vld [vmem:[#allocation10_spill] sm:$0xff] }
 0x402   : > { %vm2033_vm0 = vcmp.lt.s32.totalorder %v4471_v38, 1024  ;;  %v1599_v23 = vmul.f32 %v3848_v42, %v1534_v24  ;;  %v1588_v35 = vmul.f32 %v3848_v42, %v1523_v43  ;;  %v2178_v52 = vadd.f32 %v2177_v14, %v2176_v61 }
 0x403   : > { %v2813_v37 = vpop.eup %2812  ;;  %v2095_v54 = vsel %vm2031_vm14, %v1836_v18, 0.0  ;;  %v1837_v9 = vmul.f32 %v3889_v30, %v1772_v22  ;;  %v1703_v51 = vmul.f32 1.442695, %v1597_v50  ;;  %v4675_v6 = vpop.xlane.xlu1 %1184  ;;  %vm2034_vm1 = vcmp.lt.s32.totalorder %v4481_v2, 1024  ;;  %v5326_v18 = vld [vmem:[#allocation34_spill] sm:$0xff] }
 0x404   : > { %v2815_v53 = vpop.eup %2814  ;;  %v1601_v28 = vmul.f32 %v3848_v42, %v1536_v19  ;;  %v1524_v10 = vsub.f32 %v1303_v13, %v4328_v3  ;;  %v1305_v1 = vmul.f32 0.6931472, %v2809_v26  ;;  %2828 = vlog2.f32 %v1207_v46  ;;  %v4694_v8 = vpop.xlane.xlu0 %1214 }
 0x405   : > { %v2817_v57 = vpop.eup %2816  ;;  %v2180_v34 = vadd.f32 %v2179_v12, %v2178_v52  ;;  %v2181_v49 = vsel %vm2135_vm13, %v2094_v33, 0.0  ;;  %v1773_v5 = vsub.f32 1.0, %v2811_v41  ;;  %v1683_v48 = vmul.f32 1.442695, %v1587_v15  ;;  %v5328_v15 = vld [vmem:[#allocation14_spill] sm:$0xff]  ;;  %v5329_v33 = vld [vmem:[#allocation35_spill] sm:$0xff] }
 0x406   : > { %v2819_v25 = vpop.eup %2818  ;;  %v2183_v20 = vsel %vm2135_vm13, %v2095_v54, 0.0  ;;  %vm2035_vm2 = vcmp.lt.s32.totalorder %v4487_v58, 1024  ;;  %v1707_v39 = vmul.f32 1.442695, %v1599_v23  ;;  %v1685_v40 = vmul.f32 1.442695, %v1588_v35 }
 0x407   : > { %v1525_v47 = vsub.f32 %v1305_v1, %v4336_v45  ;;  %v1774_v60 = vsub.f32 1.0, %v2813_v37  ;;  %v1589_v3 = vmul.f32 %v3848_v42, %v1524_v10  ;;  %v1307_v11 = vmul.f32 0.6931472, %v2815_v53  ;;  %v4685_v44 = vpop.xlane.xlu1 %1188 }
 0x408   : > { %v1309_v32 = vmul.f32 0.6931472, %v2819_v25  ;;  %v2821_v59 = vpop.eup %2820  ;;  %v2182_v24 = vadd.f32 %v2181_v49, %v2180_v34  ;;  %v2096_v43 = vsel %vm2032_vm15, %v1837_v9, 0.0  ;;  %2830 = vpow2.f32 %v1703_v51  ;;  %v5330_v9 = vld [vmem:[#allocation32_spill] sm:$0xff]  ;;  %v5331_v51 = vld [vmem:[#allocation26_spill] sm:$0xff] }
 0x409   : > { %vm2036_vm3 = vcmp.lt.s32.totalorder %v5326_v18, 1024  ;;  %v1711_v22 = vmul.f32 1.442695, %v1601_v28  ;;  %v2823_v50 = vpop.eup %2822  ;;  %v1838_v45 = vmul.f32 %v3889_v30, %v1773_v5  ;;  %v1775_v62 = vsub.f32 1.0, %v2817_v57  ;;  %v5332_v5 = vld [vmem:[#allocation84_spill] sm:$0xff] }
 0x40a   : > { %2832 = vpow2.f32 %v1683_v48  ;;  %v1526_v61 = vsub.f32 %v1307_v11, %v5327_v36  ;;  %v2825_v14 = vpop.eup %2824  ;;  %v2184_v19 = vadd.f32 %v2183_v20, %v2182_v24  ;;  %v1590_v26 = vmul.f32 %v3848_v42, %v1525_v47  ;;  %v5334_v36 = vld [vmem:[#allocation21_spill] sm:$0xff] }
 0x40b   : > { %2834 = vpow2.f32 %v1685_v40  ;;  %v1527_v13 = vsub.f32 %v1309_v32, %v5328_v15  ;;  %v2827_v46 = vpop.eup %2826  ;;  %v1839_v41 = vmul.f32 %v3889_v30, %v1774_v60  ;;  %v1776_v12 = vsub.f32 1.0, %v2821_v59  ;;  %v4698_v35 = vpop.xlane.xlu1 %1192  ;;  %v5333_v32 = vld [vmem:[#allocation24_spill] sm:$0xff]  ;;  %v5336_v15 = vld [vmem:[#allocation37_spill] sm:$0xff] }
 0x40c   : > { %2836 = vpow2.f32 %v1707_v39  ;;  %vm2037_vm4 = vcmp.lt.s32.totalorder %v5329_v33, 1024  ;;  %v1687_v23 = vmul.f32 1.442695, %v1589_v3  ;;  %v2185_v37 = vsel %vm2135_vm13, %v2096_v43, 0.0  ;;  %v4715_v3 = vpop.xlane.xlu0 %1216 }
 0x40d   : > { %2838 = vpow2.f32 %v1711_v22  ;;  %v1591_v52 = vmul.f32 %v3848_v42, %v1526_v61  ;;  %v1311_v54 = vmul.f32 0.6931472, %v2827_v46  ;;  %vm2038_vm5 = vcmp.lt.s32.totalorder %v5330_v9, 1024 }
 0x40e   : > { %vm2047_vm6 = vcmp.lt.s32.totalorder %v5331_v51, 1024  ;;  %v2097_v53 = vsel %vm2033_vm0, %v1838_v45, 0.0  ;;  %v1840_v28 = vmul.f32 %v3889_v30, %v1775_v62  ;;  %v1331_v10 = vmul.f32 0.6931472, %v2823_v50  ;;  %v2829_v1 = vpop.eup %2828 }
 0x40f   : > { %2840 = vlog2.f32 %v1211_v63  ;;  %v1777_v57 = vsub.f32 1.0, %v2825_v14  ;;  %v1689_v34 = vmul.f32 1.442695, %v1590_v26  ;;  %v1592_v49 = vmul.f32 %v3848_v42, %v1527_v13  ;;  %v1197_v38 = vpop.xlane.xlu1 %1196  ;;  %v5335_v26 = vld [vmem:[#allocation20_spill] sm:$0xff] }
 0x410   : > { %v1528_v48 = vsub.f32 %v1311_v54, %v5332_v5  ;;  %v1787_v25 = vsub.f32 1.0, %v4658_v4  ;;  %v2098_v20 = vsel %vm2034_vm1, %v1839_v41, 0.0  ;;  %v1841_v39 = vmul.f32 %v3889_v30, %v1776_v12  ;;  %v5337_v41 = vld [vmem:[#allocation19_spill] sm:$0xff]  ;;  %v4743_v54 = vpop.xlane.xlu0 %1218 }
 0x411   : > { %2842 = vpow2.f32 %v1687_v23  ;;  %v2186_v40 = vadd.f32 %v2185_v37, %v2184_v19  ;;  %v2187_v47 = vsel %vm2135_vm13, %v2097_v53, 0.0  ;;  %v1691_v63 = vmul.f32 1.442695, %v1591_v52 }
 0x412   : > { %v1593_v60 = vmul.f32 %v3848_v42, %v1528_v48  ;;  %v2099_v11 = vsel %vm2035_vm2, %v1840_v28, 0.0  ;;  %v1538_v4 = vsub.f32 %v1331_v10, %v5333_v32  ;;  %v1335_v59 = vmul.f32 0.6931472, %v2829_v1  ;;  %v2831_v2 = vpop.eup %2830 }
 0x413   : > { %2844 = vlog2.f32 %v4675_v6  ;;  %v2189_v24 = vsel %vm2135_vm13, %v2098_v20, 0.0  ;;  %v1842_v43 = vmul.f32 %v3889_v30, %v1777_v57  ;;  %v1693_v22 = vmul.f32 1.442695, %v1592_v49  ;;  %v1201_v61 = vpop.xlane.xlu1 %1200 }
 0x414   : > { %2846 = vpow2.f32 %v1689_v34  ;;  %v2833_v50 = vpop.eup %2832  ;;  %v1843_v45 = vmul.f32 %v3889_v30, %v1778_v17  ;;  %v2188_v62 = vadd.f32 %v2187_v47, %v2186_v40  ;;  %v2100_v58 = vsel %vm2036_vm3, %v1841_v39, 0.0 }
 0x415   : > { %vm2039_vm7 = vcmp.lt.s32.totalorder %v5334_v36, 1024  ;;  %v4731_v6 = vadd.s32 %v3879_v55, %v4635_v7  ;;  %v2835_v14 = vpop.eup %2834  ;;  %v1852_v19 = vmul.f32 %v3889_v30, %v1787_v25  ;;  %vm2049_vm8 = vcmp.lt.s32.totalorder %v5335_v26, 1024  ;;  %v5338_v25 = vld [vmem:[#allocation28_spill] sm:$0xff] }
 0x416   : > { %v2191_v21 = vsel %vm2135_vm13, %v2099_v11, 0.0  ;;  %vm2040_vm9 = vcmp.lt.s32.totalorder %v5336_v15, 1024  ;;  %2848 = vpow2.f32 %v1691_v63  ;;  %v1695_v17 = vmul.f32 1.442695, %v1593_v60  ;;  %v2837_v18 = vpop.eup %2836 }
 0x417   : > { %v2190_v13 = vadd.f32 %v2189_v24, %v2188_v62  ;;  %v1603_v46 = vmul.f32 %v3848_v42, %v1538_v4  ;;  %v1540_v12 = vsub.f32 %v1335_v59, %v5337_v41  ;;  %2850 = vlog2.f32 %v4685_v44  ;;  %v2839_v7 = vpop.eup %2838  ;;  %v4746_v57 = vpop.xlane.xlu1 %1204 }
 0x418   : > { %v2193_v23 = vsel %vm2135_vm13, %v2100_v58, 0.0  ;;  %v2101_v37 = vsel %vm2037_vm4, %v1842_v43, 0.0  ;;  %v1779_v52 = vsub.f32 1.0, %v2833_v50  ;;  %2852 = vpow2.f32 %v1693_v22  ;;  %v4765_v24 = vpop.xlane.xlu0 %1220  ;;  %v5340_v58 = vld [vmem:[#allocation38_spill] sm:$0xff] }
 0x419   : > { %v2841_v53 = vpop.eup %2840  ;;  %v1789_v28 = vsub.f32 1.0, %v2831_v2  ;;  %v2192_v10 = vadd.f32 %v2191_v21, %v2190_v13  ;;  %v1780_v1 = vsub.f32 1.0, %v2835_v14  ;;  %2854 = vlog2.f32 %v4698_v35 }
 0x41a   : > { %v2102_v44 = vsel %vm2038_vm5, %v1843_v45, 0.0  ;;  %v2111_v34 = vsel %vm2047_vm6, %v1852_v19, 0.0  ;;  %2856 = vpow2.f32 %v1695_v17  ;;  %v4753_v33 = vadd.s32 440, %v3868_v31  ;;  %v5342_v19 = vld [vmem:[#allocation15_spill] sm:$0xff] }
 0x41b   : > { %v2843_v49 = vpop.eup %2842  ;;  %v2194_v5 = vadd.f32 %v2193_v23, %v2192_v10  ;;  %v2195_v48 = vsel %vm2135_vm13, %v2101_v37, 0.0  ;;  %vm2041_vm10 = vcmp.lt.s32.totalorder %v5338_v25, 1024  ;;  %v1605_v35 = vmul.f32 %v3848_v42, %v1540_v12  ;;  %v4762_v60 = vpop.xlane.xlu1 %1208 }
 0x41c   : > { %2858 = vlog2.f32 %v1197_v38  ;;  %v1844_v20 = vmul.f32 %v3889_v30, %v1779_v52  ;;  %v1715_v9 = vmul.f32 1.442695, %v1603_v46  ;;  %v1339_v39 = vmul.f32 0.6931472, %v2841_v53  ;;  %v5339_v38 = vld [vmem:[#allocation22_spill] sm:$0xff]  ;;  %v5343_v52 = vld [vmem:[#allocation39_spill] sm:$0xff] }
 0x41d   : > { %2860 = vlog2.f32 %v4694_v8  ;;  %v2845_v51 = vpop.eup %2844  ;;  %v1854_v40 = vmul.f32 %v3889_v30, %v1789_v28  ;;  %v1791_v47 = vsub.f32 1.0, %v2837_v18  ;;  %v1845_v63 = vmul.f32 %v3889_v30, %v1780_v1 }
 0x41e   : > { %2862 = vlog2.f32 %v1201_v61  ;;  %v2847_v11 = vpop.eup %2846  ;;  %v2196_v32 = vadd.f32 %v2195_v48, %v2194_v5  ;;  %v1793_v4 = vsub.f32 1.0, %v2839_v7  ;;  %v1781_v59 = vsub.f32 1.0, %v2843_v49  ;;  %v5341_v61 = vld [vmem:[#allocation30_spill] sm:$0xff]  ;;  %v5344_v49 = vld [vmem:[#allocation40_spill] sm:$0xff]  ;;  %v4803_v48 = vpop.xlane.xlu0 %1222 }
 0x41f   : > { %vm2042_vm11 = vcmp.lt.s32.totalorder %v5339_v38, 1024  ;;  %v1313_v2 = vmul.f32 0.6931472, %v2845_v51  ;;  %v2197_v8 = vsel %vm2135_vm13, %v2102_v44, 0.0  ;;  %v4769_v43 = vsel %vm2135_vm13, %v2111_v34, 0.0  ;;  %v4788_v41 = vpop.xlane.xlu1 %1212  ;;  %v5346_v51 = vld [vmem:[#allocation12_spill] sm:$0xff] }
 0x420   : > { %v1719_v22 = vmul.f32 1.442695, %v1605_v35  ;;  %v4772_v50 = vadd.s32 448, %v3868_v31  ;;  %v2849_v45 = vpop.eup %2848  ;;  %v2103_v62 = vsel %vm2039_vm7, %v1844_v20, 0.0  ;;  %2864 = vpow2.f32 %v1715_v9  ;;  %v5345_v20 = vld [vmem:[#allocation33_spill] sm:$0xff]  ;;  %v5352_v38 = vld [vmem:[#allocation87_spill] sm:$0xff] }
 0x421   : > { %vm2043_vm12 = vcmp.lt.s32.totalorder %v5340_v58, 1024  ;;  %v1542_v14 = vsub.f32 %v1339_v39, %v5341_v61  ;;  %v1529_v21 = vsub.f32 %v1313_v2, %v5342_v19  ;;  %v2851_v17 = vpop.eup %2850  ;;  %v4781_v18 = vsel %vm2049_vm8, %v1854_v40, 0.0  ;;  %v5349_v19 = vld [vmem:[#allocation17_spill] sm:$0xff] }
 0x422   : > { %v4784_v13 = vmul.f32 %v3889_v30, %v1791_v47  ;;  %v2104_v46 = vsel %vm2040_vm9, %v1845_v63, 0.0  ;;  %v1782_v36 = vsub.f32 1.0, %v2847_v11  ;;  %v2853_v12 = vpop.eup %2852  ;;  %v4791_v7 = vmul.f32 %v3889_v30, %v1793_v4 }
 0x423   : > { %v2198_v23 = vadd.f32 %v2197_v8, %v2196_v32  ;;  %v1846_v37 = vmul.f32 %v3889_v30, %v1781_v59  ;;  %vm2044_vm14 = vcmp.lt.s32.totalorder %v5343_v52, 1024  ;;  %v1594_v26 = vmul.f32 %v3848_v42, %v1529_v21  ;;  %v2855_v53 = vpop.eup %2854  ;;  %v4808_v63 = vpop.xlane.xlu1 %766  ;;  %v5347_v32 = vld [vmem:[#allocation36_spill] sm:$0xff] }
 0x424   : > { %v2199_v28 = vsel %vm2135_vm13, %v2103_v62, 0.0  ;;  %2866 = vpow2.f32 %v1719_v22  ;;  %v1783_v15 = vsub.f32 1.0, %v2849_v45  ;;  %v1317_v10 = vmul.f32 0.6931472, %v2851_v17  ;;  %v2857_v1 = vpop.eup %2856  ;;  %v5348_v62 = vld [vmem:[#allocation16_spill] sm:$0xff] }
 0x425   : > { %v2201_v44 = vsel %vm2135_vm13, %v2104_v46, 0.0  ;;  %v4799_v34 = vmul.f32 %v3848_v42, %v1542_v14  ;;  %vm2045_vm15 = vcmp.lt.s32.totalorder %v5344_v49, 1024  ;;  %v1697_v5 = vmul.f32 1.442695, %v1594_v26 }
 0x426   : > { %2868 = vlog2.f32 %v4715_v3  ;;  %v2859_v35 = vpop.eup %2858  ;;  %vm2051_vm0 = vcmp.lt.s32.totalorder %v5345_v20, 1024  ;;  %v1847_v9 = vmul.f32 %v3889_v30, %v1782_v36  ;;  %v1784_v39 = vsub.f32 1.0, %v2853_v12 }
 0x427   : > { %v1531_v40 = vsub.f32 %v1317_v10, %v5346_v51  ;;  %v1321_v47 = vmul.f32 0.6931472, %v2855_v53  ;;  %v2861_v11 = vpop.eup %2860  ;;  %vm2053_vm1 = vcmp.lt.s32.totalorder %v5347_v32, 1024  ;;  %v2200_v4 = vadd.f32 %v2199_v28, %v2198_v23  ;;  %v4822_v23 = vpop.xlane.xlu1 %768  ;;  %v5350_v53 = vld [vmem:[#allocation41_spill] sm:$0xff]  ;;  %v5351_v10 = vld [vmem:[#allocation18_spill] sm:$0xff] }
 0x428   : > { %v2105_v3 = vsel %vm2041_vm10, %v1846_v37, 0.0  ;;  %2870 = vpow2.f32 %v1697_v5  ;;  %v1325_v59 = vmul.f32 0.6931472, %v2859_v35  ;;  %v2863_v2 = vpop.eup %2862  ;;  %v1848_v8 = vmul.f32 %v3889_v30, %v1783_v15 }
 0x429   : > { %v1785_v22 = vsub.f32 1.0, %v2857_v1  ;;  %v1596_v45 = vmul.f32 %v3848_v42, %v1531_v40  ;;  %v1533_v61 = vsub.f32 %v1321_v47, %v5348_v62  ;;  %v2202_v14 = vadd.f32 %v2201_v44, %v2200_v4  ;;  %v4828_v1 = vpop.xlane.xlu0 %1224 }
 0x42a   : > { %v1535_v21 = vsub.f32 %v1325_v59, %v5349_v19  ;;  %v1329_v17 = vmul.f32 0.6931472, %v2863_v2  ;;  %2872 = vlog2.f32 %v4746_v57  ;;  %v2106_v25 = vsel %vm2042_vm11, %v1847_v9, 0.0  ;;  %v2865_v37 = vpop.eup %2864  ;;  %v5353_v2 = vld [vmem:[#allocation31_spill] sm:$0xff] }
 0x42b   : > { %v1849_v46 = vmul.f32 %v3889_v30, %v1784_v39  ;;  %v1701_v36 = vmul.f32 1.442695, %v1596_v45  ;;  %v1598_v12 = vmul.f32 %v3848_v42, %v1533_v61  ;;  %v2203_v26 = vsel %vm2135_vm13, %v2105_v3, 0.0  ;;  %v771_v58 = vpop.xlane.xlu1 %770 }
 0x42c   : > { %vm2046_vm2 = vcmp.lt.s32.totalorder %v5350_v53, 1024  ;;  %v1343_v28 = vmul.f32 0.6931472, %v2861_v11  ;;  %v1600_v15 = vmul.f32 %v3848_v42, %v1535_v21  ;;  %v1537_v57 = vsub.f32 %v1329_v17, %v5351_v10  ;;  %v5355_v53 = vld [vmem:[#allocation43_spill] sm:$0xff] }
 0x42d   : > { %vm2055_vm3 = vcmp.lt.s32.totalorder %v5352_v38, 1024  ;;  %v2107_v44 = vsel %vm2043_vm12, %v1848_v8, 0.0  ;;  %v1850_v5 = vmul.f32 %v3889_v30, %v1785_v22  ;;  %2874 = vpow2.f32 %v1701_v36 }
 0x42e   : > { %v1705_v35 = vmul.f32 1.442695, %v1598_v12  ;;  %v2205_v9 = vsel %vm2135_vm13, %v2106_v25, 0.0  ;;  %v1709_v39 = vmul.f32 1.442695, %v1600_v15  ;;  %v1602_v51 = vmul.f32 %v3848_v42, %v1537_v57  ;;  %v2867_v40 = vpop.eup %2866 }
 0x42f   : > { %2876 = vlog2.f32 %v4762_v60  ;;  %v1795_v47 = vsub.f32 1.0, %v2865_v37  ;;  %v2204_v11 = vadd.f32 %v2203_v26, %v2202_v14  ;;  %v2108_v4 = vsel %vm2044_vm14, %v1849_v46, 0.0 }
 0x430   : > { %2878 = vpow2.f32 %v1705_v35  ;;  %v4839_v3 = vpop.eup %2868  ;;  %v2207_v59 = vsel %vm2135_vm13, %v2107_v44, 0.0  ;;  %v1544_v8 = vsub.f32 %v1343_v28, %v5353_v2  ;;  %v1713_v22 = vmul.f32 1.442695, %v1602_v51  ;;  %v5354_v28 = vld [vmem:[#allocation29_spill] sm:$0xff] }
 0x431   : > { %2880 = vpow2.f32 %v1709_v39  ;;  %v4845_v45 = vsel %vm2135_vm13, %v4781_v18, 0.0  ;;  %v2206_v60 = vadd.f32 %v2205_v9, %v2204_v11  ;;  %v2109_v62 = vsel %vm2045_vm15, %v1850_v5, 0.0  ;;  %v4856_v18 = vpop.xlane.xlu0 %1226 }
 0x432   : > { %vm2048_vm4 = vcmp.lt.s32.totalorder %v4571_v29, 1024  ;;  %2882 = vlog2.f32 %v4743_v54  ;;  %v2871_v52 = vpop.eup %2870  ;;  %v2115_v61 = vsel %vm2051_vm0, %v4784_v13, 0.0  ;;  %v2209_v14 = vsel %vm2135_vm13, %v2108_v4, 0.0  ;;  %v4863_v54 = vpop.xlane.xlu1 %772 }
 0x433   : > { %v1723_v19 = vmul.f32 1.442695, %v4799_v34  ;;  %2884 = vpow2.f32 %v1713_v22  ;;  %v2117_v49 = vsel %vm2053_vm1, %v4791_v7, 0.0  ;;  %v2208_v21 = vadd.f32 %v2207_v59, %v2206_v60 }
 0x434   : > { %v1786_v17 = vsub.f32 1.0, %v2871_v52  ;;  %vm2050_vm5 = vcmp.lt.s32.totalorder %v4577_v0, 1024  ;;  %2886 = vlog2.f32 %v4788_v41  ;;  %v2873_v13 = vpop.eup %2872  ;;  %v1860_v20 = vmul.f32 %v3889_v30, %v1795_v47 }
 0x435   : > { %v2211_v34 = vsel %vm2135_vm13, %v2109_v62, 0.0  ;;  %v1609_v25 = vmul.f32 %v3848_v42, %v1544_v8  ;;  %2888 = vlog2.f32 %v4765_v24  ;;  %v2210_v46 = vadd.f32 %v2209_v14, %v2208_v21  ;;  %v1229_v9 = vpop.xlane.xlu0 %1228 }
 0x436   : > { %v1851_v7 = vmul.f32 %v3889_v30, %v1786_v17  ;;  %vm2052_vm6 = vcmp.lt.s32.totalorder %v4580_v56, 1024  ;;  %v1333_v32 = vmul.f32 0.6931472, %v2873_v13  ;;  %2890 = vlog2.f32 %v4808_v63  ;;  %v4882_v10 = vpop.xlane.xlu1 %774  ;;  %v5357_v17 = vld [vmem:[#allocation23_spill] sm:$0xff] }
 0x437   : > { %v4873_v41 = vsel %vm2135_vm13, %v2115_v61, 0.0  ;;  %v4876_v36 = vsel %vm2135_vm13, %v2117_v49, 0.0  ;;  %v1797_v12 = vsub.f32 1.0, %v2867_v40  ;;  %2892 = vpow2.f32 %v1723_v19  ;;  %v2875_v37 = vpop.eup %2874  ;;  %v5356_v61 = vld [vmem:[#allocation85_spill] sm:$0xff] }
 0x438   : > { %v2212_v26 = vadd.f32 %v2211_v34, %v2210_v46  ;;  %v2110_v24 = vsel %vm2046_vm2, %v1851_v7, 0.0  ;;  %v1539_v15 = vsub.f32 %v1333_v32, %v5354_v28  ;;  %2894 = vlog2.f32 %v4822_v23 }
 0x439   : > { %v2877_v63 = vpop.eup %2876  ;;  %v4886_v57 = vsel %vm2055_vm3, %v1860_v20, 0.0  ;;  %v2213_v44 = vsel %vm2135_vm13, %v2110_v24, 0.0  ;;  %v1727_v5 = vmul.f32 1.442695, %v1609_v25  ;;  %v1788_v35 = vsub.f32 1.0, %v2875_v37  ;;  %v1231_v20 = vpop.xlane.xlu0 %1230 }
 0x43a   : > { %v2879_v39 = vpop.eup %2878  ;;  %v2214_v51 = vadd.f32 %v2213_v44, %v2212_v26  ;;  %vm2054_vm7 = vcmp.lt.s32.totalorder %v5355_v53, 1024  ;;  %2896 = vlog2.f32 %v4803_v48  ;;  %v1604_v23 = vmul.f32 %v3848_v42, %v1539_v15  ;;  %v777_v60 = vpop.xlane.xlu1 %776  ;;  %v5358_v15 = vld [vmem:[#allocation86_spill] sm:$0xff] }
 0x43b   : > { %v1337_v40 = vmul.f32 0.6931472, %v2877_v63  ;;  %v2881_v47 = vpop.eup %2880  ;;  %v4893_v11 = vmul.f32 %v3889_v30, %v1797_v12  ;;  %v1853_v38 = vmul.f32 %v3889_v30, %v1788_v35  ;;  %v1790_v4 = vsub.f32 1.0, %v2879_v39 }
 0x43c   : > { %2898 = vlog2.f32 %v771_v58  ;;  %v2883_v59 = vpop.eup %2882  ;;  %v2216_v2 = vadd.f32 %v4769_v43, %v2214_v51  ;;  %v1792_v8 = vsub.f32 1.0, %v2881_v47  ;;  %v1717_v22 = vmul.f32 1.442695, %v1604_v23 }
 0x43d   : > { %2900 = vlog2.f32 %v4828_v1  ;;  %v2885_v48 = vpop.eup %2884  ;;  %v2112_v62 = vsel %vm2048_vm4, %v1853_v38, 0.0  ;;  %v1855_v52 = vmul.f32 %v3889_v30, %v1790_v4  ;;  %v1541_v14 = vsub.f32 %v1337_v40, %v5356_v61 }
 0x43e   : > { %2902 = vpow2.f32 %v1727_v5  ;;  %v2887_v19 = vpop.eup %2886  ;;  %v2217_v58 = vsel %vm2135_vm13, %v2112_v62, 0.0  ;;  %v1857_v49 = vmul.f32 %v3889_v30, %v1792_v8  ;;  %v1794_v43 = vsub.f32 1.0, %v2885_v48  ;;  %v779_v32 = vpop.xlane.xlu1 %778 }
 0x43f   : > { %2904 = vpow2.f32 %v1717_v22  ;;  %v2889_v21 = vpop.eup %2888  ;;  %vm2057_vm8 = vcmp.lt.s32.totalorder %v5357_v17, 1024  ;;  %v2218_v1 = vadd.f32 %v2217_v58, %v2216_v2  ;;  %v2114_v13 = vsel %vm2050_vm5, %v1855_v52, 0.0 }
 0x440   : > { %v1606_v29 = vmul.f32 %v3848_v42, %v1541_v14  ;;  %2906 = vlog2.f32 %v4856_v18  ;;  %v2891_v34 = vpop.eup %2890  ;;  %v1345_v25 = vmul.f32 0.6931472, %v4839_v3  ;;  %v2221_v46 = vsel %vm2135_vm13, %v2114_v13, 0.0 }
 0x441   : > { %v1341_v7 = vmul.f32 0.6931472, %v2887_v19  ;;  %2908 = vlog2.f32 %v1229_v9  ;;  %v2893_v12 = vpop.eup %2892  ;;  %v2220_v37 = vadd.f32 %v4845_v45, %v2218_v1  ;;  %v2116_v0 = vsel %vm2052_vm6, %v1857_v49, 0.0  ;;  %v5359_v45 = vld [vmem:[#allocation8_spill] sm:$0xff]  ;;  %v1233_v49 = vpop.xlane.xlu0 %1232 }
 0x442   : > { %v1859_v26 = vmul.f32 %v3889_v30, %v1794_v43  ;;  %v1721_v24 = vmul.f32 1.442695, %v1606_v29  ;;  %v2895_v28 = vpop.eup %2894  ;;  %v1347_v18 = vmul.f32 0.6931472, %v2883_v59  ;;  %vm2056_vm9 = vcmp.lt.s32.totalorder %v4621_v27, 1024  ;;  %v781_v23 = vpop.xlane.xlu1 %780 }
 0x443   : > { %v1543_v3 = vsub.f32 %v1341_v7, %v5358_v15  ;;  %v1473_v63 = vmul.f32 0.6931472, %v2891_v34  ;;  %2910 = vlog2.f32 %v1231_v20  ;;  %v2222_v44 = vadd.f32 %v2221_v46, %v2220_v37 }
 0x444   : > { %v1349_v5 = vmul.f32 0.6931472, %v2889_v21  ;;  %2912 = vpow2.f32 %v1721_v24  ;;  %v1475_v35 = vmul.f32 0.6931472, %v2895_v28  ;;  %v2897_v9 = vpop.eup %2896  ;;  %vm2059_vm10 = vcmp.lt.s32.totalorder %v5359_v45, 1024 }
 0x445   : > { %v2225_v56 = vsel %vm2135_vm13, %v2116_v0, 0.0  ;;  %v1608_v39 = vmul.f32 %v3848_v42, %v1543_v3  ;;  %v1545_v51 = vsub.f32 %v1345_v25, %v1473_v63  ;;  %2914 = vlog2.f32 %v4863_v54 }
 0x446   : > { %v2899_v40 = vpop.eup %2898  ;;  %v2224_v47 = vadd.f32 %v4873_v41, %v2222_v44  ;;  %v2118_v38 = vsel %vm2054_vm7, %v1859_v26, 0.0  ;;  %v1546_v4 = vsub.f32 %v1347_v18, %v1475_v35  ;;  %2916 = vlog2.f32 %v4882_v10  ;;  %v783_v29 = vpop.xlane.xlu1 %782 }
 0x447   : > { %v2901_v59 = vpop.eup %2900  ;;  %v1725_v2 = vmul.f32 1.442695, %v1608_v39  ;;  %v1610_v8 = vmul.f32 %v3848_v42, %v1545_v51  ;;  %v1477_v22 = vmul.f32 0.6931472, %v2899_v40  ;;  %2918 = vlog2.f32 %v777_v60 }
 0x448   : > { %v4926_v48 = vpop.eup %2902  ;;  %v1799_v62 = vsub.f32 1.0, %v2893_v12  ;;  %v2226_v54 = vadd.f32 %v2225_v56, %v2224_v47  ;;  %vm2058_vm11 = vcmp.lt.s32.totalorder %v4632_v16, 1024  ;;  %v1611_v41 = vmul.f32 %v3848_v42, %v1546_v4  ;;  %v5360_v56 = vld [vmem:[#allocation42_spill] sm:$0xff] }
 0x449   : > { %2920 = vlog2.f32 %v779_v32  ;;  %v2905_v53 = vpop.eup %2904  ;;  %v2229_v52 = vsel %vm2135_vm13, %v2118_v38, 0.0  ;;  %v1729_v10 = vmul.f32 1.442695, %v1610_v8  ;;  %v1547_v61 = vsub.f32 %v1349_v5, %v1477_v22 }
 0x44a   : > { %2922 = vpow2.f32 %v1725_v2  ;;  %v2907_v14 = vpop.eup %2906  ;;  %v2228_v19 = vadd.f32 %v4876_v36, %v2226_v54  ;;  %v1796_v58 = vsub.f32 1.0, %v2905_v53  ;;  %v1731_v60 = vmul.f32 1.442695, %v1611_v41 }
 0x44b   : > { %2924 = vlog2.f32 %v781_v23  ;;  %v2909_v43 = vpop.eup %2908  ;;  %v2121_v21 = vsel %vm2057_vm8, %v4893_v11, 0.0  ;;  %v4937_v1 = vadd.s32 %v3879_v55, %v4753_v33  ;;  %v1612_v13 = vmul.f32 %v3848_v42, %v1547_v61 }
 0x44c   : > { %2926 = vpow2.f32 %v1729_v10  ;;  %v1864_v20 = vmul.f32 %v3889_v30, %v1799_v62  ;;  %v2230_v36 = vadd.f32 %v2229_v52, %v2228_v19  ;;  %v1861_v34 = vmul.f32 %v3889_v30, %v1796_v58 }
 0x44d   : > { %2928 = vpow2.f32 %v1731_v60  ;;  %v2911_v25 = vpop.eup %2910  ;;  %v2231_v46 = vsel %vm2135_vm13, %v4886_v57, 0.0  ;;  %vm2060_vm12 = vcmp.lt.s32.totalorder %v4731_v6, 1024  ;;  %v4947_v33 = vadd.s32 %v3879_v55, %v4772_v50 }
 0x44e   : > { %2930 = vlog2.f32 %v1233_v49  ;;  %v1733_v11 = vmul.f32 1.442695, %v1612_v13  ;;  %v2913_v17 = vpop.eup %2912  ;;  %v2120_v7 = vsel %vm2056_vm9, %v1861_v34, 0.0  ;;  %v2232_v32 = vadd.f32 %v2231_v46, %v2230_v36 }
 0x44f   : > { %v4952_v12 = vadd.s32 456, %v3868_v31  ;;  %2932 = vlog2.f32 %v783_v29  ;;  %v2915_v37 = vpop.eup %2914  ;;  %v2235_v57 = vsel %vm2135_vm13, %v2121_v21, 0.0  ;;  %v2233_v0 = vsel %vm2135_vm13, %v2120_v7, 0.0 }
 0x450   : > { %v1798_v26 = vsub.f32 1.0, %v2913_v17  ;;  %2934 = vpow2.f32 %v1733_v11  ;;  %v2917_v50 = vpop.eup %2916  ;;  %v2123_v24 = vsel %vm2059_vm10, %v1864_v20, 0.0  ;;  %v1351_v28 = vmul.f32 0.6931472, %v2897_v9 }
 0x451   : > { %v2234_v18 = vadd.f32 %v2233_v0, %v2232_v32  ;;  %v1479_v27 = vmul.f32 0.6931472, %v2915_v37  ;;  %v2919_v15 = vpop.eup %2918  ;;  %v1801_v3 = vsub.f32 1.0, %v4926_v48  ;;  %v1353_v63 = vmul.f32 0.6931472, %v2901_v59 }
 0x452   : > { %v1863_v44 = vmul.f32 %v3889_v30, %v1798_v26  ;;  %v1481_v5 = vmul.f32 0.6931472, %v2917_v50  ;;  %vm2061_vm14 = vcmp.lt.s32.totalorder %v5360_v56, 1024  ;;  %v1355_v51 = vmul.f32 0.6931472, %v2907_v14 }
 0x453   : > { %v2921_v35 = vpop.eup %2920  ;;  %v2236_v39 = vadd.f32 %v2235_v57, %v2234_v18  ;;  %v1548_v23 = vsub.f32 %v1351_v28, %v1479_v27  ;;  %v1483_v40 = vmul.f32 0.6931472, %v2919_v15  ;;  %v1357_v45 = vmul.f32 0.6931472, %v2909_v43 }
 0x454   : > { %v2923_v47 = vpop.eup %2922  ;;  %v2122_v9 = vsel %vm2058_vm11, %v1863_v44, 0.0  ;;  %v1549_v38 = vsub.f32 %v1353_v63, %v1481_v5  ;;  %v1485_v4 = vmul.f32 0.6931472, %v2921_v35  ;;  %v2239_v54 = vsel %vm2135_vm13, %v2123_v24, 0.0 }
 0x455   : > { %v2925_v2 = vpop.eup %2924  ;;  %v2237_v59 = vsel %vm2135_vm13, %v2122_v9, 0.0  ;;  %v1800_v8 = vsub.f32 1.0, %v2923_v47  ;;  %v1613_v22 = vmul.f32 %v3848_v42, %v1548_v23  ;;  %v1550_v48 = vsub.f32 %v1355_v51, %v1483_v40 }
 0x456   : > { %v2927_v62 = vpop.eup %2926  ;;  %v2238_v41 = vadd.f32 %v2237_v59, %v2236_v39  ;;  %v1614_v53 = vmul.f32 %v3848_v42, %v1549_v38  ;;  %v1551_v52 = vsub.f32 %v1357_v45, %v1485_v4  ;;  %v1866_v16 = vmul.f32 %v3889_v30, %v1801_v3 }
 0x457   : > { %v2929_v10 = vpop.eup %2928  ;;  %v1865_v61 = vmul.f32 %v3889_v30, %v1800_v8  ;;  %v1735_v14 = vmul.f32 1.442695, %v1613_v22  ;;  %v1615_v19 = vmul.f32 %v3848_v42, %v1550_v48  ;;  %v1802_v60 = vsub.f32 1.0, %v2927_v62 }
 0x458   : > { %v2931_v58 = vpop.eup %2930  ;;  %v1737_v49 = vmul.f32 1.442695, %v1614_v53  ;;  %v1616_v43 = vmul.f32 %v3848_v42, %v1551_v52  ;;  %v1487_v21 = vmul.f32 0.6931472, %v2925_v2  ;;  %v1359_v20 = vmul.f32 0.6931472, %v2911_v25 }
 0x459   : > { %v2933_v13 = vpop.eup %2932  ;;  %v2124_v29 = vsel %vm2060_vm12, %v1865_v61, 0.0  ;;  %2936 = vpow2.f32 %v1735_v14  ;;  %v1739_v36 = vmul.f32 1.442695, %v1615_v19  ;;  %v2240_v46 = vadd.f32 %v2239_v54, %v2238_v41 }
 0x45a   : > { %v2935_v34 = vpop.eup %2934  ;;  %v1803_v11 = vsub.f32 1.0, %v2929_v10  ;;  %2938 = vpow2.f32 %v1737_v49  ;;  %v1741_v17 = vmul.f32 1.442695, %v1616_v43  ;;  %v2241_v7 = vsel %vm2135_vm13, %v2124_v29, 0.0 }
 0x45b   : > { %vm2062_vm15 = vcmp.lt.s32.totalorder %v4937_v1, 1024  ;;  %v1936_v32 = vadd.s32 464, %v3868_v31  ;;  %2940 = vpow2.f32 %v1739_v36  ;;  %v1867_v37 = vmul.f32 %v3889_v30, %v1802_v60 }
 0x45c   : > { %v1804_v57 = vsub.f32 1.0, %v2935_v34  ;;  %2942 = vpow2.f32 %v1741_v17  ;;  %v1552_v6 = vsub.f32 %v1359_v20, %v1487_v21  ;;  %v1361_v25 = vmul.f32 0.6931472, %v2931_v58 }
 0x45d   : > { %v2000_v0 = vadd.s32 %v3879_v55, %v4952_v12  ;;  %v1489_v26 = vmul.f32 0.6931472, %v2933_v13  ;;  %v1937_v50 = vadd.s32 472, %v3868_v31  ;;  %v2125_v24 = vsel %vm2061_vm14, %v1866_v16, 0.0 }
 0x45e   : > { %v2242_v28 = vadd.f32 %v2241_v7, %v2240_v46  ;;  %v1868_v18 = vmul.f32 %v3889_v30, %v1803_v11  ;;  %v1617_v27 = vmul.f32 %v3848_v42, %v1552_v6  ;;  %vm2063_vm0 = vcmp.lt.s32.totalorder %v4947_v33, 1024 }
 0x45f   : > { %v1553_v15 = vsub.f32 %v1361_v25, %v1489_v26  ;;  %v1938_v3 = vadd.s32 480, %v3868_v31  ;;  %v2126_v63 = vsel %vm2062_vm15, %v1867_v37, 0.0  ;;  %v1869_v12 = vmul.f32 %v3889_v30, %v1804_v57 }
 0x460   : > { %v2001_v44 = vadd.s32 %v3879_v55, %v1936_v32  ;;  %v1743_v5 = vmul.f32 1.442695, %v1617_v27  ;;  %v2243_v35 = vsel %vm2135_vm13, %v2125_v24, 0.0  ;;  %vm2064_vm1 = vcmp.lt.s32.totalorder %v2000_v0, 1024 }
 0x461   : > { %v1618_v56 = vmul.f32 %v3848_v42, %v1553_v15  ;;  %v1939_v39 = vadd.s32 488, %v3868_v31  ;;  %v2244_v51 = vadd.f32 %v2243_v35, %v2242_v28  ;;  %v2127_v33 = vsel %vm2063_vm0, %v1868_v18, 0.0 }
 0x462   : > { %2944 = vpow2.f32 %v1743_v5  ;;  %v2002_v23 = vadd.s32 %v3879_v55, %v1937_v50  ;;  %v2245_v1 = vsel %vm2135_vm13, %v2126_v63, 0.0  ;;  %v2003_v9 = vadd.s32 %v3879_v55, %v1938_v3 }
 0x463   : > { %v2937_v40 = vpop.eup %2936  ;;  %v1745_v47 = vmul.f32 1.442695, %v1618_v56  ;;  %v2128_v38 = vsel %vm2064_vm1, %v1869_v12, 0.0  ;;  %vm2065_vm2 = vcmp.lt.s32.totalorder %v2001_v44, 1024  ;;  %v1940_v2 = vadd.s32 496, %v3868_v31 }
 0x464   : > { %v2939_v45 = vpop.eup %2938  ;;  %v1805_v4 = vsub.f32 1.0, %v2937_v40  ;;  %v2247_v59 = vsel %vm2135_vm13, %v2127_v33, 0.0  ;;  %v2004_v22 = vadd.s32 %v3879_v55, %v1939_v39  ;;  %v2246_v62 = vadd.f32 %v2245_v1, %v2244_v51 }
 0x465   : > { %v2941_v42 = vpop.eup %2940  ;;  %v1806_v8 = vsub.f32 1.0, %v2939_v45  ;;  %2946 = vpow2.f32 %v1745_v47  ;;  %vm2066_vm3 = vcmp.lt.s32.totalorder %v2002_v23, 1024  ;;  %v2249_v53 = vsel %vm2135_vm13, %v2128_v38, 0.0 }
 0x466   : > { %v2943_v48 = vpop.eup %2942  ;;  %v1870_v54 = vmul.f32 %v3889_v30, %v1805_v4  ;;  %v1807_v41 = vsub.f32 1.0, %v2941_v42  ;;  %vm2067_vm4 = vcmp.lt.s32.totalorder %v2003_v9, 1024  ;;  %v2248_v16 = vadd.f32 %v2247_v59, %v2246_v62 }
 0x467   : > { %v1871_v52 = vmul.f32 %v3889_v30, %v1806_v8  ;;  %v1808_v10 = vsub.f32 1.0, %v2943_v48  ;;  %v1941_v19 = vadd.s32 504, %v3868_v31  ;;  %vm2068_vm5 = vcmp.lt.s32.totalorder %v2004_v22, 1024 }
 0x468   : > { %v2129_v61 = vsel %vm2065_vm2, %v1870_v54, 0.0  ;;  %v1872_v14 = vmul.f32 %v3889_v30, %v1807_v41  ;;  %v2005_v43 = vadd.s32 %v3879_v55, %v1940_v2  ;;  %v2250_v13 = vadd.f32 %v2249_v53, %v2248_v16 }
 0x469   : > { %v1873_v58 = vmul.f32 %v3889_v30, %v1808_v10  ;;  %v2130_v60 = vsel %vm2066_vm3, %v1871_v52, 0.0  ;;  %v2251_v49 = vsel %vm2135_vm13, %v2129_v61, 0.0  ;;  %v2006_v11 = vadd.s32 %v3879_v55, %v1941_v19 }
 0x46a   : > { %v2131_v21 = vsel %vm2067_vm4, %v1872_v14, 0.0  ;;  %v2253_v29 = vsel %vm2135_vm13, %v2130_v60, 0.0  ;;  %v2252_v34 = vadd.f32 %v2251_v49, %v2250_v13  ;;  %vm2069_vm6 = vcmp.lt.s32.totalorder %v2005_v43, 1024 }
 0x46b   : > { %v2132_v36 = vsel %vm2068_vm5, %v1873_v58, 0.0  ;;  %v2255_v31 = vsel %vm2135_vm13, %v2131_v21, 0.0  ;;  %vm2070_vm7 = vcmp.lt.s32.totalorder %v2006_v11, 1024 }
 0x46c   : > { %v2945_v20 = vpop.eup %2944  ;;  %v2254_v17 = vadd.f32 %v2253_v29, %v2252_v34  ;;  %v2257_v37 = vsel %vm2135_vm13, %v2132_v36, 0.0 }
 0x46d   : > { %v1809_v46 = vsub.f32 1.0, %v2945_v20 }
 0x46e   : > { %v2256_v6 = vadd.f32 %v2255_v31, %v2254_v17 }
 0x46f   : > { %v2947_v7 = vpop.eup %2946  ;;  %v1874_v32 = vmul.f32 %v3889_v30, %v1809_v46 }
 0x470   : > { %v1810_v57 = vsub.f32 1.0, %v2947_v7  ;;  %v2258_v26 = vadd.f32 %v2257_v37, %v2256_v6 }
 0x471   : > { %v2133_v25 = vsel %vm2069_vm6, %v1874_v32, 0.0 }
 0x472   : > { %v1875_v0 = vmul.f32 %v3889_v30, %v1810_v57  ;;  %v2259_v50 = vsel %vm2135_vm13, %v2133_v25, 0.0 }
 0x473   : > { %v2260_v24 = vadd.f32 %v2259_v50, %v2258_v26 }
 0x474   : > { %v2134_v55 = vsel %vm2070_vm7, %v1875_v0, 0.0 }
 0x475   : > { %v2261_v28 = vsel %vm2135_vm13, %v2134_v55, 0.0 }
 0x476   : > { %v2262_v18 = vadd.f32 %v2261_v28, %v2260_v24 }
 0x478   : > { %2263 = vadd.xlane.f32.xlu1 %v2262_v18 }
 0x505   : > { %v2264_v27 = vpop.xlane.xlu1 %2263 }
 0x506   : > { %v2265_v15 = vrot.slane %v2264_v27, 4 }
 0x508   : > { %v2266_v3 = vadd.f32 %v2265_v15, %v2264_v27 }
 0x50a   : > { %v2267_v63 = vrot.slane %v2266_v3, 2 }
 0x50c   : > { %v2268_v12 = vadd.f32 %v2267_v63, %v2266_v3 }
 0x50e   : > { %v2269_v44 = vrot.slane %v2268_v12, 1 }
 0x510   : > { %v2270_v5 = vadd.f32 %v2269_v44, %v2268_v12 }
 0x512   : > { %2381 = vpush %v2270_v5 }
 0x543   : > { %s2382_s27 = spop %2381 }
 0x544   : > { %v2272_v30 = vstv %s2382_s27 }
 0x545   : > { %2273 = vst [vmem:[%s193_s24] sm:$0x1] %v2272_v30 }
 0x546   : > { %2985 = shalt.err (!%p2982_p2)
}
 0x547   : > { %s2986_s8 = scalar_lea.hbm %s5023_s30, 16  ;;  %s2990_s11 = scalar_lea.hbm %s5066_s3, 32 }
 0x548   : > { %p2987_p3 = scmp.ne.s32.totalorder %s5023_s30, %s2986_s8  ;;  %p2991_p8 = scmp.lt.u32.totalorder %s5023_s30, %s5066_s3 }
 0x549   : > { %p2992_p11 = scmp.lt.u32.totalorder %s2990_s11, %s2986_s8  ;;  %p2994_p10 = scmp.lt.u32.totalorder %s2986_s8, %s5023_s30 }
 0x54a   : > { %p2988_p4 = pnand %p2987_p3, %p3101_p5 }
 0x54b   : > { %p2993_p9 = por %p2992_p11, %p2991_p8 }
 0x54c   : > { %p2989_p7 = pneg %p2988_p4 }
 0x54d   : > { %p2995_p12 = por %p2994_p10, %p2993_p9 }
 0x54f   : > { %p2996_p13 = pnand %p2995_p12, %p2989_p7 }
 0x551   : > { %2999 = shalt.err (!%p2996_p13)
}
 0x552   : > { %2387 = dma.vmem_to_hbm [thread:$0]  (%p3101_p5), %s5018_s25, 16, %s5023_s30, %s2275_s4  }
 0x553 PF: > { %p2399_p0 = scmp.ge.s32.totalorder %s3038_s15, 2  ;;  %s2299_s20 = sand.u32 1, %s3026_s12  }
 0x554   : > { %s2300_s24 = scalar_lea.sflag [#allocation3], %s2299_s20 }
 0x555   : > { %p2394_p1 = pnand %p2399_p0, %p3105_p6 }
 0x557   : > { %3021 = dma.done.wait (!%p2394_p1), %s2300_s24, 16  }
 0x558   : > { %3023 = vsyncadd (!%p2394_p1), %s2300_s24, 4294967280  ;;  %p14_p2 = scmp.ge.s32.totalorder %s3088_s18, 4   ;;  %s5361_s12 = smov %s3030_s13 }
 0x559   : > { %s5362_s13 = smov %s3034_s14  ;;  %s5363_s14 = smov %s3099_s21 }
 0x55a   : > { %s5364_s15 = smov %s3088_s18  ;;  %16 = sbr.rel (!%p14_p2) target bundleno = 4 (0x4), region = 75 }
 0x561   :  { %2304 = vsyncpa [#allocation3], 1 }
 0x562   :  { %2306 = vsyncpa [#allocation3 + $0x1], 1 }
 0x563   :  { %2307 = vsyncpa [#allocation4], 1 }
 0x564   :  { %2309 = vsyncpa [#allocation4 + $0x1], 1 }

</bundles_post_ra>
